<compile_context>
chip_gen: v6e
topology: v6e:2x2x1
jax: 0.10.0
libtpu: 0.0.40
codegen_flags: <defaults>
</compile_context>

<pallas_src>
import functools
import math

import jax
import jax.numpy as jnp
from jax.experimental import pallas as pl
from jax.experimental.pallas import tpu as pltpu

F32 = jnp.float32
BF16 = jnp.bfloat16

# Tile caps (bf16 operands).  _pick_tile falls back to full (small) dims at
# demo shapes and to 128-wide tiles otherwise (v5e-safe; v7x VMEM budget OK:
# (2*tm*tk + 2*tk*tn + 3*tm*tn)*2B << 48 MiB at these caps).
TM, TN, TK = 256, 256, 1024
TLN = 512  # rows per standalone LayerNorm tile


def _round_up(x, m):
    return ((x + m - 1) // m) * m


def _pick_tile(n, cap, granule):
    """Largest tile <= cap; prefer one that divides n so no padding is needed."""
    if n <= cap:
        return n
    for t in range(cap, granule - 1, -granule):
        if n % t == 0:
            return t
    return cap  # requires padding


def _maybe_pad2(a, rows, cols):
    r, c = a.shape
    if r == rows and c == cols:
        return a
    return jnp.pad(a, ((0, rows - r), (0, cols - c)))


# --------------------------------------------------------------------------
# Tiled linear: matmul + bias [+ReLU] [+scale] [+residual] [+LayerNorm]
# --------------------------------------------------------------------------

def _linear_kernel(x_ref, w_ref, b_ref, *rest,
                   activation, has_scale, has_res, has_ln, eps):
    o_ref, acc_ref = rest[-2], rest[-1]
    pos = 0
    scale_ref = rest[pos] if has_scale else None
    pos += int(has_scale)
    res_ref = rest[pos] if has_res else None
    pos += int(has_res)
    if has_ln:
        g_ref, beta_ref = rest[pos], rest[pos + 1]

    k = pl.program_id(2)

    @pl.when(k == 0)
    def _():
        acc_ref[...] = jnp.zeros_like(acc_ref)

    # bf16 operands, f32 accumulation (MXU-native on v5e/v6e/v7x).
    acc_ref[...] += jnp.dot(x_ref[...].astype(BF16), w_ref[...].astype(BF16),
                            preferred_element_type=jnp.float32)

    @pl.when(k == pl.num_programs(2) - 1)
    def _():
        y = acc_ref[...] + b_ref[...].astype(jnp.float32)  # [1,tn] broadcasts
        if activation == "relu":
            y = jnp.maximum(y, 0.0)
        if has_scale:
            y = y * scale_ref[...].astype(jnp.float32)
        if has_res:
            y = y + res_ref[...].astype(jnp.float32)
        if has_ln:  # full row is in this block (tn == N); single-pass variance
            mu = jnp.mean(y, axis=-1, keepdims=True)
            var = jnp.maximum(jnp.mean(y * y, axis=-1, keepdims=True) - mu * mu, 0.0)
            y = (y - mu) * jax.lax.rsqrt(var + eps)
            y = y * g_ref[...] + beta_ref[...]
        o_ref[...] = y.astype(o_ref.dtype)


def pallas_linear(x, w, b, *, activation=None, scale=None, residual=None,
                  ln_gamma=None, ln_beta=None, ln_eps=1e-5, out_dtype=F32):
    M, K = x.shape
    _, N = w.shape
    has_ln = ln_gamma is not None
    has_res = residual is not None

    # Fused residual/LN epilogue needs the whole row in one N-block.
    if (has_ln or has_res) and N > TN:
        y = pallas_linear(x, w, b, activation=activation, scale=scale,
                          out_dtype=out_dtype)
        if has_ln:
            return pallas_layernorm(y, ln_gamma, ln_beta, residual=residual,
                                    eps=ln_eps)
        return y + residual

    tm = _pick_tile(M, TM, 8)
    tk = _pick_tile(K, TK, 128)
    tn = _pick_tile(N, TN, 128)
    Mp, Kp, Np = _round_up(M, tm), _round_up(K, tk), _round_up(N, tn)

    inputs = [_maybe_pad2(x, Mp, Kp), _maybe_pad2(w, Kp, Np),
              _maybe_pad2(b.reshape(1, N), 1, Np)]
    in_specs = [pl.BlockSpec((tm, tk), lambda i, j, k: (i, k)),
                pl.BlockSpec((tk, tn), lambda i, j, k: (k, j)),
                pl.BlockSpec((1, tn), lambda i, j, k: (0, j))]
    if scale is not None:
        inputs.append(_maybe_pad2(scale, Mp, Np))
        in_specs.append(pl.BlockSpec((tm, tn), lambda i, j, k: (i, j)))
    if has_res:
        inputs.append(_maybe_pad2(residual, Mp, Np))
        in_specs.append(pl.BlockSpec((tm, tn), lambda i, j, k: (i, j)))
    if has_ln:
        inputs += [ln_gamma, ln_beta]
        in_specs += [pl.BlockSpec((1, tn), lambda i, j, k: (0, j)),
                     pl.BlockSpec((1, tn), lambda i, j, k: (0, j))]

    out = pl.pallas_call(
        functools.partial(_linear_kernel, activation=activation,
                          has_scale=scale is not None, has_res=has_res,
                          has_ln=has_ln, eps=ln_eps),
        grid=(Mp // tm, Np // tn, Kp // tk),
        in_specs=in_specs,
        out_specs=pl.BlockSpec((tm, tn), lambda i, j, k: (i, j)),
        out_shape=jax.ShapeDtypeStruct((Mp, Np), out_dtype),
        scratch_shapes=[pltpu.VMEM((tm, tn), jnp.float32)],
        compiler_params=pltpu.CompilerParams(
            dimension_semantics=("parallel", "parallel", "arbitrary")),
    )(*inputs)
    if (Mp, Np) != (M, N):
        out = out[:M, :N]
    return out


# --------------------------------------------------------------------------
# Standalone LayerNorm (only used where there is no preceding matmul)
# --------------------------------------------------------------------------

def _ln_kernel(x_ref, g_ref, b_ref, o_ref, *, eps):
    x = x_ref[...].astype(jnp.float32)
    mu = jnp.mean(x, axis=-1, keepdims=True)
    var = jnp.maximum(jnp.mean(x * x, axis=-1, keepdims=True) - mu * mu, 0.0)
    y = (x - mu) * jax.lax.rsqrt(var + eps)
    o_ref[...] = (y * g_ref[...] + b_ref[...]).astype(o_ref.dtype)


def _add_ln_kernel(x_ref, r_ref, g_ref, b_ref, o_ref, *, eps):
    x = x_ref[...].astype(jnp.float32) + r_ref[...].astype(jnp.float32)
    mu = jnp.mean(x, axis=-1, keepdims=True)
    var = jnp.maximum(jnp.mean(x * x, axis=-1, keepdims=True) - mu * mu, 0.0)
    y = (x - mu) * jax.lax.rsqrt(var + eps)
    o_ref[...] = (y * g_ref[...] + b_ref[...]).astype(o_ref.dtype)


def pallas_layernorm(x, gamma, beta, residual=None, eps=1e-5):
    M, D = x.shape
    tm = _pick_tile(M, TLN, 8)
    Mp = _round_up(M, tm)
    xp = _maybe_pad2(x, Mp, D)

    row_spec = pl.BlockSpec((tm, D), lambda i: (i, 0))
    vec_spec = pl.BlockSpec((1, D), lambda i: (0, 0))

    if residual is None:
        kernel = functools.partial(_ln_kernel, eps=eps)
        in_specs = [row_spec, vec_spec, vec_spec]
        args = (xp, gamma, beta)
    else:
        rp = _maybe_pad2(residual, Mp, D)
        kernel = functools.partial(_add_ln_kernel, eps=eps)
        in_specs = [row_spec, row_spec, vec_spec, vec_spec]
        args = (xp, rp, gamma, beta)

    out = pl.pallas_call(
        kernel,
        grid=(Mp // tm,),
        in_specs=in_specs,
        out_specs=row_spec,
        out_shape=jax.ShapeDtypeStruct((Mp, D), F32),
        compiler_params=pltpu.CompilerParams(dimension_semantics=("parallel",)),
    )(*args)
    return out[:M] if Mp != M else out


# --------------------------------------------------------------------------
# Multi-head self-attention: grid over (batch, head), [B,H,S,Dh] layout
# --------------------------------------------------------------------------

def _mha_kernel(bias_ref, q_ref, k_ref, v_ref, o_ref, *, scale):
    # TODO(synk): for long sequences convert to a flash-style (q-tile, kv-tile)
    # grid with online softmax; a full [S, S] score tile is fine at these S.
    q = q_ref[0, 0].astype(BF16)               # [S, Dh]
    k = k_ref[0, 0].astype(BF16)
    v = v_ref[0, 0].astype(BF16)
    s = jax.lax.dot_general(q, k, (((1,), (1,)), ((), ())),
                            preferred_element_type=jnp.float32)
    s = s * scale + bias_ref[0]                 # additive key mask [1, S]
    s = s - jnp.max(s, axis=-1, keepdims=True)
    p = jnp.exp(s)
    # Exact normalization (avoids approx-reciprocal error vs the reference).
    # TODO(synk): fully-masked query rows give uniform attention over padded
    # keys rather than zeros (edge case only; demo mask is all ones).
    p = p / jnp.sum(p, axis=-1, keepdims=True)
    o = jax.lax.dot_general(p.astype(BF16), v, (((1,), (0,)), ((), ())),
                            preferred_element_type=jnp.float32)
    o_ref[0, 0] = o.astype(o_ref.dtype)


def pallas_mha(q2d, k2d, v2d, mask_bias, B, S, num_heads):
    D = q2d.shape[-1]
    Dh = D // num_heads
    scale = 1.0 / math.sqrt(Dh)

    def heads(x):  # [M, D] -> [B, H, S, Dh] (wrapper-side layout plumbing)
        return x.reshape(B, S, num_heads, Dh).transpose(0, 2, 1, 3)

    q, k, v = heads(q2d), heads(k2d), heads(v2d)
    xspec = pl.BlockSpec((1, 1, S, Dh), lambda b, h: (b, h, 0, 0))
    mspec = pl.BlockSpec((1, 1, S), lambda b, h: (b, 0, 0))
    out = pl.pallas_call(
        functools.partial(_mha_kernel, scale=scale),
        grid=(B, num_heads),
        in_specs=[mspec, xspec, xspec, xspec],
        out_specs=xspec,
        out_shape=jax.ShapeDtypeStruct((B, num_heads, S, Dh), F32),
        compiler_params=pltpu.CompilerParams(
            dimension_semantics=("parallel", "parallel")),
    )(mask_bias, q, k, v)
    return out.transpose(0, 2, 1, 3).reshape(B * S, D)


# --------------------------------------------------------------------------
# Complex AWGN channel: fused per-sample power norm + noise, single step
# --------------------------------------------------------------------------

def _channel_kernel(x_ref, n_ref, xn_ref, y_ref, *, sigma):
    # fading='none' -> h = 1.
    # TODO(synk): Rayleigh / Rician fading branches of ComplexWirelessChannel
    # are not implemented.
    # TODO(synk): power is averaged over all S positions including padded
    # tokens; differs from a reference that masks padding out of the estimate.
    x = x_ref[...].astype(jnp.float32)          # [B, S, T]: [real | imag] lanes
    Th = x.shape[-1] // 2
    xr = x[..., :Th]
    xi = x[..., Th:]
    p = jnp.mean(xr * xr + xi * xi, axis=-1, keepdims=True)   # [B, S, 1]
    p = jnp.mean(p, axis=1, keepdims=True)                    # [B, 1, 1]
    inv = jax.lax.rsqrt(p + 1e-8)
    xn = x * inv
    y = xn + sigma * n_ref[...].astype(jnp.float32)
    xn_ref[...] = xn.astype(xn_ref.dtype)
    y_ref[...] = y.astype(y_ref.dtype)


def pallas_channel(x, noise, snr_db):
    B, S, T = x.shape
    sigma = math.sqrt(1.0 / (2.0 * (10.0 ** (snr_db / 10.0))))  # per-component
    spec = pl.BlockSpec((B, S, T), lambda i: (0, 0, 0))
    shape = jax.ShapeDtypeStruct((B, S, T), F32)
    return pl.pallas_call(
        functools.partial(_channel_kernel, sigma=sigma),
        grid=(1,),
        in_specs=[spec, spec],
        out_specs=(spec, spec),
        out_shape=(shape, shape),
        compiler_params=pltpu.CompilerParams(dimension_semantics=("arbitrary",)),
    )(x, noise)


# --------------------------------------------------------------------------
# Parameter initialization (deterministic, synthetic; weights in bf16)
# --------------------------------------------------------------------------

def init_linear_params(key, fan_in, fan_out, dtype=BF16):
    w = jax.random.normal(key, (fan_in, fan_out), F32) * (1.0 / math.sqrt(fan_in))
    return {"w": w.astype(dtype), "b": jnp.zeros((1, fan_out), F32)}


def init_ln_params(dim):
    return {"g": jnp.ones((1, dim), F32), "b": jnp.zeros((1, dim), F32)}


def make_expert_sizes(ffn, num_experts):
    # Arithmetic progression of hidden sizes with mean == dim_feedforward.
    # TODO(synk): exact 'arithmetic' size schedule of HetereoMoETransformer unknown.
    sizes = []
    for e in range(num_experts):
        s = int(round(ffn * 2.0 * (e + 1) / (num_experts + 1)))
        sizes.append(max(8, _round_up(s, 8)))
    return tuple(sizes)


def init_moe_params(key, D, ffn, num_experts):
    sizes = make_expert_sizes(ffn, num_experts)
    H_total = sum(sizes)
    H_pad = _round_up(H_total, 128)            # pad expert concat ONCE at init
    ks = jax.random.split(key, 2 * num_experts + 1)
    w1s, w2s = [], []
    for e in range(num_experts):
        w1s.append(jax.random.normal(ks[2 * e], (D, sizes[e]), F32)
                   * (1.0 / math.sqrt(D)))
        w2s.append(jax.random.normal(ks[2 * e + 1], (sizes[e], D), F32)
                   * (1.0 / math.sqrt(sizes[e])))
    w1_cat = jnp.concatenate(w1s, axis=1)
    w2_cat = jnp.concatenate(w2s, axis=0)
    if H_pad > H_total:                         # exact: ReLU(0)=0, zero w2 rows
        w1_cat = jnp.pad(w1_cat, ((0, 0), (0, H_pad - H_total)))
        w2_cat = jnp.pad(w2_cat, ((0, H_pad - H_total), (0, 0)))
    return {
        "gate": init_linear_params(ks[-1], D, num_experts, dtype=F32),  # XLA gate
        "w1_cat": w1_cat.astype(BF16),
        "b1_cat": jnp.zeros((1, H_pad), F32),
        "w2_cat": w2_cat.astype(BF16),
        "b2_stack": jnp.zeros((num_experts, D), F32),
    }


def init_enc_layer(key, D, ffn, num_experts):
    k1, k2, k3 = jax.random.split(key, 3)
    return {"wqkv": init_linear_params(k1, D, 3 * D),
            "wo": init_linear_params(k2, D, D),
            "moe": init_moe_params(k3, D, ffn, num_experts),
            "ln1": init_ln_params(D), "ln2": init_ln_params(D)}


def init_dec_layer(key, D, ffn):
    k1, k2, k3, k4 = jax.random.split(key, 4)
    return {"wqkv": init_linear_params(k1, D, 3 * D),
            "wo": init_linear_params(k2, D, D),
            "ffn1": init_linear_params(k3, D, ffn),
            "ffn2": init_linear_params(k4, ffn, D),
            "ln1": init_ln_params(D), "ln2": init_ln_params(D)}


def init_model(key, *, num_tasks, embed_dim, task_dim, num_encd_layer, transmit_dim,
               num_experts, vocab_size, max_seq_len, num_dec_layers=4):
    D = embed_dim + task_dim
    ffn = D * 4
    keys = jax.random.split(key, 10)
    return {
        # TODO(synk): pretrained BERT text encoder replaced by token+position
        # embedding + LayerNorm (tokenization happens outside the model).
        "tok_emb": jax.random.normal(keys[0], (vocab_size, embed_dim), F32) * 0.02,
        "pos_emb": jax.random.normal(keys[1], (max_seq_len, embed_dim), F32) * 0.02,
        "text_ln": init_ln_params(embed_dim),
        "task_emb": jax.random.normal(keys[2], (num_tasks, task_dim), F32) * 0.02,
        "enc_layers": [init_enc_layer(k, D, ffn, num_experts)
                       for k in jax.random.split(keys[3], num_encd_layer)],
        "ch_enc1": init_linear_params(keys[4], D, ffn),
        "ch_enc2": init_linear_params(keys[5], ffn, transmit_dim),
        "ch_dec1": init_linear_params(keys[6], transmit_dim, ffn),
        "ch_dec2": init_linear_params(keys[7], ffn, D),
        "dec_layers": [init_dec_layer(k, D, ffn)
                       for k in jax.random.split(keys[8], num_dec_layers)],
        "head_w": (jax.random.normal(keys[9], (num_tasks, D, vocab_size), F32)
                   * (1.0 / math.sqrt(D))).astype(BF16),
        "head_b": jnp.zeros((num_tasks, 1, vocab_size), F32),
    }


# --------------------------------------------------------------------------
# Model blocks
# --------------------------------------------------------------------------

def _self_attention(x2d, mask_bias, p, B, S, D, H):
    qkv = pallas_linear(x2d, p["wqkv"]["w"], p["wqkv"]["b"])     # fused QKV
    q, k, v = qkv[:, :D], qkv[:, D:2 * D], qkv[:, 2 * D:]
    return pallas_mha(q, k, v, mask_bias, B, S, H)


def hetero_moe_ffn(x2d, moe, sizes, top_k):
    # TODO(synk): SNR-conditioned gating of HetereoMoETransformer not
    # replicated; the gate uses token features only.
    M = x2d.shape[0]
    E = len(sizes)
    H_total = sum(sizes)
    H_pad = moe["w1_cat"].shape[1]

    # Gate (E tiny): plain XLA — avoids a lane-sparse pallas output + extra launch.
    gate_logits = x2d @ moe["gate"]["w"] + moe["gate"]["b"]
    gate_scores = jax.nn.softmax(gate_logits, axis=-1)            # [M, E]
    _, top_idx = jax.lax.top_k(gate_scores, top_k)
    expert_mask = jnp.sum(jax.nn.one_hot(top_idx, E, dtype=F32), axis=1)
    sel = gate_scores * expert_mask
    sel = sel / (jnp.sum(sel, axis=-1, keepdims=True) + 1e-9)     # renorm top-k

    # Per-column gate scale over the concatenated expert hidden dims.
    cols = [jnp.broadcast_to(sel[:, e:e + 1], (M, sizes[e])) for e in range(E)]
    if H_pad > H_total:
        cols.append(jnp.zeros((M, H_pad - H_total), F32))
    scale = jnp.concatenate(cols, axis=-1)                        # [M, H_pad]

    # All experts in ONE up-projection matmul; ReLU + gate scale fused.
    h = pallas_linear(x2d, moe["w1_cat"], moe["b1_cat"],
                      activation="relu", scale=scale)
    bias_sel = sel @ moe["b2_stack"]                              # [M, D]
    return h, bias_sel, gate_scores, expert_mask


def moe_encoder_layer(x2d, mask_bias, p, B, S, D, H, sizes, top_k):
    attn = _self_attention(x2d, mask_bias, p, B, S, D, H)
    # Output projection with residual + LayerNorm fused into the epilogue.
    x2d = pallas_linear(attn, p["wo"]["w"], p["wo"]["b"], residual=x2d,
                        ln_gamma=p["ln1"]["g"], ln_beta=p["ln1"]["b"])
    h, bias_sel, gs, em = hetero_moe_ffn(x2d, p["moe"], sizes, top_k)
    # Down-projection (sums experts) with residual + LN fused.
    zero_b = jnp.zeros((1, D), F32)
    x2d = pallas_linear(h, p["moe"]["w2_cat"], zero_b,
                        residual=x2d + bias_sel,
                        ln_gamma=p["ln2"]["g"], ln_beta=p["ln2"]["b"])
    return x2d, gs, em


def decoder_layer(x2d, mask_bias, p, B, S, D, H):
    attn = _self_attention(x2d, mask_bias, p, B, S, D, H)
    x2d = pallas_linear(attn, p["wo"]["w"], p["wo"]["b"], residual=x2d,
                        ln_gamma=p["ln1"]["g"], ln_beta=p["ln1"]["b"])
    f = pallas_linear(x2d, p["ffn1"]["w"], p["ffn1"]["b"], activation="relu")
    x2d = pallas_linear(f, p["ffn2"]["w"], p["ffn2"]["b"], residual=x2d,
                        ln_gamma=p["ln2"]["g"], ln_beta=p["ln2"]["b"])
    return x2d


# --------------------------------------------------------------------------
# Forward pass
# --------------------------------------------------------------------------

def hetereo_moe_semcom_forward(params, input_ids, attn_mask, task_id, noise_key, *,
                               snr_db, fading, embed_dim, task_dim, num_heads,
                               num_experts, top_k):
    if fading != "none":
        # TODO(synk): Rayleigh/Rician fading not implemented (AWGN only).
        raise NotImplementedError("only fading='none' (AWGN) is implemented")

    B, S = input_ids.shape
    D = embed_dim + task_dim
    M = B * S
    sizes = make_expert_sizes(D * 4, num_experts)

    # --- text encoder (BERT stand-in) ---
    tok = params["tok_emb"][input_ids]                           # [B, S, embed_dim]
    pos = params["pos_emb"][:S][None, :, :]
    text_feat = pallas_layernorm((tok + pos).reshape(M, embed_dim),
                                 params["text_ln"]["g"], params["text_ln"]["b"])
    input_lengths = jnp.sum(attn_mask, axis=1)
    mask_f = attn_mask.astype(F32)
    mask_bias = ((1.0 - mask_f) * (-1e9)).reshape(B, 1, S)       # additive key mask

    # --- task prompt, fuse ---
    task_feat = jnp.broadcast_to(params["task_emb"][task_id][None, None, :],
                                 (B, S, task_dim))
    fused = jnp.concatenate([text_feat.reshape(B, S, embed_dim), task_feat], axis=-1)
    x = fused.reshape(M, D)

    # --- heterogeneous-MoE transformer encoder ---
    gate_scores_all, expert_masks_all = [], []
    E = num_experts
    for p in params["enc_layers"]:
        x, gs, em = moe_encoder_layer(x, mask_bias, p, B, S, D, num_heads,
                                      sizes, top_k)
        gate_scores_all.append(gs.reshape(B, S, E))
        expert_masks_all.append(em.reshape(B, S, E))
    encoder_gate_scores = jnp.stack(gate_scores_all)             # [L, B, S, E]
    encoder_expert_masks = jnp.stack(expert_masks_all)

    # --- channel encoder: Linear -> ReLU -> Linear ---
    ce = pallas_linear(x, params["ch_enc1"]["w"], params["ch_enc1"]["b"],
                       activation="relu")
    ce = pallas_linear(ce, params["ch_enc2"]["w"], params["ch_enc2"]["b"])   # [M, T]
    T = ce.shape[-1]
    Th = T // 2

    # --- physical channel (per-sample power norm + complex AWGN) ---
    noise = jax.random.normal(noise_key, (B, S, T), F32)
    xn, y = pallas_channel(ce.reshape(B, S, T), noise, snr_db)
    x_complex = xn[..., :Th] + 1j * xn[..., Th:]                 # [B, S, Th]
    y_noisy = y[..., :Th] + 1j * y[..., Th:]
    rx_signal = y.reshape(M, T)

    # --- channel decoder: Linear -> ReLU -> Linear ---
    cd = pallas_linear(rx_signal, params["ch_dec1"]["w"], params["ch_dec1"]["b"],
                       activation="relu")
    cd = pallas_linear(cd, params["ch_dec2"]["w"], params["ch_dec2"]["b"])   # [M, D]

    # --- semantic decoder (4-layer, 4-head self-attention stack) ---
    # TODO(synk): SemanticDecoder internals (target embedding / pos. encoding)
    # approximated by a self-attention stack over channel-decoded features.
    yfeat = cd
    zero_bias = jnp.zeros((B, 1, S), F32)
    for p in params["dec_layers"]:
        yfeat = decoder_layer(yfeat, zero_bias, p, B, S, D, 4)

    # --- multi-task output head ---
    hw = params["head_w"][task_id]
    hb = params["head_b"][task_id]
    logits = pallas_linear(yfeat, hw, hb)
    output = logits.reshape(B, S, hw.shape[-1])

    return (output, input_ids, input_lengths, x_complex, y_noisy,
            encoder_gate_scores, encoder_expert_masks)


# --------------------------------------------------------------------------
# Demo
# --------------------------------------------------------------------------

if __name__ == "__main__":
    B, S = 2, 8
    embed_dim, task_dim = 24, 8          # D = 32
    num_tasks = 3
    transmit_dim = 16
    num_encd_layer = 2
    num_heads = 4
    num_experts = 4
    top_k = 2
    vocab_size = 64
    max_seq_len = 64

    key = jax.random.PRNGKey(0)
    pkey, idkey, nkey = jax.random.split(key, 3)

    params = init_model(pkey, num_tasks=num_tasks, embed_dim=embed_dim,
                        task_dim=task_dim, num_encd_layer=num_encd_layer,
                        transmit_dim=transmit_dim, num_experts=num_experts,
                        vocab_size=vocab_size, max_seq_len=max_seq_len)

    # Deterministic stand-in for tokenized text (list of strings -> ids + mask).
    input_ids = jax.random.randint(idkey, (B, S), 0, vocab_size)
    attn_mask = jnp.ones((B, S), jnp.int32)
    task_id = 1
    snr_db = 15.0

    fwd = jax.jit(hetereo_moe_semcom_forward,
                  static_argnames=("snr_db", "fading", "embed_dim", "task_dim",
                                   "num_heads", "num_experts", "top_k"))
    out = fwd(params, input_ids, attn_mask, task_id, nkey,
              snr_db=snr_db, fading="none", embed_dim=embed_dim,
              task_dim=task_dim, num_heads=num_heads,
              num_experts=num_experts, top_k=top_k)
    out = jax.block_until_ready(out)
    (output, ids, lengths, x_complex, y_noisy,
     gate_scores, expert_masks) = out

    assert output.shape == (B, S, vocab_size)
    assert ids.shape == (B, S)
    assert lengths.shape == (B,)
    assert x_complex.shape == (B, S, transmit_dim // 2)
    assert y_noisy.shape == (B, S, transmit_dim // 2)
    assert gate_scores.shape == (num_encd_layer, B, S, num_experts)
    assert expert_masks.shape == (num_encd_layer, B, S, num_experts)
    assert bool(jnp.all(jnp.isfinite(output)))
    print("KERNEL_OK")
</pallas_src>

<mosaic_0001>
module attributes {stable_mosaic.version = 11 : i64} {
  func.func @_ln_kernel(%arg0: i32, %arg1: memref<16x24xf32, #tpu.memory_space<vmem>>, %arg2: memref<1x24xf32, #tpu.memory_space<vmem>>, %arg3: memref<1x24xf32, #tpu.memory_space<vmem>>, %arg4: memref<16x24xf32, #tpu.memory_space<vmem>>) attributes {dimension_semantics = [#tpu.dimension_semantics<parallel>], iteration_bounds = array<i64: 1>, scalar_prefetch = 0 : i64, scratch_operands = 0 : i64, tpu.core_type = #tpu.core_type<tc>, window_params = [{transform_indices = @transform_0, window_bounds = array<i64: 16, 24>}, {pipeline_mode = #tpu.pipeline_mode<synchronous>, transform_indices = @transform_1, window_bounds = array<i64: 1, 24>}, {pipeline_mode = #tpu.pipeline_mode<synchronous>, transform_indices = @transform_2, window_bounds = array<i64: 1, 24>}, {transform_indices = @transform_3, window_bounds = array<i64: 16, 24>}]} {
    %c0 = arith.constant 0 : index
    %c0_0 = arith.constant 0 : index
    %0 = vector.load %arg1[%c0, %c0_0] : memref<16x24xf32, #tpu.memory_space<vmem>>, vector<16x24xf32>
    %cst = arith.constant dense<0.000000e+00> : vector<16xf32>
    %1 = vector.multi_reduction <add>, %0, %cst [1] : vector<16x24xf32> to vector<16xf32>
    %2 = vector.shape_cast %1 : vector<16xf32> to vector<16x1xf32>
    %cst_1 = arith.constant 2.400000e+01 : f32
    %3 = vector.broadcast %cst_1 : f32 to vector<16x1xf32>
    %4 = arith.divf %2, %3 : vector<16x1xf32>
    %5 = arith.mulf %0, %0 : vector<16x24xf32>
    %cst_2 = arith.constant dense<0.000000e+00> : vector<16xf32>
    %6 = vector.multi_reduction <add>, %5, %cst_2 [1] : vector<16x24xf32> to vector<16xf32>
    %7 = vector.shape_cast %6 : vector<16xf32> to vector<16x1xf32>
    %cst_3 = arith.constant 2.400000e+01 : f32
    %8 = vector.broadcast %cst_3 : f32 to vector<16x1xf32>
    %9 = arith.divf %7, %8 : vector<16x1xf32>
    %10 = arith.mulf %4, %4 : vector<16x1xf32>
    %11 = arith.subf %9, %10 : vector<16x1xf32>
    %cst_4 = arith.constant 0.000000e+00 : f32
    %12 = vector.broadcast %cst_4 : f32 to vector<16x1xf32>
    %13 = arith.maximumf %11, %12 : vector<16x1xf32>
    %14 = vector.broadcast %4 : vector<16x1xf32> to vector<16x24xf32>
    %15 = arith.subf %0, %14 : vector<16x24xf32>
    %cst_5 = arith.constant 9.99999974E-6 : f32
    %16 = vector.broadcast %cst_5 : f32 to vector<16x1xf32>
    %17 = arith.addf %13, %16 : vector<16x1xf32>
    %18 = math.rsqrt %17 : vector<16x1xf32>
    %19 = vector.broadcast %18 : vector<16x1xf32> to vector<16x24xf32>
    %20 = arith.mulf %15, %19 : vector<16x24xf32>
    %c0_6 = arith.constant 0 : index
    %c0_7 = arith.constant 0 : index
    %21 = vector.load %arg2[%c0_6, %c0_7] : memref<1x24xf32, #tpu.memory_space<vmem>>, vector<1x24xf32>
    %22 = vector.broadcast %21 : vector<1x24xf32> to vector<16x24xf32>
    %23 = arith.mulf %20, %22 : vector<16x24xf32>
    %c0_8 = arith.constant 0 : index
    %c0_9 = arith.constant 0 : index
    %24 = vector.load %arg3[%c0_8, %c0_9] : memref<1x24xf32, #tpu.memory_space<vmem>>, vector<1x24xf32>
    %25 = vector.broadcast %24 : vector<1x24xf32> to vector<16x24xf32>
    %26 = arith.addf %23, %25 : vector<16x24xf32>
    %c0_10 = arith.constant 0 : index
    %c0_11 = arith.constant 0 : index
    %27 = vector.load %arg4[%c0_10, %c0_11] : memref<16x24xf32, #tpu.memory_space<vmem>>, vector<16x24xf32>
    tpu.vector_store %arg4[%c0_10, %c0_11], %26 {strides = array<i32>} : memref<16x24xf32, #tpu.memory_space<vmem>>, vector<16x24xf32>,
    return
  }
  func.func @transform_0(%arg0: i32) -> (i32, i32) {
    %c0_i32 = arith.constant 0 : i32
    %c0_i32_0 = arith.constant 0 : i32
    return %arg0, %c0_i32 : i32, i32
  }
  func.func @transform_1(%arg0: i32) -> (i32, i32) {
    %c0_i32 = arith.constant 0 : i32
    %c0_i32_0 = arith.constant 0 : i32
    %c0_i32_1 = arith.constant 0 : i32
    return %c0_i32, %c0_i32_0 : i32, i32
  }
  func.func @transform_2(%arg0: i32) -> (i32, i32) {
    %c0_i32 = arith.constant 0 : i32
    %c0_i32_0 = arith.constant 0 : i32
    %c0_i32_1 = arith.constant 0 : i32
    return %c0_i32, %c0_i32_0 : i32, i32
  }
  func.func @transform_3(%arg0: i32) -> (i32, i32) {
    %c0_i32 = arith.constant 0 : i32
    %c0_i32_0 = arith.constant 0 : i32
    return %arg0, %c0_i32 : i32, i32
  }
}

module attributes {stable_mosaic.version = 11 : i64} {
  func.func @_mha_kernel(%arg0: i32, %arg1: i32, %arg2: memref<1x1x8xf32, #tpu.memory_space<vmem>>, %arg3: memref<1x1x8x8xf32, #tpu.memory_space<vmem>>, %arg4: memref<1x1x8x8xf32, #tpu.memory_space<vmem>>, %arg5: memref<1x1x8x8xf32, #tpu.memory_space<vmem>>, %arg6: memref<1x1x8x8xf32, #tpu.memory_space<vmem>>) attributes {dimension_semantics = [#tpu.dimension_semantics<parallel>, #tpu.dimension_semantics<parallel>], iteration_bounds = array<i64: 2, 4>, scalar_prefetch = 0 : i64, scratch_operands = 0 : i64, tpu.core_type = #tpu.core_type<tc>, window_params = [{transform_indices = @transform_0, window_bounds = array<i64: 1, 1, 8>}, {transform_indices = @transform_1, window_bounds = array<i64: 1, 1, 8, 8>}, {transform_indices = @transform_2, window_bounds = array<i64: 1, 1, 8, 8>}, {transform_indices = @transform_3, window_bounds = array<i64: 1, 1, 8, 8>}, {transform_indices = @transform_4, window_bounds = array<i64: 1, 1, 8, 8>}]} {
    %c0 = arith.constant 0 : index
    %c0_0 = arith.constant 0 : index
    %c0_1 = arith.constant 0 : index
    %c0_2 = arith.constant 0 : index
    %0 = vector.load %arg3[%c0, %c0_0, %c0_1, %c0_2] : memref<1x1x8x8xf32, #tpu.memory_space<vmem>>, vector<1x1x8x8xf32>
    %1 = vector.shape_cast %0 : vector<1x1x8x8xf32> to vector<8x8xf32>
    %2 = arith.truncf %1 : vector<8x8xf32> to vector<8x8xbf16>
    %c0_3 = arith.constant 0 : index
    %c0_4 = arith.constant 0 : index
    %c0_5 = arith.constant 0 : index
    %c0_6 = arith.constant 0 : index
    %3 = vector.load %arg4[%c0_3, %c0_4, %c0_5, %c0_6] : memref<1x1x8x8xf32, #tpu.memory_space<vmem>>, vector<1x1x8x8xf32>
    %4 = vector.shape_cast %3 : vector<1x1x8x8xf32> to vector<8x8xf32>
    %5 = arith.truncf %4 : vector<8x8xf32> to vector<8x8xbf16>
    %c0_7 = arith.constant 0 : index
    %c0_8 = arith.constant 0 : index
    %c0_9 = arith.constant 0 : index
    %c0_10 = arith.constant 0 : index
    %6 = vector.load %arg5[%c0_7, %c0_8, %c0_9, %c0_10] : memref<1x1x8x8xf32, #tpu.memory_space<vmem>>, vector<1x1x8x8xf32>
    %7 = vector.shape_cast %6 : vector<1x1x8x8xf32> to vector<8x8xf32>
    %8 = arith.truncf %7 : vector<8x8xf32> to vector<8x8xbf16>
    %cst = arith.constant dense<0.000000e+00> : vector<8x8xf32>
    %9 = tpu.matmul %2, %5, %cst {dimension_numbers = #tpu.dot_dimension_numbers<[1], [1], [0], [0], [0, 0, 1, 0], [], []>} : vector<8x8xbf16>, vector<8x8xbf16>, vector<8x8xf32> -> vector<8x8xf32>
    %cst_11 = arith.constant 0.353553385 : f32
    %10 = vector.broadcast %cst_11 : f32 to vector<8x8xf32>
    %11 = arith.mulf %9, %10 : vector<8x8xf32>
    %c0_12 = arith.constant 0 : index
    %c0_13 = arith.constant 0 : index
    %c0_14 = arith.constant 0 : index
    %12 = vector.load %arg2[%c0_12, %c0_13, %c0_14] : memref<1x1x8xf32, #tpu.memory_space<vmem>>, vector<1x1x8xf32>
    %13 = vector.shape_cast %12 : vector<1x1x8xf32> to vector<1x8xf32>
    %14 = vector.broadcast %13 : vector<1x8xf32> to vector<8x8xf32>
    %15 = arith.addf %11, %14 : vector<8x8xf32>
    %cst_15 = arith.constant dense<0xFF800000> : vector<8xf32>
    %16 = vector.multi_reduction <maximumf>, %15, %cst_15 [1] : vector<8x8xf32> to vector<8xf32>
    %17 = vector.shape_cast %16 : vector<8xf32> to vector<8x1xf32>
    %18 = vector.broadcast %17 : vector<8x1xf32> to vector<8x8xf32>
    %19 = arith.subf %15, %18 : vector<8x8xf32>
    %20 = math.exp %19 : vector<8x8xf32>
    %cst_16 = arith.constant dense<0.000000e+00> : vector<8xf32>
    %21 = vector.multi_reduction <add>, %20, %cst_16 [1] : vector<8x8xf32> to vector<8xf32>
    %22 = vector.shape_cast %21 : vector<8xf32> to vector<8x1xf32>
    %23 = vector.broadcast %22 : vector<8x1xf32> to vector<8x8xf32>
    %24 = arith.divf %20, %23 : vector<8x8xf32>
    %25 = arith.truncf %24 : vector<8x8xf32> to vector<8x8xbf16>
    %cst_17 = arith.constant dense<0.000000e+00> : vector<8x8xf32>
    %26 = tpu.matmul %25, %8, %cst_17 {dimension_numbers = #tpu.dot_dimension_numbers<[1], [0], [0], [1], [0, 0, 1, 1], [], []>} : vector<8x8xbf16>, vector<8x8xbf16>, vector<8x8xf32> -> vector<8x8xf32>
    %c0_18 = arith.constant 0 : index
    %c0_19 = arith.constant 0 : index
    %c0_20 = arith.constant 0 : index
    %c0_21 = arith.constant 0 : index
    %27 = vector.load %arg6[%c0_18, %c0_19, %c0_20, %c0_21] : memref<1x1x8x8xf32, #tpu.memory_space<vmem>>, vector<1x1x8x8xf32>
    %28 = vector.shape_cast %27 : vector<1x1x8x8xf32> to vector<8x8xf32>
    %29 = vector.shape_cast %26 : vector<8x8xf32> to vector<1x1x8x8xf32>
    tpu.vector_store %arg6[%c0_18, %c0_19, %c0_20, %c0_21], %29 {strides = array<i32>} : memref<1x1x8x8xf32, #tpu.memory_space<vmem>>, vector<1x1x8x8xf32>,
    return
  }
  func.func @transform_0(%arg0: i32, %arg1: i32) -> (i32, i32, i32) {
    %c0_i32 = arith.constant 0 : i32
    %c0_i32_0 = arith.constant 0 : i32
    %c0_i32_1 = arith.constant 0 : i32
    return %arg0, %c0_i32, %c0_i32_0 : i32, i32, i32
  }
  func.func @transform_1(%arg0: i32, %arg1: i32) -> (i32, i32, i32, i32) {
    %c0_i32 = arith.constant 0 : i32
    %c0_i32_0 = arith.constant 0 : i32
    %c0_i32_1 = arith.constant 0 : i32
    return %arg0, %arg1, %c0_i32, %c0_i32_0 : i32, i32, i32, i32
  }
  func.func @transform_2(%arg0: i32, %arg1: i32) -> (i32, i32, i32, i32) {
    %c0_i32 = arith.constant 0 : i32
    %c0_i32_0 = arith.constant 0 : i32
    %c0_i32_1 = arith.constant 0 : i32
    return %arg0, %arg1, %c0_i32, %c0_i32_0 : i32, i32, i32, i32
  }
  func.func @transform_3(%arg0: i32, %arg1: i32) -> (i32, i32, i32, i32) {
    %c0_i32 = arith.constant 0 : i32
    %c0_i32_0 = arith.constant 0 : i32
    %c0_i32_1 = arith.constant 0 : i32
    return %arg0, %arg1, %c0_i32, %c0_i32_0 : i32, i32, i32, i32
  }
  func.func @transform_4(%arg0: i32, %arg1: i32) -> (i32, i32, i32, i32) {
    %c0_i32 = arith.constant 0 : i32
    %c0_i32_0 = arith.constant 0 : i32
    %c0_i32_1 = arith.constant 0 : i32
    return %arg0, %arg1, %c0_i32, %c0_i32_0 : i32, i32, i32, i32
  }
}

module attributes {stable_mosaic.version = 11 : i64} {
  func.func @_linear_kernel(%arg0: i32, %arg1: i32, %arg2: i32, %arg3: memref<16x32xf32, #tpu.memory_space<vmem>>, %arg4: memref<32x96xbf16, #tpu.memory_space<vmem>>, %arg5: memref<1x96xf32, #tpu.memory_space<vmem>>, %arg6: memref<16x96xf32, #tpu.memory_space<vmem>>, %arg7: memref<16x96xf32, #tpu.memory_space<vmem>>) attributes {dimension_semantics = [#tpu.dimension_semantics<parallel>, #tpu.dimension_semantics<parallel>, #tpu.dimension_semantics<arbitrary>], iteration_bounds = array<i64: 1, 1, 1>, scalar_prefetch = 0 : i64, scratch_operands = 1 : i64, tpu.core_type = #tpu.core_type<tc>, window_params = [{transform_indices = @transform_0, window_bounds = array<i64: 16, 32>}, {transform_indices = @transform_1, window_bounds = array<i64: 32, 96>}, {transform_indices = @transform_2, window_bounds = array<i64: 1, 96>}, {transform_indices = @transform_3, window_bounds = array<i64: 16, 96>}]} {
    %c0_i32 = arith.constant 0 : i32
    %0 = arith.cmpi eq, %arg2, %c0_i32 : i32
    %1 = arith.extui %0 : i1 to i32
    %c0_i32_0 = arith.constant 0 : i32
    %2 = arith.cmpi ne, %1, %c0_i32_0 : i32
    scf.if %2 {
      %cst_10 = arith.constant 0.000000e+00 : f32
      %13 = vector.broadcast %cst_10 : f32 to vector<16x96xf32>
      %c0_11 = arith.constant 0 : index
      %c0_12 = arith.constant 0 : index
      %14 = vector.load %arg7[%c0_11, %c0_12] : memref<16x96xf32, #tpu.memory_space<vmem>>, vector<16x96xf32>
      tpu.vector_store %arg7[%c0_11, %c0_12], %13 {strides = array<i32>} : memref<16x96xf32, #tpu.memory_space<vmem>>, vector<16x96xf32>,
    } else {
    }
    %c0 = arith.constant 0 : index
    %c0_1 = arith.constant 0 : index
    %3 = vector.load %arg7[%c0, %c0_1] : memref<16x96xf32, #tpu.memory_space<vmem>>, vector<16x96xf32>
    %c0_2 = arith.constant 0 : index
    %c0_3 = arith.constant 0 : index
    %4 = vector.load %arg3[%c0_2, %c0_3] : memref<16x32xf32, #tpu.memory_space<vmem>>, vector<16x32xf32>
    %5 = arith.truncf %4 : vector<16x32xf32> to vector<16x32xbf16>
    %c0_4 = arith.constant 0 : index
    %c0_5 = arith.constant 0 : index
    %6 = vector.load %arg4[%c0_4, %c0_5] : memref<32x96xbf16, #tpu.memory_space<vmem>>, vector<32x96xbf16>
    %cst = arith.constant dense<0.000000e+00> : vector<16x96xf32>
    %7 = tpu.matmul %5, %6, %cst {dimension_numbers = #tpu.dot_dimension_numbers<[1], [0], [0], [1], [0, 0, 1, 1], [], []>} : vector<16x32xbf16>, vector<32x96xbf16>, vector<16x96xf32> -> vector<16x96xf32>
    %8 = arith.addf %3, %7 : vector<16x96xf32>
    %c0_6 = arith.constant 0 : index
    %c0_7 = arith.constant 0 : index
    %9 = vector.load %arg7[%c0_6, %c0_7] : memref<16x96xf32, #tpu.memory_space<vmem>>, vector<16x96xf32>
    tpu.vector_store %arg7[%c0_6, %c0_7], %8 {strides = array<i32>} : memref<16x96xf32, #tpu.memory_space<vmem>>, vector<16x96xf32>,
    %c0_i32_8 = arith.constant 0 : i32
    %10 = arith.cmpi eq, %arg2, %c0_i32_8 : i32
    %11 = arith.extui %10 : i1 to i32
    %c0_i32_9 = arith.constant 0 : i32
    %12 = arith.cmpi ne, %11, %c0_i32_9 : i32
    scf.if %12 {
      %c0_10 = arith.constant 0 : index
      %c0_11 = arith.constant 0 : index
      %13 = vector.load %arg7[%c0_10, %c0_11] : memref<16x96xf32, #tpu.memory_space<vmem>>, vector<16x96xf32>
      %c0_12 = arith.constant 0 : index
      %c0_13 = arith.constant 0 : index
      %14 = vector.load %arg5[%c0_12, %c0_13] : memref<1x96xf32, #tpu.memory_space<vmem>>, vector<1x96xf32>
      %15 = vector.broadcast %14 : vector<1x96xf32> to vector<16x96xf32>
      %16 = arith.addf %13, %15 : vector<16x96xf32>
      %c0_14 = arith.constant 0 : index
      %c0_15 = arith.constant 0 : index
      %17 = vector.load %arg6[%c0_14, %c0_15] : memref<16x96xf32, #tpu.memory_space<vmem>>, vector<16x96xf32>
      tpu.vector_store %arg6[%c0_14, %c0_15], %16 {strides = array<i32>} : memref<16x96xf32, #tpu.memory_space<vmem>>, vector<16x96xf32>,
    } else {
    }
    return
  }
  func.func @transform_0(%arg0: i32, %arg1: i32, %arg2: i32) -> (i32, i32) {
    %c0_i32 = arith.constant 0 : i32
    return %arg0, %arg2 : i32, i32
  }
  func.func @transform_1(%arg0: i32, %arg1: i32, %arg2: i32) -> (i32, i32) {
    %c0_i32 = arith.constant 0 : i32
    return %arg2, %arg1 : i32, i32
  }
  func.func @transform_2(%arg0: i32, %arg1: i32, %arg2: i32) -> (i32, i32) {
    %c0_i32 = arith.constant 0 : i32
    %c0_i32_0 = arith.constant 0 : i32
    return %c0_i32, %arg1 : i32, i32
  }
  func.func @transform_3(%arg0: i32, %arg1: i32, %arg2: i32) -> (i32, i32) {
    %c0_i32 = arith.constant 0 : i32
    return %arg0, %arg1 : i32, i32
  }
}

module attributes {stable_mosaic.version = 11 : i64} {
  func.func @_linear_kernel(%arg0: i32, %arg1: i32, %arg2: i32, %arg3: memref<16x32xf32, #tpu.memory_space<vmem>>, %arg4: memref<32x32xbf16, #tpu.memory_space<vmem>>, %arg5: memref<1x32xf32, #tpu.memory_space<vmem>>, %arg6: memref<16x32xf32, #tpu.memory_space<vmem>>, %arg7: memref<1x32xf32, #tpu.memory_space<vmem>>, %arg8: memref<1x32xf32, #tpu.memory_space<vmem>>, %arg9: memref<16x32xf32, #tpu.memory_space<vmem>>, %arg10: memref<16x32xf32, #tpu.memory_space<vmem>>) attributes {dimension_semantics = [#tpu.dimension_semantics<parallel>, #tpu.dimension_semantics<parallel>, #tpu.dimension_semantics<arbitrary>], iteration_bounds = array<i64: 1, 1, 1>, scalar_prefetch = 0 : i64, scratch_operands = 1 : i64, tpu.core_type = #tpu.core_type<tc>, window_params = [{transform_indices = @transform_0, window_bounds = array<i64: 16, 32>}, {transform_indices = @transform_1, window_bounds = array<i64: 32, 32>}, {transform_indices = @transform_2, window_bounds = array<i64: 1, 32>}, {transform_indices = @transform_3, window_bounds = array<i64: 16, 32>}, {transform_indices = @transform_4, window_bounds = array<i64: 1, 32>}, {transform_indices = @transform_5, window_bounds = array<i64: 1, 32>}, {transform_indices = @transform_6, window_bounds = array<i64: 16, 32>}]} {
    %c0_i32 = arith.constant 0 : i32
    %0 = arith.cmpi eq, %arg2, %c0_i32 : i32
    %1 = arith.extui %0 : i1 to i32
    %c0_i32_0 = arith.constant 0 : i32
    %2 = arith.cmpi ne, %1, %c0_i32_0 : i32
    scf.if %2 {
      %cst_10 = arith.constant 0.000000e+00 : f32
      %13 = vector.broadcast %cst_10 : f32 to vector<16x32xf32>
      %c0_11 = arith.constant 0 : index
      %c0_12 = arith.constant 0 : index
      %14 = vector.load %arg10[%c0_11, %c0_12] : memref<16x32xf32, #tpu.memory_space<vmem>>, vector<16x32xf32>
      tpu.vector_store %arg10[%c0_11, %c0_12], %13 {strides = array<i32>} : memref<16x32xf32, #tpu.memory_space<vmem>>, vector<16x32xf32>,
    } else {
    }
    %c0 = arith.constant 0 : index
    %c0_1 = arith.constant 0 : index
    %3 = vector.load %arg10[%c0, %c0_1] : memref<16x32xf32, #tpu.memory_space<vmem>>, vector<16x32xf32>
    %c0_2 = arith.constant 0 : index
    %c0_3 = arith.constant 0 : index
    %4 = vector.load %arg3[%c0_2, %c0_3] : memref<16x32xf32, #tpu.memory_space<vmem>>, vector<16x32xf32>
    %5 = arith.truncf %4 : vector<16x32xf32> to vector<16x32xbf16>
    %c0_4 = arith.constant 0 : index
    %c0_5 = arith.constant 0 : index
    %6 = vector.load %arg4[%c0_4, %c0_5] : memref<32x32xbf16, #tpu.memory_space<vmem>>, vector<32x32xbf16>
    %cst = arith.constant dense<0.000000e+00> : vector<16x32xf32>
    %7 = tpu.matmul %5, %6, %cst {dimension_numbers = #tpu.dot_dimension_numbers<[1], [0], [0], [1], [0, 0, 1, 1], [], []>} : vector<16x32xbf16>, vector<32x32xbf16>, vector<16x32xf32> -> vector<16x32xf32>
    %8 = arith.addf %3, %7 : vector<16x32xf32>
    %c0_6 = arith.constant 0 : index
    %c0_7 = arith.constant 0 : index
    %9 = vector.load %arg10[%c0_6, %c0_7] : memref<16x32xf32, #tpu.memory_space<vmem>>, vector<16x32xf32>
    tpu.vector_store %arg10[%c0_6, %c0_7], %8 {strides = array<i32>} : memref<16x32xf32, #tpu.memory_space<vmem>>, vector<16x32xf32>,
    %c0_i32_8 = arith.constant 0 : i32
    %10 = arith.cmpi eq, %arg2, %c0_i32_8 : i32
    %11 = arith.extui %10 : i1 to i32
    %c0_i32_9 = arith.constant 0 : i32
    %12 = arith.cmpi ne, %11, %c0_i32_9 : i32
    scf.if %12 {
      %c0_10 = arith.constant 0 : index
      %c0_11 = arith.constant 0 : index
      %13 = vector.load %arg10[%c0_10, %c0_11] : memref<16x32xf32, #tpu.memory_space<vmem>>, vector<16x32xf32>
      %c0_12 = arith.constant 0 : index
      %c0_13 = arith.constant 0 : index
      %14 = vector.load %arg5[%c0_12, %c0_13] : memref<1x32xf32, #tpu.memory_space<vmem>>, vector<1x32xf32>
      %15 = vector.broadcast %14 : vector<1x32xf32> to vector<16x32xf32>
      %16 = arith.addf %13, %15 : vector<16x32xf32>
      %c0_14 = arith.constant 0 : index
      %c0_15 = arith.constant 0 : index
      %17 = vector.load %arg6[%c0_14, %c0_15] : memref<16x32xf32, #tpu.memory_space<vmem>>, vector<16x32xf32>
      %18 = arith.addf %16, %17 : vector<16x32xf32>
      %cst_16 = arith.constant dense<0.000000e+00> : vector<16xf32>
      %19 = vector.multi_reduction <add>, %18, %cst_16 [1] : vector<16x32xf32> to vector<16xf32>
      %20 = vector.shape_cast %19 : vector<16xf32> to vector<16x1xf32>
      %cst_17 = arith.constant 3.200000e+01 : f32
      %21 = vector.broadcast %cst_17 : f32 to vector<16x1xf32>
      %22 = arith.divf %20, %21 : vector<16x1xf32>
      %23 = arith.mulf %18, %18 : vector<16x32xf32>
      %cst_18 = arith.constant dense<0.000000e+00> : vector<16xf32>
      %24 = vector.multi_reduction <add>, %23, %cst_18 [1] : vector<16x32xf32> to vector<16xf32>
      %25 = vector.shape_cast %24 : vector<16xf32> to vector<16x1xf32>
      %cst_19 = arith.constant 3.200000e+01 : f32
      %26 = vector.broadcast %cst_19 : f32 to vector<16x1xf32>
      %27 = arith.divf %25, %26 : vector<16x1xf32>
      %28 = arith.mulf %22, %22 : vector<16x1xf32>
      %29 = arith.subf %27, %28 : vector<16x1xf32>
      %cst_20 = arith.constant 0.000000e+00 : f32
      %30 = vector.broadcast %cst_20 : f32 to vector<16x1xf32>
      %31 = arith.maximumf %29, %30 : vector<16x1xf32>
      %32 = vector.broadcast %22 : vector<16x1xf32> to vector<16x32xf32>
      %33 = arith.subf %18, %32 : vector<16x32xf32>
      %cst_21 = arith.constant 9.99999974E-6 : f32
      %34 = vector.broadcast %cst_21 : f32 to vector<16x1xf32>
      %35 = arith.addf %31, %34 : vector<16x1xf32>
      %36 = math.rsqrt %35 : vector<16x1xf32>
      %37 = vector.broadcast %36 : vector<16x1xf32> to vector<16x32xf32>
      %38 = arith.mulf %33, %37 : vector<16x32xf32>
      %c0_22 = arith.constant 0 : index
      %c0_23 = arith.constant 0 : index
      %39 = vector.load %arg7[%c0_22, %c0_23] : memref<1x32xf32, #tpu.memory_space<vmem>>, vector<1x32xf32>
      %40 = vector.broadcast %39 : vector<1x32xf32> to vector<16x32xf32>
      %41 = arith.mulf %38, %40 : vector<16x32xf32>
      %c0_24 = arith.constant 0 : index
      %c0_25 = arith.constant 0 : index
      %42 = vector.load %arg8[%c0_24, %c0_25] : memref<1x32xf32, #tpu.memory_space<vmem>>, vector<1x32xf32>
      %43 = vector.broadcast %42 : vector<1x32xf32> to vector<16x32xf32>
      %44 = arith.addf %41, %43 : vector<16x32xf32>
      %c0_26 = arith.constant 0 : index
      %c0_27 = arith.constant 0 : index
      %45 = vector.load %arg9[%c0_26, %c0_27] : memref<16x32xf32, #tpu.memory_space<vmem>>, vector<16x32xf32>
      tpu.vector_store %arg9[%c0_26, %c0_27], %44 {strides = array<i32>} : memref<16x32xf32, #tpu.memory_space<vmem>>, vector<16x32xf32>,
    } else {
    }
    return
  }
  func.func @transform_0(%arg0: i32, %arg1: i32, %arg2: i32) -> (i32, i32) {
    %c0_i32 = arith.constant 0 : i32
    return %arg0, %arg2 : i32, i32
  }
  func.func @transform_1(%arg0: i32, %arg1: i32, %arg2: i32) -> (i32, i32) {
    %c0_i32 = arith.constant 0 : i32
    return %arg2, %arg1 : i32, i32
  }
  func.func @transform_2(%arg0: i32, %arg1: i32, %arg2: i32) -> (i32, i32) {
    %c0_i32 = arith.constant 0 : i32
    %c0_i32_0 = arith.constant 0 : i32
    return %c0_i32, %arg1 : i32, i32
  }
  func.func @transform_3(%arg0: i32, %arg1: i32, %arg2: i32) -> (i32, i32) {
    %c0_i32 = arith.constant 0 : i32
    return %arg0, %arg1 : i32, i32
  }
  func.func @transform_4(%arg0: i32, %arg1: i32, %arg2: i32) -> (i32, i32) {
    %c0_i32 = arith.constant 0 : i32
    %c0_i32_0 = arith.constant 0 : i32
    return %c0_i32, %arg1 : i32, i32
  }
  func.func @transform_5(%arg0: i32, %arg1: i32, %arg2: i32) -> (i32, i32) {
    %c0_i32 = arith.constant 0 : i32
    %c0_i32_0 = arith.constant 0 : i32
    return %c0_i32, %arg1 : i32, i32
  }
  func.func @transform_6(%arg0: i32, %arg1: i32, %arg2: i32) -> (i32, i32) {
    %c0_i32 = arith.constant 0 : i32
    return %arg0, %arg1 : i32, i32
  }
}

module attributes {stable_mosaic.version = 11 : i64} {
  func.func @_linear_kernel(%arg0: i32, %arg1: i32, %arg2: i32, %arg3: memref<16x32xf32, #tpu.memory_space<vmem>>, %arg4: memref<32x128xbf16, #tpu.memory_space<vmem>>, %arg5: memref<1x128xf32, #tpu.memory_space<vmem>>, %arg6: memref<16x128xf32, #tpu.memory_space<vmem>>, %arg7: memref<16x128xf32, #tpu.memory_space<vmem>>, %arg8: memref<16x128xf32, #tpu.memory_space<vmem>>) attributes {dimension_semantics = [#tpu.dimension_semantics<parallel>, #tpu.dimension_semantics<parallel>, #tpu.dimension_semantics<arbitrary>], iteration_bounds = array<i64: 1, 5, 1>, scalar_prefetch = 0 : i64, scratch_operands = 1 : i64, tpu.core_type = #tpu.core_type<tc>, window_params = [{transform_indices = @transform_0, window_bounds = array<i64: 16, 32>}, {transform_indices = @transform_1, window_bounds = array<i64: 32, 128>}, {transform_indices = @transform_2, window_bounds = array<i64: 1, 128>}, {transform_indices = @transform_3, window_bounds = array<i64: 16, 128>}, {transform_indices = @transform_4, window_bounds = array<i64: 16, 128>}]} {
    %c0_i32 = arith.constant 0 : i32
    %0 = arith.cmpi eq, %arg2, %c0_i32 : i32
    %1 = arith.extui %0 : i1 to i32
    %c0_i32_0 = arith.constant 0 : i32
    %2 = arith.cmpi ne, %1, %c0_i32_0 : i32
    scf.if %2 {
      %cst_10 = arith.constant 0.000000e+00 : f32
      %13 = vector.broadcast %cst_10 : f32 to vector<16x128xf32>
      %c0_11 = arith.constant 0 : index
      %c0_12 = arith.constant 0 : index
      %14 = vector.load %arg8[%c0_11, %c0_12] : memref<16x128xf32, #tpu.memory_space<vmem>>, vector<16x128xf32>
      tpu.vector_store %arg8[%c0_11, %c0_12], %13 {strides = array<i32>} : memref<16x128xf32, #tpu.memory_space<vmem>>, vector<16x128xf32>,
    } else {
    }
    %c0 = arith.constant 0 : index
    %c0_1 = arith.constant 0 : index
    %3 = vector.load %arg8[%c0, %c0_1] : memref<16x128xf32, #tpu.memory_space<vmem>>, vector<16x128xf32>
    %c0_2 = arith.constant 0 : index
    %c0_3 = arith.constant 0 : index
    %4 = vector.load %arg3[%c0_2, %c0_3] : memref<16x32xf32, #tpu.memory_space<vmem>>, vector<16x32xf32>
    %5 = arith.truncf %4 : vector<16x32xf32> to vector<16x32xbf16>
    %c0_4 = arith.constant 0 : index
    %c0_5 = arith.constant 0 : index
    %6 = vector.load %arg4[%c0_4, %c0_5] : memref<32x128xbf16, #tpu.memory_space<vmem>>, vector<32x128xbf16>
    %cst = arith.constant dense<0.000000e+00> : vector<16x128xf32>
    %7 = tpu.matmul %5, %6, %cst {dimension_numbers = #tpu.dot_dimension_numbers<[1], [0], [0], [1], [0, 0, 1, 1], [], []>} : vector<16x32xbf16>, vector<32x128xbf16>, vector<16x128xf32> -> vector<16x128xf32>
    %8 = arith.addf %3, %7 : vector<16x128xf32>
    %c0_6 = arith.constant 0 : index
    %c0_7 = arith.constant 0 : index
    %9 = vector.load %arg8[%c0_6, %c0_7] : memref<16x128xf32, #tpu.memory_space<vmem>>, vector<16x128xf32>
    tpu.vector_store %arg8[%c0_6, %c0_7], %8 {strides = array<i32>} : memref<16x128xf32, #tpu.memory_space<vmem>>, vector<16x128xf32>,
    %c0_i32_8 = arith.constant 0 : i32
    %10 = arith.cmpi eq, %arg2, %c0_i32_8 : i32
    %11 = arith.extui %10 : i1 to i32
    %c0_i32_9 = arith.constant 0 : i32
    %12 = arith.cmpi ne, %11, %c0_i32_9 : i32
    scf.if %12 {
      %c0_10 = arith.constant 0 : index
      %c0_11 = arith.constant 0 : index
      %13 = vector.load %arg8[%c0_10, %c0_11] : memref<16x128xf32, #tpu.memory_space<vmem>>, vector<16x128xf32>
      %c0_12 = arith.constant 0 : index
      %c0_13 = arith.constant 0 : index
      %14 = vector.load %arg5[%c0_12, %c0_13] : memref<1x128xf32, #tpu.memory_space<vmem>>, vector<1x128xf32>
      %15 = vector.broadcast %14 : vector<1x128xf32> to vector<16x128xf32>
      %16 = arith.addf %13, %15 : vector<16x128xf32>
      %cst_14 = arith.constant 0.000000e+00 : f32
      %17 = vector.broadcast %cst_14 : f32 to vector<16x128xf32>
      %18 = arith.maximumf %16, %17 : vector<16x128xf32>
      %c0_15 = arith.constant 0 : index
      %c0_16 = arith.constant 0 : index
      %19 = vector.load %arg6[%c0_15, %c0_16] : memref<16x128xf32, #tpu.memory_space<vmem>>, vector<16x128xf32>
      %20 = arith.mulf %18, %19 : vector<16x128xf32>
      %c0_17 = arith.constant 0 : index
      %c0_18 = arith.constant 0 : index
      %21 = vector.load %arg7[%c0_17, %c0_18] : memref<16x128xf32, #tpu.memory_space<vmem>>, vector<16x128xf32>
      tpu.vector_store %arg7[%c0_17, %c0_18], %20 {strides = array<i32>} : memref<16x128xf32, #tpu.memory_space<vmem>>, vector<16x128xf32>,
    } else {
    }
    return
  }
  func.func @transform_0(%arg0: i32, %arg1: i32, %arg2: i32) -> (i32, i32) {
    %c0_i32 = arith.constant 0 : i32
    return %arg0, %arg2 : i32, i32
  }
  func.func @transform_1(%arg0: i32, %arg1: i32, %arg2: i32) -> (i32, i32) {
    %c0_i32 = arith.constant 0 : i32
    return %arg2, %arg1 : i32, i32
  }
  func.func @transform_2(%arg0: i32, %arg1: i32, %arg2: i32) -> (i32, i32) {
    %c0_i32 = arith.constant 0 : i32
    %c0_i32_0 = arith.constant 0 : i32
    return %c0_i32, %arg1 : i32, i32
  }
  func.func @transform_3(%arg0: i32, %arg1: i32, %arg2: i32) -> (i32, i32) {
    %c0_i32 = arith.constant 0 : i32
    return %arg0, %arg1 : i32, i32
  }
  func.func @transform_4(%arg0: i32, %arg1: i32, %arg2: i32) -> (i32, i32) {
    %c0_i32 = arith.constant 0 : i32
    return %arg0, %arg1 : i32, i32
  }
}

module attributes {stable_mosaic.version = 11 : i64} {
  func.func @_linear_kernel(%arg0: i32, %arg1: i32, %arg2: i32, %arg3: memref<16x640xf32, #tpu.memory_space<vmem>>, %arg4: memref<640x32xbf16, #tpu.memory_space<vmem>>, %arg5: memref<1x32xf32, #tpu.memory_space<vmem>>, %arg6: memref<16x32xf32, #tpu.memory_space<vmem>>, %arg7: memref<1x32xf32, #tpu.memory_space<vmem>>, %arg8: memref<1x32xf32, #tpu.memory_space<vmem>>, %arg9: memref<16x32xf32, #tpu.memory_space<vmem>>, %arg10: memref<16x32xf32, #tpu.memory_space<vmem>>) attributes {dimension_semantics = [#tpu.dimension_semantics<parallel>, #tpu.dimension_semantics<parallel>, #tpu.dimension_semantics<arbitrary>], iteration_bounds = array<i64: 1, 1, 1>, scalar_prefetch = 0 : i64, scratch_operands = 1 : i64, tpu.core_type = #tpu.core_type<tc>, window_params = [{transform_indices = @transform_0, window_bounds = array<i64: 16, 640>}, {transform_indices = @transform_1, window_bounds = array<i64: 640, 32>}, {transform_indices = @transform_2, window_bounds = array<i64: 1, 32>}, {transform_indices = @transform_3, window_bounds = array<i64: 16, 32>}, {transform_indices = @transform_4, window_bounds = array<i64: 1, 32>}, {transform_indices = @transform_5, window_bounds = array<i64: 1, 32>}, {transform_indices = @transform_6, window_bounds = array<i64: 16, 32>}]} {
    %c0_i32 = arith.constant 0 : i32
    %0 = arith.cmpi eq, %arg2, %c0_i32 : i32
    %1 = arith.extui %0 : i1 to i32
    %c0_i32_0 = arith.constant 0 : i32
    %2 = arith.cmpi ne, %1, %c0_i32_0 : i32
    scf.if %2 {
      %cst_10 = arith.constant 0.000000e+00 : f32
      %13 = vector.broadcast %cst_10 : f32 to vector<16x32xf32>
      %c0_11 = arith.constant 0 : index
      %c0_12 = arith.constant 0 : index
      %14 = vector.load %arg10[%c0_11, %c0_12] : memref<16x32xf32, #tpu.memory_space<vmem>>, vector<16x32xf32>
      tpu.vector_store %arg10[%c0_11, %c0_12], %13 {strides = array<i32>} : memref<16x32xf32, #tpu.memory_space<vmem>>, vector<16x32xf32>,
    } else {
    }
    %c0 = arith.constant 0 : index
    %c0_1 = arith.constant 0 : index
    %3 = vector.load %arg10[%c0, %c0_1] : memref<16x32xf32, #tpu.memory_space<vmem>>, vector<16x32xf32>
    %c0_2 = arith.constant 0 : index
    %c0_3 = arith.constant 0 : index
    %4 = vector.load %arg3[%c0_2, %c0_3] : memref<16x640xf32, #tpu.memory_space<vmem>>, vector<16x640xf32>
    %5 = arith.truncf %4 : vector<16x640xf32> to vector<16x640xbf16>
    %c0_4 = arith.constant 0 : index
    %c0_5 = arith.constant 0 : index
    %6 = vector.load %arg4[%c0_4, %c0_5] : memref<640x32xbf16, #tpu.memory_space<vmem>>, vector<640x32xbf16>
    %cst = arith.constant dense<0.000000e+00> : vector<16x32xf32>
    %7 = tpu.matmul %5, %6, %cst {dimension_numbers = #tpu.dot_dimension_numbers<[1], [0], [0], [1], [0, 0, 1, 1], [], []>} : vector<16x640xbf16>, vector<640x32xbf16>, vector<16x32xf32> -> vector<16x32xf32>
    %8 = arith.addf %3, %7 : vector<16x32xf32>
    %c0_6 = arith.constant 0 : index
    %c0_7 = arith.constant 0 : index
    %9 = vector.load %arg10[%c0_6, %c0_7] : memref<16x32xf32, #tpu.memory_space<vmem>>, vector<16x32xf32>
    tpu.vector_store %arg10[%c0_6, %c0_7], %8 {strides = array<i32>} : memref<16x32xf32, #tpu.memory_space<vmem>>, vector<16x32xf32>,
    %c0_i32_8 = arith.constant 0 : i32
    %10 = arith.cmpi eq, %arg2, %c0_i32_8 : i32
    %11 = arith.extui %10 : i1 to i32
    %c0_i32_9 = arith.constant 0 : i32
    %12 = arith.cmpi ne, %11, %c0_i32_9 : i32
    scf.if %12 {
      %c0_10 = arith.constant 0 : index
      %c0_11 = arith.constant 0 : index
      %13 = vector.load %arg10[%c0_10, %c0_11] : memref<16x32xf32, #tpu.memory_space<vmem>>, vector<16x32xf32>
      %c0_12 = arith.constant 0 : index
      %c0_13 = arith.constant 0 : index
      %14 = vector.load %arg5[%c0_12, %c0_13] : memref<1x32xf32, #tpu.memory_space<vmem>>, vector<1x32xf32>
      %15 = vector.broadcast %14 : vector<1x32xf32> to vector<16x32xf32>
      %16 = arith.addf %13, %15 : vector<16x32xf32>
      %c0_14 = arith.constant 0 : index
      %c0_15 = arith.constant 0 : index
      %17 = vector.load %arg6[%c0_14, %c0_15] : memref<16x32xf32, #tpu.memory_space<vmem>>, vector<16x32xf32>
      %18 = arith.addf %16, %17 : vector<16x32xf32>
      %cst_16 = arith.constant dense<0.000000e+00> : vector<16xf32>
      %19 = vector.multi_reduction <add>, %18, %cst_16 [1] : vector<16x32xf32> to vector<16xf32>
      %20 = vector.shape_cast %19 : vector<16xf32> to vector<16x1xf32>
      %cst_17 = arith.constant 3.200000e+01 : f32
      %21 = vector.broadcast %cst_17 : f32 to vector<16x1xf32>
      %22 = arith.divf %20, %21 : vector<16x1xf32>
      %23 = arith.mulf %18, %18 : vector<16x32xf32>
      %cst_18 = arith.constant dense<0.000000e+00> : vector<16xf32>
      %24 = vector.multi_reduction <add>, %23, %cst_18 [1] : vector<16x32xf32> to vector<16xf32>
      %25 = vector.shape_cast %24 : vector<16xf32> to vector<16x1xf32>
      %cst_19 = arith.constant 3.200000e+01 : f32
      %26 = vector.broadcast %cst_19 : f32 to vector<16x1xf32>
      %27 = arith.divf %25, %26 : vector<16x1xf32>
      %28 = arith.mulf %22, %22 : vector<16x1xf32>
      %29 = arith.subf %27, %28 : vector<16x1xf32>
      %cst_20 = arith.constant 0.000000e+00 : f32
      %30 = vector.broadcast %cst_20 : f32 to vector<16x1xf32>
      %31 = arith.maximumf %29, %30 : vector<16x1xf32>
      %32 = vector.broadcast %22 : vector<16x1xf32> to vector<16x32xf32>
      %33 = arith.subf %18, %32 : vector<16x32xf32>
      %cst_21 = arith.constant 9.99999974E-6 : f32
      %34 = vector.broadcast %cst_21 : f32 to vector<16x1xf32>
      %35 = arith.addf %31, %34 : vector<16x1xf32>
      %36 = math.rsqrt %35 : vector<16x1xf32>
      %37 = vector.broadcast %36 : vector<16x1xf32> to vector<16x32xf32>
      %38 = arith.mulf %33, %37 : vector<16x32xf32>
      %c0_22 = arith.constant 0 : index
      %c0_23 = arith.constant 0 : index
      %39 = vector.load %arg7[%c0_22, %c0_23] : memref<1x32xf32, #tpu.memory_space<vmem>>, vector<1x32xf32>
      %40 = vector.broadcast %39 : vector<1x32xf32> to vector<16x32xf32>
      %41 = arith.mulf %38, %40 : vector<16x32xf32>
      %c0_24 = arith.constant 0 : index
      %c0_25 = arith.constant 0 : index
      %42 = vector.load %arg8[%c0_24, %c0_25] : memref<1x32xf32, #tpu.memory_space<vmem>>, vector<1x32xf32>
      %43 = vector.broadcast %42 : vector<1x32xf32> to vector<16x32xf32>
      %44 = arith.addf %41, %43 : vector<16x32xf32>
      %c0_26 = arith.constant 0 : index
      %c0_27 = arith.constant 0 : index
      %45 = vector.load %arg9[%c0_26, %c0_27] : memref<16x32xf32, #tpu.memory_space<vmem>>, vector<16x32xf32>
      tpu.vector_store %arg9[%c0_26, %c0_27], %44 {strides = array<i32>} : memref<16x32xf32, #tpu.memory_space<vmem>>, vector<16x32xf32>,
    } else {
    }
    return
  }
  func.func @transform_0(%arg0: i32, %arg1: i32, %arg2: i32) -> (i32, i32) {
    %c0_i32 = arith.constant 0 : i32
    return %arg0, %arg2 : i32, i32
  }
  func.func @transform_1(%arg0: i32, %arg1: i32, %arg2: i32) -> (i32, i32) {
    %c0_i32 = arith.constant 0 : i32
    return %arg2, %arg1 : i32, i32
  }
  func.func @transform_2(%arg0: i32, %arg1: i32, %arg2: i32) -> (i32, i32) {
    %c0_i32 = arith.constant 0 : i32
    %c0_i32_0 = arith.constant 0 : i32
    return %c0_i32, %arg1 : i32, i32
  }
  func.func @transform_3(%arg0: i32, %arg1: i32, %arg2: i32) -> (i32, i32) {
    %c0_i32 = arith.constant 0 : i32
    return %arg0, %arg1 : i32, i32
  }
  func.func @transform_4(%arg0: i32, %arg1: i32, %arg2: i32) -> (i32, i32) {
    %c0_i32 = arith.constant 0 : i32
    %c0_i32_0 = arith.constant 0 : i32
    return %c0_i32, %arg1 : i32, i32
  }
  func.func @transform_5(%arg0: i32, %arg1: i32, %arg2: i32) -> (i32, i32) {
    %c0_i32 = arith.constant 0 : i32
    %c0_i32_0 = arith.constant 0 : i32
    return %c0_i32, %arg1 : i32, i32
  }
  func.func @transform_6(%arg0: i32, %arg1: i32, %arg2: i32) -> (i32, i32) {
    %c0_i32 = arith.constant 0 : i32
    return %arg0, %arg1 : i32, i32
  }
}

module attributes {stable_mosaic.version = 11 : i64} {
  func.func @_linear_kernel(%arg0: i32, %arg1: i32, %arg2: i32, %arg3: memref<16x32xf32, #tpu.memory_space<vmem>>, %arg4: memref<32x128xbf16, #tpu.memory_space<vmem>>, %arg5: memref<1x128xf32, #tpu.memory_space<vmem>>, %arg6: memref<16x128xf32, #tpu.memory_space<vmem>>, %arg7: memref<16x128xf32, #tpu.memory_space<vmem>>) attributes {dimension_semantics = [#tpu.dimension_semantics<parallel>, #tpu.dimension_semantics<parallel>, #tpu.dimension_semantics<arbitrary>], iteration_bounds = array<i64: 1, 1, 1>, scalar_prefetch = 0 : i64, scratch_operands = 1 : i64, tpu.core_type = #tpu.core_type<tc>, window_params = [{transform_indices = @transform_0, window_bounds = array<i64: 16, 32>}, {transform_indices = @transform_1, window_bounds = array<i64: 32, 128>}, {transform_indices = @transform_2, window_bounds = array<i64: 1, 128>}, {transform_indices = @transform_3, window_bounds = array<i64: 16, 128>}]} {
    %c0_i32 = arith.constant 0 : i32
    %0 = arith.cmpi eq, %arg2, %c0_i32 : i32
    %1 = arith.extui %0 : i1 to i32
    %c0_i32_0 = arith.constant 0 : i32
    %2 = arith.cmpi ne, %1, %c0_i32_0 : i32
    scf.if %2 {
      %cst_10 = arith.constant 0.000000e+00 : f32
      %13 = vector.broadcast %cst_10 : f32 to vector<16x128xf32>
      %c0_11 = arith.constant 0 : index
      %c0_12 = arith.constant 0 : index
      %14 = vector.load %arg7[%c0_11, %c0_12] : memref<16x128xf32, #tpu.memory_space<vmem>>, vector<16x128xf32>
      tpu.vector_store %arg7[%c0_11, %c0_12], %13 {strides = array<i32>} : memref<16x128xf32, #tpu.memory_space<vmem>>, vector<16x128xf32>,
    } else {
    }
    %c0 = arith.constant 0 : index
    %c0_1 = arith.constant 0 : index
    %3 = vector.load %arg7[%c0, %c0_1] : memref<16x128xf32, #tpu.memory_space<vmem>>, vector<16x128xf32>
    %c0_2 = arith.constant 0 : index
    %c0_3 = arith.constant 0 : index
    %4 = vector.load %arg3[%c0_2, %c0_3] : memref<16x32xf32, #tpu.memory_space<vmem>>, vector<16x32xf32>
    %5 = arith.truncf %4 : vector<16x32xf32> to vector<16x32xbf16>
    %c0_4 = arith.constant 0 : index
    %c0_5 = arith.constant 0 : index
    %6 = vector.load %arg4[%c0_4, %c0_5] : memref<32x128xbf16, #tpu.memory_space<vmem>>, vector<32x128xbf16>
    %cst = arith.constant dense<0.000000e+00> : vector<16x128xf32>
    %7 = tpu.matmul %5, %6, %cst {dimension_numbers = #tpu.dot_dimension_numbers<[1], [0], [0], [1], [0, 0, 1, 1], [], []>} : vector<16x32xbf16>, vector<32x128xbf16>, vector<16x128xf32> -> vector<16x128xf32>
    %8 = arith.addf %3, %7 : vector<16x128xf32>
    %c0_6 = arith.constant 0 : index
    %c0_7 = arith.constant 0 : index
    %9 = vector.load %arg7[%c0_6, %c0_7] : memref<16x128xf32, #tpu.memory_space<vmem>>, vector<16x128xf32>
    tpu.vector_store %arg7[%c0_6, %c0_7], %8 {strides = array<i32>} : memref<16x128xf32, #tpu.memory_space<vmem>>, vector<16x128xf32>,
    %c0_i32_8 = arith.constant 0 : i32
    %10 = arith.cmpi eq, %arg2, %c0_i32_8 : i32
    %11 = arith.extui %10 : i1 to i32
    %c0_i32_9 = arith.constant 0 : i32
    %12 = arith.cmpi ne, %11, %c0_i32_9 : i32
    scf.if %12 {
      %c0_10 = arith.constant 0 : index
      %c0_11 = arith.constant 0 : index
      %13 = vector.load %arg7[%c0_10, %c0_11] : memref<16x128xf32, #tpu.memory_space<vmem>>, vector<16x128xf32>
      %c0_12 = arith.constant 0 : index
      %c0_13 = arith.constant 0 : index
      %14 = vector.load %arg5[%c0_12, %c0_13] : memref<1x128xf32, #tpu.memory_space<vmem>>, vector<1x128xf32>
      %15 = vector.broadcast %14 : vector<1x128xf32> to vector<16x128xf32>
      %16 = arith.addf %13, %15 : vector<16x128xf32>
      %cst_14 = arith.constant 0.000000e+00 : f32
      %17 = vector.broadcast %cst_14 : f32 to vector<16x128xf32>
      %18 = arith.maximumf %16, %17 : vector<16x128xf32>
      %c0_15 = arith.constant 0 : index
      %c0_16 = arith.constant 0 : index
      %19 = vector.load %arg6[%c0_15, %c0_16] : memref<16x128xf32, #tpu.memory_space<vmem>>, vector<16x128xf32>
      tpu.vector_store %arg6[%c0_15, %c0_16], %18 {strides = array<i32>} : memref<16x128xf32, #tpu.memory_space<vmem>>, vector<16x128xf32>,
    } else {
    }
    return
  }
  func.func @transform_0(%arg0: i32, %arg1: i32, %arg2: i32) -> (i32, i32) {
    %c0_i32 = arith.constant 0 : i32
    return %arg0, %arg2 : i32, i32
  }
  func.func @transform_1(%arg0: i32, %arg1: i32, %arg2: i32) -> (i32, i32) {
    %c0_i32 = arith.constant 0 : i32
    return %arg2, %arg1 : i32, i32
  }
  func.func @transform_2(%arg0: i32, %arg1: i32, %arg2: i32) -> (i32, i32) {
    %c0_i32 = arith.constant 0 : i32
    %c0_i32_0 = arith.constant 0 : i32
    return %c0_i32, %arg1 : i32, i32
  }
  func.func @transform_3(%arg0: i32, %arg1: i32, %arg2: i32) -> (i32, i32) {
    %c0_i32 = arith.constant 0 : i32
    return %arg0, %arg1 : i32, i32
  }
}

module attributes {stable_mosaic.version = 11 : i64} {
  func.func @_linear_kernel(%arg0: i32, %arg1: i32, %arg2: i32, %arg3: memref<16x128xf32, #tpu.memory_space<vmem>>, %arg4: memref<128x16xbf16, #tpu.memory_space<vmem>>, %arg5: memref<1x16xf32, #tpu.memory_space<vmem>>, %arg6: memref<16x16xf32, #tpu.memory_space<vmem>>, %arg7: memref<16x16xf32, #tpu.memory_space<vmem>>) attributes {dimension_semantics = [#tpu.dimension_semantics<parallel>, #tpu.dimension_semantics<parallel>, #tpu.dimension_semantics<arbitrary>], iteration_bounds = array<i64: 1, 1, 1>, scalar_prefetch = 0 : i64, scratch_operands = 1 : i64, tpu.core_type = #tpu.core_type<tc>, window_params = [{transform_indices = @transform_0, window_bounds = array<i64: 16, 128>}, {transform_indices = @transform_1, window_bounds = array<i64: 128, 16>}, {transform_indices = @transform_2, window_bounds = array<i64: 1, 16>}, {transform_indices = @transform_3, window_bounds = array<i64: 16, 16>}]} {
    %c0_i32 = arith.constant 0 : i32
    %0 = arith.cmpi eq, %arg2, %c0_i32 : i32
    %1 = arith.extui %0 : i1 to i32
    %c0_i32_0 = arith.constant 0 : i32
    %2 = arith.cmpi ne, %1, %c0_i32_0 : i32
    scf.if %2 {
      %cst_10 = arith.constant 0.000000e+00 : f32
      %13 = vector.broadcast %cst_10 : f32 to vector<16x16xf32>
      %c0_11 = arith.constant 0 : index
      %c0_12 = arith.constant 0 : index
      %14 = vector.load %arg7[%c0_11, %c0_12] : memref<16x16xf32, #tpu.memory_space<vmem>>, vector<16x16xf32>
      tpu.vector_store %arg7[%c0_11, %c0_12], %13 {strides = array<i32>} : memref<16x16xf32, #tpu.memory_space<vmem>>, vector<16x16xf32>,
    } else {
    }
    %c0 = arith.constant 0 : index
    %c0_1 = arith.constant 0 : index
    %3 = vector.load %arg7[%c0, %c0_1] : memref<16x16xf32, #tpu.memory_space<vmem>>, vector<16x16xf32>
    %c0_2 = arith.constant 0 : index
    %c0_3 = arith.constant 0 : index
    %4 = vector.load %arg3[%c0_2, %c0_3] : memref<16x128xf32, #tpu.memory_space<vmem>>, vector<16x128xf32>
    %5 = arith.truncf %4 : vector<16x128xf32> to vector<16x128xbf16>
    %c0_4 = arith.constant 0 : index
    %c0_5 = arith.constant 0 : index
    %6 = vector.load %arg4[%c0_4, %c0_5] : memref<128x16xbf16, #tpu.memory_space<vmem>>, vector<128x16xbf16>
    %cst = arith.constant dense<0.000000e+00> : vector<16x16xf32>
    %7 = tpu.matmul %5, %6, %cst {dimension_numbers = #tpu.dot_dimension_numbers<[1], [0], [0], [1], [0, 0, 1, 1], [], []>} : vector<16x128xbf16>, vector<128x16xbf16>, vector<16x16xf32> -> vector<16x16xf32>
    %8 = arith.addf %3, %7 : vector<16x16xf32>
    %c0_6 = arith.constant 0 : index
    %c0_7 = arith.constant 0 : index
    %9 = vector.load %arg7[%c0_6, %c0_7] : memref<16x16xf32, #tpu.memory_space<vmem>>, vector<16x16xf32>
    tpu.vector_store %arg7[%c0_6, %c0_7], %8 {strides = array<i32>} : memref<16x16xf32, #tpu.memory_space<vmem>>, vector<16x16xf32>,
    %c0_i32_8 = arith.constant 0 : i32
    %10 = arith.cmpi eq, %arg2, %c0_i32_8 : i32
    %11 = arith.extui %10 : i1 to i32
    %c0_i32_9 = arith.constant 0 : i32
    %12 = arith.cmpi ne, %11, %c0_i32_9 : i32
    scf.if %12 {
      %c0_10 = arith.constant 0 : index
      %c0_11 = arith.constant 0 : index
      %13 = vector.load %arg7[%c0_10, %c0_11] : memref<16x16xf32, #tpu.memory_space<vmem>>, vector<16x16xf32>
      %c0_12 = arith.constant 0 : index
      %c0_13 = arith.constant 0 : index
      %14 = vector.load %arg5[%c0_12, %c0_13] : memref<1x16xf32, #tpu.memory_space<vmem>>, vector<1x16xf32>
      %15 = vector.broadcast %14 : vector<1x16xf32> to vector<16x16xf32>
      %16 = arith.addf %13, %15 : vector<16x16xf32>
      %c0_14 = arith.constant 0 : index
      %c0_15 = arith.constant 0 : index
      %17 = vector.load %arg6[%c0_14, %c0_15] : memref<16x16xf32, #tpu.memory_space<vmem>>, vector<16x16xf32>
      tpu.vector_store %arg6[%c0_14, %c0_15], %16 {strides = array<i32>} : memref<16x16xf32, #tpu.memory_space<vmem>>, vector<16x16xf32>,
    } else {
    }
    return
  }
  func.func @transform_0(%arg0: i32, %arg1: i32, %arg2: i32) -> (i32, i32) {
    %c0_i32 = arith.constant 0 : i32
    return %arg0, %arg2 : i32, i32
  }
  func.func @transform_1(%arg0: i32, %arg1: i32, %arg2: i32) -> (i32, i32) {
    %c0_i32 = arith.constant 0 : i32
    return %arg2, %arg1 : i32, i32
  }
  func.func @transform_2(%arg0: i32, %arg1: i32, %arg2: i32) -> (i32, i32) {
    %c0_i32 = arith.constant 0 : i32
    %c0_i32_0 = arith.constant 0 : i32
    return %c0_i32, %arg1 : i32, i32
  }
  func.func @transform_3(%arg0: i32, %arg1: i32, %arg2: i32) -> (i32, i32) {
    %c0_i32 = arith.constant 0 : i32
    return %arg0, %arg1 : i32, i32
  }
}

module attributes {stable_mosaic.version = 11 : i64} {
  func.func @_linear_kernel(%arg0: i32, %arg1: i32, %arg2: i32, %arg3: memref<16x16xf32, #tpu.memory_space<vmem>>, %arg4: memref<16x128xbf16, #tpu.memory_space<vmem>>, %arg5: memref<1x128xf32, #tpu.memory_space<vmem>>, %arg6: memref<16x128xf32, #tpu.memory_space<vmem>>, %arg7: memref<16x128xf32, #tpu.memory_space<vmem>>) attributes {dimension_semantics = [#tpu.dimension_semantics<parallel>, #tpu.dimension_semantics<parallel>, #tpu.dimension_semantics<arbitrary>], iteration_bounds = array<i64: 1, 1, 1>, scalar_prefetch = 0 : i64, scratch_operands = 1 : i64, tpu.core_type = #tpu.core_type<tc>, window_params = [{transform_indices = @transform_0, window_bounds = array<i64: 16, 16>}, {transform_indices = @transform_1, window_bounds = array<i64: 16, 128>}, {transform_indices = @transform_2, window_bounds = array<i64: 1, 128>}, {transform_indices = @transform_3, window_bounds = array<i64: 16, 128>}]} {
    %c0_i32 = arith.constant 0 : i32
    %0 = arith.cmpi eq, %arg2, %c0_i32 : i32
    %1 = arith.extui %0 : i1 to i32
    %c0_i32_0 = arith.constant 0 : i32
    %2 = arith.cmpi ne, %1, %c0_i32_0 : i32
    scf.if %2 {
      %cst_10 = arith.constant 0.000000e+00 : f32
      %13 = vector.broadcast %cst_10 : f32 to vector<16x128xf32>
      %c0_11 = arith.constant 0 : index
      %c0_12 = arith.constant 0 : index
      %14 = vector.load %arg7[%c0_11, %c0_12] : memref<16x128xf32, #tpu.memory_space<vmem>>, vector<16x128xf32>
      tpu.vector_store %arg7[%c0_11, %c0_12], %13 {strides = array<i32>} : memref<16x128xf32, #tpu.memory_space<vmem>>, vector<16x128xf32>,
    } else {
    }
    %c0 = arith.constant 0 : index
    %c0_1 = arith.constant 0 : index
    %3 = vector.load %arg7[%c0, %c0_1] : memref<16x128xf32, #tpu.memory_space<vmem>>, vector<16x128xf32>
    %c0_2 = arith.constant 0 : index
    %c0_3 = arith.constant 0 : index
    %4 = vector.load %arg3[%c0_2, %c0_3] : memref<16x16xf32, #tpu.memory_space<vmem>>, vector<16x16xf32>
    %5 = arith.truncf %4 : vector<16x16xf32> to vector<16x16xbf16>
    %c0_4 = arith.constant 0 : index
    %c0_5 = arith.constant 0 : index
    %6 = vector.load %arg4[%c0_4, %c0_5] : memref<16x128xbf16, #tpu.memory_space<vmem>>, vector<16x128xbf16>
    %cst = arith.constant dense<0.000000e+00> : vector<16x128xf32>
    %7 = tpu.matmul %5, %6, %cst {dimension_numbers = #tpu.dot_dimension_numbers<[1], [0], [0], [1], [0, 0, 1, 1], [], []>} : vector<16x16xbf16>, vector<16x128xbf16>, vector<16x128xf32> -> vector<16x128xf32>
    %8 = arith.addf %3, %7 : vector<16x128xf32>
    %c0_6 = arith.constant 0 : index
    %c0_7 = arith.constant 0 : index
    %9 = vector.load %arg7[%c0_6, %c0_7] : memref<16x128xf32, #tpu.memory_space<vmem>>, vector<16x128xf32>
    tpu.vector_store %arg7[%c0_6, %c0_7], %8 {strides = array<i32>} : memref<16x128xf32, #tpu.memory_space<vmem>>, vector<16x128xf32>,
    %c0_i32_8 = arith.constant 0 : i32
    %10 = arith.cmpi eq, %arg2, %c0_i32_8 : i32
    %11 = arith.extui %10 : i1 to i32
    %c0_i32_9 = arith.constant 0 : i32
    %12 = arith.cmpi ne, %11, %c0_i32_9 : i32
    scf.if %12 {
      %c0_10 = arith.constant 0 : index
      %c0_11 = arith.constant 0 : index
      %13 = vector.load %arg7[%c0_10, %c0_11] : memref<16x128xf32, #tpu.memory_space<vmem>>, vector<16x128xf32>
      %c0_12 = arith.constant 0 : index
      %c0_13 = arith.constant 0 : index
      %14 = vector.load %arg5[%c0_12, %c0_13] : memref<1x128xf32, #tpu.memory_space<vmem>>, vector<1x128xf32>
      %15 = vector.broadcast %14 : vector<1x128xf32> to vector<16x128xf32>
      %16 = arith.addf %13, %15 : vector<16x128xf32>
      %cst_14 = arith.constant 0.000000e+00 : f32
      %17 = vector.broadcast %cst_14 : f32 to vector<16x128xf32>
      %18 = arith.maximumf %16, %17 : vector<16x128xf32>
      %c0_15 = arith.constant 0 : index
      %c0_16 = arith.constant 0 : index
      %19 = vector.load %arg6[%c0_15, %c0_16] : memref<16x128xf32, #tpu.memory_space<vmem>>, vector<16x128xf32>
      tpu.vector_store %arg6[%c0_15, %c0_16], %18 {strides = array<i32>} : memref<16x128xf32, #tpu.memory_space<vmem>>, vector<16x128xf32>,
    } else {
    }
    return
  }
  func.func @transform_0(%arg0: i32, %arg1: i32, %arg2: i32) -> (i32, i32) {
    %c0_i32 = arith.constant 0 : i32
    return %arg0, %arg2 : i32, i32
  }
  func.func @transform_1(%arg0: i32, %arg1: i32, %arg2: i32) -> (i32, i32) {
    %c0_i32 = arith.constant 0 : i32
    return %arg2, %arg1 : i32, i32
  }
  func.func @transform_2(%arg0: i32, %arg1: i32, %arg2: i32) -> (i32, i32) {
    %c0_i32 = arith.constant 0 : i32
    %c0_i32_0 = arith.constant 0 : i32
    return %c0_i32, %arg1 : i32, i32
  }
  func.func @transform_3(%arg0: i32, %arg1: i32, %arg2: i32) -> (i32, i32) {
    %c0_i32 = arith.constant 0 : i32
    return %arg0, %arg1 : i32, i32
  }
}

module attributes {stable_mosaic.version = 11 : i64} {
  func.func @_linear_kernel(%arg0: i32, %arg1: i32, %arg2: i32, %arg3: memref<16x128xf32, #tpu.memory_space<vmem>>, %arg4: memref<128x32xbf16, #tpu.memory_space<vmem>>, %arg5: memref<1x32xf32, #tpu.memory_space<vmem>>, %arg6: memref<16x32xf32, #tpu.memory_space<vmem>>, %arg7: memref<1x32xf32, #tpu.memory_space<vmem>>, %arg8: memref<1x32xf32, #tpu.memory_space<vmem>>, %arg9: memref<16x32xf32, #tpu.memory_space<vmem>>, %arg10: memref<16x32xf32, #tpu.memory_space<vmem>>) attributes {dimension_semantics = [#tpu.dimension_semantics<parallel>, #tpu.dimension_semantics<parallel>, #tpu.dimension_semantics<arbitrary>], iteration_bounds = array<i64: 1, 1, 1>, scalar_prefetch = 0 : i64, scratch_operands = 1 : i64, tpu.core_type = #tpu.core_type<tc>, window_params = [{transform_indices = @transform_0, window_bounds = array<i64: 16, 128>}, {transform_indices = @transform_1, window_bounds = array<i64: 128, 32>}, {transform_indices = @transform_2, window_bounds = array<i64: 1, 32>}, {transform_indices = @transform_3, window_bounds = array<i64: 16, 32>}, {transform_indices = @transform_4, window_bounds = array<i64: 1, 32>}, {transform_indices = @transform_5, window_bounds = array<i64: 1, 32>}, {transform_indices = @transform_6, window_bounds = array<i64: 16, 32>}]} {
    %c0_i32 = arith.constant 0 : i32
    %0 = arith.cmpi eq, %arg2, %c0_i32 : i32
    %1 = arith.extui %0 : i1 to i32
    %c0_i32_0 = arith.constant 0 : i32
    %2 = arith.cmpi ne, %1, %c0_i32_0 : i32
    scf.if %2 {
      %cst_10 = arith.constant 0.000000e+00 : f32
      %13 = vector.broadcast %cst_10 : f32 to vector<16x32xf32>
      %c0_11 = arith.constant 0 : index
      %c0_12 = arith.constant 0 : index
      %14 = vector.load %arg10[%c0_11, %c0_12] : memref<16x32xf32, #tpu.memory_space<vmem>>, vector<16x32xf32>
      tpu.vector_store %arg10[%c0_11, %c0_12], %13 {strides = array<i32>} : memref<16x32xf32, #tpu.memory_space<vmem>>, vector<16x32xf32>,
    } else {
    }
    %c0 = arith.constant 0 : index
    %c0_1 = arith.constant 0 : index
    %3 = vector.load %arg10[%c0, %c0_1] : memref<16x32xf32, #tpu.memory_space<vmem>>, vector<16x32xf32>
    %c0_2 = arith.constant 0 : index
    %c0_3 = arith.constant 0 : index
    %4 = vector.load %arg3[%c0_2, %c0_3] : memref<16x128xf32, #tpu.memory_space<vmem>>, vector<16x128xf32>
    %5 = arith.truncf %4 : vector<16x128xf32> to vector<16x128xbf16>
    %c0_4 = arith.constant 0 : index
    %c0_5 = arith.constant 0 : index
    %6 = vector.load %arg4[%c0_4, %c0_5] : memref<128x32xbf16, #tpu.memory_space<vmem>>, vector<128x32xbf16>
    %cst = arith.constant dense<0.000000e+00> : vector<16x32xf32>
    %7 = tpu.matmul %5, %6, %cst {dimension_numbers = #tpu.dot_dimension_numbers<[1], [0], [0], [1], [0, 0, 1, 1], [], []>} : vector<16x128xbf16>, vector<128x32xbf16>, vector<16x32xf32> -> vector<16x32xf32>
    %8 = arith.addf %3, %7 : vector<16x32xf32>
    %c0_6 = arith.constant 0 : index
    %c0_7 = arith.constant 0 : index
    %9 = vector.load %arg10[%c0_6, %c0_7] : memref<16x32xf32, #tpu.memory_space<vmem>>, vector<16x32xf32>
    tpu.vector_store %arg10[%c0_6, %c0_7], %8 {strides = array<i32>} : memref<16x32xf32, #tpu.memory_space<vmem>>, vector<16x32xf32>,
    %c0_i32_8 = arith.constant 0 : i32
    %10 = arith.cmpi eq, %arg2, %c0_i32_8 : i32
    %11 = arith.extui %10 : i1 to i32
    %c0_i32_9 = arith.constant 0 : i32
    %12 = arith.cmpi ne, %11, %c0_i32_9 : i32
    scf.if %12 {
      %c0_10 = arith.constant 0 : index
      %c0_11 = arith.constant 0 : index
      %13 = vector.load %arg10[%c0_10, %c0_11] : memref<16x32xf32, #tpu.memory_space<vmem>>, vector<16x32xf32>
      %c0_12 = arith.constant 0 : index
      %c0_13 = arith.constant 0 : index
      %14 = vector.load %arg5[%c0_12, %c0_13] : memref<1x32xf32, #tpu.memory_space<vmem>>, vector<1x32xf32>
      %15 = vector.broadcast %14 : vector<1x32xf32> to vector<16x32xf32>
      %16 = arith.addf %13, %15 : vector<16x32xf32>
      %c0_14 = arith.constant 0 : index
      %c0_15 = arith.constant 0 : index
      %17 = vector.load %arg6[%c0_14, %c0_15] : memref<16x32xf32, #tpu.memory_space<vmem>>, vector<16x32xf32>
      %18 = arith.addf %16, %17 : vector<16x32xf32>
      %cst_16 = arith.constant dense<0.000000e+00> : vector<16xf32>
      %19 = vector.multi_reduction <add>, %18, %cst_16 [1] : vector<16x32xf32> to vector<16xf32>
      %20 = vector.shape_cast %19 : vector<16xf32> to vector<16x1xf32>
      %cst_17 = arith.constant 3.200000e+01 : f32
      %21 = vector.broadcast %cst_17 : f32 to vector<16x1xf32>
      %22 = arith.divf %20, %21 : vector<16x1xf32>
      %23 = arith.mulf %18, %18 : vector<16x32xf32>
      %cst_18 = arith.constant dense<0.000000e+00> : vector<16xf32>
      %24 = vector.multi_reduction <add>, %23, %cst_18 [1] : vector<16x32xf32> to vector<16xf32>
      %25 = vector.shape_cast %24 : vector<16xf32> to vector<16x1xf32>
      %cst_19 = arith.constant 3.200000e+01 : f32
      %26 = vector.broadcast %cst_19 : f32 to vector<16x1xf32>
      %27 = arith.divf %25, %26 : vector<16x1xf32>
      %28 = arith.mulf %22, %22 : vector<16x1xf32>
      %29 = arith.subf %27, %28 : vector<16x1xf32>
      %cst_20 = arith.constant 0.000000e+00 : f32
      %30 = vector.broadcast %cst_20 : f32 to vector<16x1xf32>
      %31 = arith.maximumf %29, %30 : vector<16x1xf32>
      %32 = vector.broadcast %22 : vector<16x1xf32> to vector<16x32xf32>
      %33 = arith.subf %18, %32 : vector<16x32xf32>
      %cst_21 = arith.constant 9.99999974E-6 : f32
      %34 = vector.broadcast %cst_21 : f32 to vector<16x1xf32>
      %35 = arith.addf %31, %34 : vector<16x1xf32>
      %36 = math.rsqrt %35 : vector<16x1xf32>
      %37 = vector.broadcast %36 : vector<16x1xf32> to vector<16x32xf32>
      %38 = arith.mulf %33, %37 : vector<16x32xf32>
      %c0_22 = arith.constant 0 : index
      %c0_23 = arith.constant 0 : index
      %39 = vector.load %arg7[%c0_22, %c0_23] : memref<1x32xf32, #tpu.memory_space<vmem>>, vector<1x32xf32>
      %40 = vector.broadcast %39 : vector<1x32xf32> to vector<16x32xf32>
      %41 = arith.mulf %38, %40 : vector<16x32xf32>
      %c0_24 = arith.constant 0 : index
      %c0_25 = arith.constant 0 : index
      %42 = vector.load %arg8[%c0_24, %c0_25] : memref<1x32xf32, #tpu.memory_space<vmem>>, vector<1x32xf32>
      %43 = vector.broadcast %42 : vector<1x32xf32> to vector<16x32xf32>
      %44 = arith.addf %41, %43 : vector<16x32xf32>
      %c0_26 = arith.constant 0 : index
      %c0_27 = arith.constant 0 : index
      %45 = vector.load %arg9[%c0_26, %c0_27] : memref<16x32xf32, #tpu.memory_space<vmem>>, vector<16x32xf32>
      tpu.vector_store %arg9[%c0_26, %c0_27], %44 {strides = array<i32>} : memref<16x32xf32, #tpu.memory_space<vmem>>, vector<16x32xf32>,
    } else {
    }
    return
  }
  func.func @transform_0(%arg0: i32, %arg1: i32, %arg2: i32) -> (i32, i32) {
    %c0_i32 = arith.constant 0 : i32
    return %arg0, %arg2 : i32, i32
  }
  func.func @transform_1(%arg0: i32, %arg1: i32, %arg2: i32) -> (i32, i32) {
    %c0_i32 = arith.constant 0 : i32
    return %arg2, %arg1 : i32, i32
  }
  func.func @transform_2(%arg0: i32, %arg1: i32, %arg2: i32) -> (i32, i32) {
    %c0_i32 = arith.constant 0 : i32
    %c0_i32_0 = arith.constant 0 : i32
    return %c0_i32, %arg1 : i32, i32
  }
  func.func @transform_3(%arg0: i32, %arg1: i32, %arg2: i32) -> (i32, i32) {
    %c0_i32 = arith.constant 0 : i32
    return %arg0, %arg1 : i32, i32
  }
  func.func @transform_4(%arg0: i32, %arg1: i32, %arg2: i32) -> (i32, i32) {
    %c0_i32 = arith.constant 0 : i32
    %c0_i32_0 = arith.constant 0 : i32
    return %c0_i32, %arg1 : i32, i32
  }
  func.func @transform_5(%arg0: i32, %arg1: i32, %arg2: i32) -> (i32, i32) {
    %c0_i32 = arith.constant 0 : i32
    %c0_i32_0 = arith.constant 0 : i32
    return %c0_i32, %arg1 : i32, i32
  }
  func.func @transform_6(%arg0: i32, %arg1: i32, %arg2: i32) -> (i32, i32) {
    %c0_i32 = arith.constant 0 : i32
    return %arg0, %arg1 : i32, i32
  }
}

module attributes {stable_mosaic.version = 11 : i64} {
  func.func @_linear_kernel(%arg0: i32, %arg1: i32, %arg2: i32, %arg3: memref<16x128xf32, #tpu.memory_space<vmem>>, %arg4: memref<128x32xbf16, #tpu.memory_space<vmem>>, %arg5: memref<1x32xf32, #tpu.memory_space<vmem>>, %arg6: memref<16x32xf32, #tpu.memory_space<vmem>>, %arg7: memref<16x32xf32, #tpu.memory_space<vmem>>) attributes {dimension_semantics = [#tpu.dimension_semantics<parallel>, #tpu.dimension_semantics<parallel>, #tpu.dimension_semantics<arbitrary>], iteration_bounds = array<i64: 1, 1, 1>, scalar_prefetch = 0 : i64, scratch_operands = 1 : i64, tpu.core_type = #tpu.core_type<tc>, window_params = [{transform_indices = @transform_0, window_bounds = array<i64: 16, 128>}, {transform_indices = @transform_1, window_bounds = array<i64: 128, 32>}, {transform_indices = @transform_2, window_bounds = array<i64: 1, 32>}, {transform_indices = @transform_3, window_bounds = array<i64: 16, 32>}]} {
    %c0_i32 = arith.constant 0 : i32
    %0 = arith.cmpi eq, %arg2, %c0_i32 : i32
    %1 = arith.extui %0 : i1 to i32
    %c0_i32_0 = arith.constant 0 : i32
    %2 = arith.cmpi ne, %1, %c0_i32_0 : i32
    scf.if %2 {
      %cst_10 = arith.constant 0.000000e+00 : f32
      %13 = vector.broadcast %cst_10 : f32 to vector<16x32xf32>
      %c0_11 = arith.constant 0 : index
      %c0_12 = arith.constant 0 : index
      %14 = vector.load %arg7[%c0_11, %c0_12] : memref<16x32xf32, #tpu.memory_space<vmem>>, vector<16x32xf32>
      tpu.vector_store %arg7[%c0_11, %c0_12], %13 {strides = array<i32>} : memref<16x32xf32, #tpu.memory_space<vmem>>, vector<16x32xf32>,
    } else {
    }
    %c0 = arith.constant 0 : index
    %c0_1 = arith.constant 0 : index
    %3 = vector.load %arg7[%c0, %c0_1] : memref<16x32xf32, #tpu.memory_space<vmem>>, vector<16x32xf32>
    %c0_2 = arith.constant 0 : index
    %c0_3 = arith.constant 0 : index
    %4 = vector.load %arg3[%c0_2, %c0_3] : memref<16x128xf32, #tpu.memory_space<vmem>>, vector<16x128xf32>
    %5 = arith.truncf %4 : vector<16x128xf32> to vector<16x128xbf16>
    %c0_4 = arith.constant 0 : index
    %c0_5 = arith.constant 0 : index
    %6 = vector.load %arg4[%c0_4, %c0_5] : memref<128x32xbf16, #tpu.memory_space<vmem>>, vector<128x32xbf16>
    %cst = arith.constant dense<0.000000e+00> : vector<16x32xf32>
    %7 = tpu.matmul %5, %6, %cst {dimension_numbers = #tpu.dot_dimension_numbers<[1], [0], [0], [1], [0, 0, 1, 1], [], []>} : vector<16x128xbf16>, vector<128x32xbf16>, vector<16x32xf32> -> vector<16x32xf32>
    %8 = arith.addf %3, %7 : vector<16x32xf32>
    %c0_6 = arith.constant 0 : index
    %c0_7 = arith.constant 0 : index
    %9 = vector.load %arg7[%c0_6, %c0_7] : memref<16x32xf32, #tpu.memory_space<vmem>>, vector<16x32xf32>
    tpu.vector_store %arg7[%c0_6, %c0_7], %8 {strides = array<i32>} : memref<16x32xf32, #tpu.memory_space<vmem>>, vector<16x32xf32>,
    %c0_i32_8 = arith.constant 0 : i32
    %10 = arith.cmpi eq, %arg2, %c0_i32_8 : i32
    %11 = arith.extui %10 : i1 to i32
    %c0_i32_9 = arith.constant 0 : i32
    %12 = arith.cmpi ne, %11, %c0_i32_9 : i32
    scf.if %12 {
      %c0_10 = arith.constant 0 : index
      %c0_11 = arith.constant 0 : index
      %13 = vector.load %arg7[%c0_10, %c0_11] : memref<16x32xf32, #tpu.memory_space<vmem>>, vector<16x32xf32>
      %c0_12 = arith.constant 0 : index
      %c0_13 = arith.constant 0 : index
      %14 = vector.load %arg5[%c0_12, %c0_13] : memref<1x32xf32, #tpu.memory_space<vmem>>, vector<1x32xf32>
      %15 = vector.broadcast %14 : vector<1x32xf32> to vector<16x32xf32>
      %16 = arith.addf %13, %15 : vector<16x32xf32>
      %c0_14 = arith.constant 0 : index
      %c0_15 = arith.constant 0 : index
      %17 = vector.load %arg6[%c0_14, %c0_15] : memref<16x32xf32, #tpu.memory_space<vmem>>, vector<16x32xf32>
      tpu.vector_store %arg6[%c0_14, %c0_15], %16 {strides = array<i32>} : memref<16x32xf32, #tpu.memory_space<vmem>>, vector<16x32xf32>,
    } else {
    }
    return
  }
  func.func @transform_0(%arg0: i32, %arg1: i32, %arg2: i32) -> (i32, i32) {
    %c0_i32 = arith.constant 0 : i32
    return %arg0, %arg2 : i32, i32
  }
  func.func @transform_1(%arg0: i32, %arg1: i32, %arg2: i32) -> (i32, i32) {
    %c0_i32 = arith.constant 0 : i32
    return %arg2, %arg1 : i32, i32
  }
  func.func @transform_2(%arg0: i32, %arg1: i32, %arg2: i32) -> (i32, i32) {
    %c0_i32 = arith.constant 0 : i32
    %c0_i32_0 = arith.constant 0 : i32
    return %c0_i32, %arg1 : i32, i32
  }
  func.func @transform_3(%arg0: i32, %arg1: i32, %arg2: i32) -> (i32, i32) {
    %c0_i32 = arith.constant 0 : i32
    return %arg0, %arg1 : i32, i32
  }
}

module attributes {stable_mosaic.version = 11 : i64} {
  func.func @_channel_kernel(%arg0: i32, %arg1: memref<2x8x16xf32, #tpu.memory_space<vmem>>, %arg2: memref<2x8x16xf32, #tpu.memory_space<vmem>>, %arg3: memref<2x8x16xf32, #tpu.memory_space<vmem>>, %arg4: memref<2x8x16xf32, #tpu.memory_space<vmem>>) attributes {dimension_semantics = [#tpu.dimension_semantics<arbitrary>], iteration_bounds = array<i64: 1>, scalar_prefetch = 0 : i64, scratch_operands = 0 : i64, tpu.core_type = #tpu.core_type<tc>, window_params = [{pipeline_mode = #tpu.pipeline_mode<synchronous>, transform_indices = @transform_0, window_bounds = array<i64: 2, 8, 16>}, {pipeline_mode = #tpu.pipeline_mode<synchronous>, transform_indices = @transform_1, window_bounds = array<i64: 2, 8, 16>}, {pipeline_mode = #tpu.pipeline_mode<synchronous>, transform_indices = @transform_2, window_bounds = array<i64: 2, 8, 16>}, {pipeline_mode = #tpu.pipeline_mode<synchronous>, transform_indices = @transform_3, window_bounds = array<i64: 2, 8, 16>}]} {
    %c0 = arith.constant 0 : index
    %c0_0 = arith.constant 0 : index
    %c0_1 = arith.constant 0 : index
    %0 = vector.load %arg1[%c0, %c0_0, %c0_1] : memref<2x8x16xf32, #tpu.memory_space<vmem>>, vector<2x8x16xf32>
    %1 = vector.extract_strided_slice %0 {offsets = [0, 0, 0], sizes = [2, 8, 8], strides = [1, 1, 1]} : vector<2x8x16xf32> to vector<2x8x8xf32>
    %2 = vector.extract_strided_slice %0 {offsets = [0, 0, 8], sizes = [2, 8, 8], strides = [1, 1, 1]} : vector<2x8x16xf32> to vector<2x8x8xf32>
    %3 = arith.mulf %1, %1 : vector<2x8x8xf32>
    %4 = arith.mulf %2, %2 : vector<2x8x8xf32>
    %5 = arith.addf %3, %4 : vector<2x8x8xf32>
    %cst = arith.constant dense<0.000000e+00> : vector<2x8xf32>
    %6 = vector.multi_reduction <add>, %5, %cst [2] : vector<2x8x8xf32> to vector<2x8xf32>
    %7 = vector.shape_cast %6 : vector<2x8xf32> to vector<2x8x1xf32>
    %cst_2 = arith.constant 8.000000e+00 : f32
    %8 = vector.broadcast %cst_2 : f32 to vector<2x8x1xf32>
    %9 = arith.divf %7, %8 : vector<2x8x1xf32>
    %cst_3 = arith.constant dense<0.000000e+00> : vector<2x1xf32>
    %10 = vector.multi_reduction <add>, %9, %cst_3 [1] : vector<2x8x1xf32> to vector<2x1xf32>
    %11 = vector.shape_cast %10 : vector<2x1xf32> to vector<2x1x1xf32>
    %cst_4 = arith.constant 8.000000e+00 : f32
    %12 = vector.broadcast %cst_4 : f32 to vector<2x1x1xf32>
    %13 = arith.divf %11, %12 : vector<2x1x1xf32>
    %cst_5 = arith.constant 9.99999993E-9 : f32
    %14 = vector.broadcast %cst_5 : f32 to vector<2x1x1xf32>
    %15 = arith.addf %13, %14 : vector<2x1x1xf32>
    %16 = math.rsqrt %15 : vector<2x1x1xf32>
    %17 = vector.broadcast %16 : vector<2x1x1xf32> to vector<2x8x16xf32>
    %18 = arith.mulf %0, %17 : vector<2x8x16xf32>
    %c0_6 = arith.constant 0 : index
    %c0_7 = arith.constant 0 : index
    %c0_8 = arith.constant 0 : index
    %19 = vector.load %arg2[%c0_6, %c0_7, %c0_8] : memref<2x8x16xf32, #tpu.memory_space<vmem>>, vector<2x8x16xf32>
    %cst_9 = arith.constant 0.125743344 : f32
    %20 = vector.broadcast %cst_9 : f32 to vector<2x8x16xf32>
    %21 = arith.mulf %20, %19 : vector<2x8x16xf32>
    %22 = arith.addf %18, %21 : vector<2x8x16xf32>
    %c0_10 = arith.constant 0 : index
    %c0_11 = arith.constant 0 : index
    %c0_12 = arith.constant 0 : index
    %23 = vector.load %arg3[%c0_10, %c0_11, %c0_12] : memref<2x8x16xf32, #tpu.memory_space<vmem>>, vector<2x8x16xf32>
    tpu.vector_store %arg3[%c0_10, %c0_11, %c0_12], %18 {strides = array<i32>} : memref<2x8x16xf32, #tpu.memory_space<vmem>>, vector<2x8x16xf32>,
    %c0_13 = arith.constant 0 : index
    %c0_14 = arith.constant 0 : index
    %c0_15 = arith.constant 0 : index
    %24 = vector.load %arg4[%c0_13, %c0_14, %c0_15] : memref<2x8x16xf32, #tpu.memory_space<vmem>>, vector<2x8x16xf32>
    tpu.vector_store %arg4[%c0_13, %c0_14, %c0_15], %22 {strides = array<i32>} : memref<2x8x16xf32, #tpu.memory_space<vmem>>, vector<2x8x16xf32>,
    return
  }
  func.func @transform_0(%arg0: i32) -> (i32, i32, i32) {
    %c0_i32 = arith.constant 0 : i32
    %c0_i32_0 = arith.constant 0 : i32
    %c0_i32_1 = arith.constant 0 : i32
    %c0_i32_2 = arith.constant 0 : i32
    return %c0_i32, %c0_i32_0, %c0_i32_1 : i32, i32, i32
  }
  func.func @transform_1(%arg0: i32) -> (i32, i32, i32) {
    %c0_i32 = arith.constant 0 : i32
    %c0_i32_0 = arith.constant 0 : i32
    %c0_i32_1 = arith.constant 0 : i32
    %c0_i32_2 = arith.constant 0 : i32
    return %c0_i32, %c0_i32_0, %c0_i32_1 : i32, i32, i32
  }
  func.func @transform_2(%arg0: i32) -> (i32, i32, i32) {
    %c0_i32 = arith.constant 0 : i32
    %c0_i32_0 = arith.constant 0 : i32
    %c0_i32_1 = arith.constant 0 : i32
    %c0_i32_2 = arith.constant 0 : i32
    return %c0_i32, %c0_i32_0, %c0_i32_1 : i32, i32, i32
  }
  func.func @transform_3(%arg0: i32) -> (i32, i32, i32) {
    %c0_i32 = arith.constant 0 : i32
    %c0_i32_0 = arith.constant 0 : i32
    %c0_i32_1 = arith.constant 0 : i32
    %c0_i32_2 = arith.constant 0 : i32
    return %c0_i32, %c0_i32_0, %c0_i32_1 : i32, i32, i32
  }
}

module attributes {stable_mosaic.version = 11 : i64} {
  func.func @_linear_kernel(%arg0: i32, %arg1: i32, %arg2: i32, %arg3: memref<16x32xf32, #tpu.memory_space<vmem>>, %arg4: memref<32x64xbf16, #tpu.memory_space<vmem>>, %arg5: memref<1x64xf32, #tpu.memory_space<vmem>>, %arg6: memref<16x64xf32, #tpu.memory_space<vmem>>, %arg7: memref<16x64xf32, #tpu.memory_space<vmem>>) attributes {dimension_semantics = [#tpu.dimension_semantics<parallel>, #tpu.dimension_semantics<parallel>, #tpu.dimension_semantics<arbitrary>], iteration_bounds = array<i64: 1, 1, 1>, scalar_prefetch = 0 : i64, scratch_operands = 1 : i64, tpu.core_type = #tpu.core_type<tc>, window_params = [{transform_indices = @transform_0, window_bounds = array<i64: 16, 32>}, {transform_indices = @transform_1, window_bounds = array<i64: 32, 64>}, {transform_indices = @transform_2, window_bounds = array<i64: 1, 64>}, {transform_indices = @transform_3, window_bounds = array<i64: 16, 64>}]} {
    %c0_i32 = arith.constant 0 : i32
    %0 = arith.cmpi eq, %arg2, %c0_i32 : i32
    %1 = arith.extui %0 : i1 to i32
    %c0_i32_0 = arith.constant 0 : i32
    %2 = arith.cmpi ne, %1, %c0_i32_0 : i32
    scf.if %2 {
      %cst_10 = arith.constant 0.000000e+00 : f32
      %13 = vector.broadcast %cst_10 : f32 to vector<16x64xf32>
      %c0_11 = arith.constant 0 : index
      %c0_12 = arith.constant 0 : index
      %14 = vector.load %arg7[%c0_11, %c0_12] : memref<16x64xf32, #tpu.memory_space<vmem>>, vector<16x64xf32>
      tpu.vector_store %arg7[%c0_11, %c0_12], %13 {strides = array<i32>} : memref<16x64xf32, #tpu.memory_space<vmem>>, vector<16x64xf32>,
    } else {
    }
    %c0 = arith.constant 0 : index
    %c0_1 = arith.constant 0 : index
    %3 = vector.load %arg7[%c0, %c0_1] : memref<16x64xf32, #tpu.memory_space<vmem>>, vector<16x64xf32>
    %c0_2 = arith.constant 0 : index
    %c0_3 = arith.constant 0 : index
    %4 = vector.load %arg3[%c0_2, %c0_3] : memref<16x32xf32, #tpu.memory_space<vmem>>, vector<16x32xf32>
    %5 = arith.truncf %4 : vector<16x32xf32> to vector<16x32xbf16>
    %c0_4 = arith.constant 0 : index
    %c0_5 = arith.constant 0 : index
    %6 = vector.load %arg4[%c0_4, %c0_5] : memref<32x64xbf16, #tpu.memory_space<vmem>>, vector<32x64xbf16>
    %cst = arith.constant dense<0.000000e+00> : vector<16x64xf32>
    %7 = tpu.matmul %5, %6, %cst {dimension_numbers = #tpu.dot_dimension_numbers<[1], [0], [0], [1], [0, 0, 1, 1], [], []>} : vector<16x32xbf16>, vector<32x64xbf16>, vector<16x64xf32> -> vector<16x64xf32>
    %8 = arith.addf %3, %7 : vector<16x64xf32>
    %c0_6 = arith.constant 0 : index
    %c0_7 = arith.constant 0 : index
    %9 = vector.load %arg7[%c0_6, %c0_7] : memref<16x64xf32, #tpu.memory_space<vmem>>, vector<16x64xf32>
    tpu.vector_store %arg7[%c0_6, %c0_7], %8 {strides = array<i32>} : memref<16x64xf32, #tpu.memory_space<vmem>>, vector<16x64xf32>,
    %c0_i32_8 = arith.constant 0 : i32
    %10 = arith.cmpi eq, %arg2, %c0_i32_8 : i32
    %11 = arith.extui %10 : i1 to i32
    %c0_i32_9 = arith.constant 0 : i32
    %12 = arith.cmpi ne, %11, %c0_i32_9 : i32
    scf.if %12 {
      %c0_10 = arith.constant 0 : index
      %c0_11 = arith.constant 0 : index
      %13 = vector.load %arg7[%c0_10, %c0_11] : memref<16x64xf32, #tpu.memory_space<vmem>>, vector<16x64xf32>
      %c0_12 = arith.constant 0 : index
      %c0_13 = arith.constant 0 : index
      %14 = vector.load %arg5[%c0_12, %c0_13] : memref<1x64xf32, #tpu.memory_space<vmem>>, vector<1x64xf32>
      %15 = vector.broadcast %14 : vector<1x64xf32> to vector<16x64xf32>
      %16 = arith.addf %13, %15 : vector<16x64xf32>
      %c0_14 = arith.constant 0 : index
      %c0_15 = arith.constant 0 : index
      %17 = vector.load %arg6[%c0_14, %c0_15] : memref<16x64xf32, #tpu.memory_space<vmem>>, vector<16x64xf32>
      tpu.vector_store %arg6[%c0_14, %c0_15], %16 {strides = array<i32>} : memref<16x64xf32, #tpu.memory_space<vmem>>, vector<16x64xf32>,
    } else {
    }
    return
  }
  func.func @transform_0(%arg0: i32, %arg1: i32, %arg2: i32) -> (i32, i32) {
    %c0_i32 = arith.constant 0 : i32
    return %arg0, %arg2 : i32, i32
  }
  func.func @transform_1(%arg0: i32, %arg1: i32, %arg2: i32) -> (i32, i32) {
    %c0_i32 = arith.constant 0 : i32
    return %arg2, %arg1 : i32, i32
  }
  func.func @transform_2(%arg0: i32, %arg1: i32, %arg2: i32) -> (i32, i32) {
    %c0_i32 = arith.constant 0 : i32
    %c0_i32_0 = arith.constant 0 : i32
    return %c0_i32, %arg1 : i32, i32
  }
  func.func @transform_3(%arg0: i32, %arg1: i32, %arg2: i32) -> (i32, i32) {
    %c0_i32 = arith.constant 0 : i32
    return %arg0, %arg1 : i32, i32
  }
}

</mosaic_0001>

<bundles_post_ra>
// kernel: hetereo_moe_semcom_forward.39
= control target key start
LH: loop header
LB: loop body
LE: loop exit
PB: predicated region body
PF: predicated region fallthrough
CT: control target
= control target key end

     0   :  { %s706_s15 = smov 0   ;;  %s708_s16 = smov 0   ;;  %s778_s0 = inlined_call_operand.vmem [shape: f32[2,1,8], index: 0, kind: input, shape index: {}]   ;;  %s779_s1 = inlined_call_operand.vmem [shape: f32[2,4,8,8], index: 1, kind: input, shape index: {}]   ;;  %s780_s2 = inlined_call_operand.vmem [shape: f32[2,4,8,8], index: 2, kind: input, shape index: {}]   ;;  %s781_s3 = inlined_call_operand.vmem [shape: f32[2,4,8,8], index: 3, kind: input, shape index: {}]   ;;  %s782_s4 = inlined_call_operand.vmem [shape: f32[2,4,8,8], index: 4, kind: output, shape index: {}]  }
   0x1   :  { %s710_s17 = smov 0   ;;  %s712_s18 = smov 0  }
   0x2   :  { %s714_s19 = smov 0  }
   0x3 LB: > { %s23_s20 = sadd.s32 1, %s669_s17  ;;  %s26_s21 = sadd.s32 1, %s673_s18  ;;  %s677_s19 = sphi %s714_s19, %s14_s19   ;;  %s673_s18 = sphi %s712_s18, %s786_s18   ;;  %s669_s17 = sphi %s710_s17, %s785_s17   ;;  %s665_s16 = sphi %s708_s16, %s784_s16   ;;  %s661_s15 = sphi %s706_s15, %s783_s15  }
   0x4   : > { %p24_p0 = scmp.ge.s32.totalorder %s23_s20, 4  ;;  %p563_p1 = scmp.ge.s32.totalorder %s677_s19, 1 }
   0x5   : > { %p219_p2 = scmp.lt.s32.totalorder %s677_s19, 9 }
   0x6   : > { %s788_s20 = smov (%p24_p0, %s23_s20), 0  ;;  %s790_s21 = smov (!%p24_p0, %s26_s21), %s673_s18 }
   0x7   : > { %p220_p3 = pnand %p563_p1, %p219_p2  ;;  %p28_p4 = scmp.ge.s32.totalorder %s790_s21, 2 }
   0x8   : > { %p270_p5 = scmp.lt.s32.totalorder (!%p220_p3), %s665_s16, 1  ;;  %p275_p6 = scmp.lt.s32.totalorder (!%p220_p3), %s661_s15, 3 }
   0x9   : > { %s792_s21 = smov (%p28_p4, %s790_s21), 0  ;;  %223 = sbr.rel (%p220_p3) target bundleno = 740 (0x2e4), region = 36 }
   0xe   : > { %v679_v0 = vmov 0.0   ;;  %vm680_vm0 = vmmov 0   ;;  %s794_s16 = smov (!%p270_p5, %s665_s16), 1  ;;  %s796_s15 = smov (!%p275_p6, %s661_s15), 3  ;;  %vm312_vm1 = vcmask 64512   ;;  %vm383_vm2 = vcmask 1043456  }
   0xf   : > { %581 = vmatprep.subr.bf16.mxu0 %v679_v0  ;;  %583 = vmatprep.mubr.msk.bf16.mxu0 %vm680_vm0, %v679_v0  ;;  %s564_s22 = sshll.u32 %s794_s16, 2  ;;  %s272_s7 = scalar_lea.vmem %s778_s0, %s794_s16 }
  0x10   : > { %587 = vmatprep.subr.bf16.mxu1 %v679_v0  ;;  %589 = vmatprep.mubr.msk.bf16.mxu1 %vm680_vm0, %v679_v0  ;;  %s278_s23 = sadd.s32 %s564_s22, %s796_s15  ;;  %v573_v7 = vld [vmem:[%s272_s7] ss:$0 sm:$0xff] }
  0x11   : > { %s736_s24 = sshll.u32 %s278_s23, 3 }
  0x12   : > { %s288_s27 = scalar_lea.vmem %s780_s2, %s736_s24  ;;  %s280_s30 = scalar_lea.vmem %s779_s1, %s736_s24 }
  0x13   : > { %v308_v1 = vld [vmem:[%s288_s27] sm:$0xff]  ;;  %s296_s10 = scalar_lea.vmem %s781_s3, %s736_s24  ;;  %s304_s13 = scalar_lea.vmem %s782_s4, %s736_s24 }
  0x14   : > { %v309_v2 = vpack.c.bf16 %v308_v1, %v308_v1  ;;  %v306_v4 = vld [vmem:[%s280_s30] sm:$0xff] }
  0x15   : > { %v307_v5 = vpack.c.bf16 %v306_v4, %v306_v4  ;;  %v310_v19 = vld [vmem:[%s296_s10] sm:$0xff] }
  0x16   : > { %v317_v3 = vsel %vm312_vm1, %v309_v2, 0  ;;  %v311_v20 = vpack.c.bf16 %v310_v19, %v310_v19 }
  0x17   : > { %582 = vmatpush3.bf16.xpose.msra.mxu0 %v317_v3 }
  0x18   : > { %v385_v21 = vsel %vm383_vm2, %v311_v20, 0 }
  0x19   : > { %588 = vmatpush3.bf16.msra.mxu1 %v385_v21 }
  0x1e   : > { %584 = vmatmul.mubr.msk.bf16.vlgmr.msra.gmra.mxu0 %vm312_vm1, %v307_v5 }
  0xde   : > { %v353_v6 = vpop.f32.mrf.mxu0 }
  0xdf   : > { %v359_v8 = vmul.f32 0.35355338, %v353_v6 }
  0xe0   : > { %v585_v9 = vpop.f32.mrf.mxu0 }
  0xe1   : > { %v367_v10 = vadd.f32 %v573_v7, %v359_v8 }
  0xe2   : > { %v356_v11 = vpop.f32.mrf.mxu0 }
  0xe3   : > { %v368_v12 = vsel %vm312_vm1, %v367_v10, -inf }
  0xe4   : > { %v586_v13 = vpop.f32.mrf.mxu0  ;;  %369 = vmax.xlane.f32.xlu0 %v368_v12 }
 0x16d   : > { %v370_v14 = vpop.xlane.xlu0 %369 }
 0x16e   : > { %v371_v15 = vsub.f32 %v367_v10, %v370_v14 }
 0x170   : > { %v372_v16 = vmul.f32 1.442695, %v371_v15 }
 0x172   : > { %635 = vpow2.f32 %v372_v16 }
 0x17f   : > { %v636_v17 = vpop.eup %635 }
 0x180   : > { %v374_v18 = vsel %vm312_vm1, %v636_v17, 0.0 }
 0x181   : > { %375 = vadd.xlane.f32.xlu0 %v374_v18 }
 0x20a   : > { %v376_v22 = vpop.xlane.xlu0 %375 }
 0x20b   : > { %637 = vrcp.f32 %v376_v22 }
 0x218   : > { %v638_v23 = vpop.eup %637 }
 0x219   : > { %v378_v24 = vmul.f32 %v638_v23, %v636_v17 }
 0x21b   : > { %v379_v25 = vpack.c.bf16 %v378_v24, %v378_v24 }
 0x21d   : > { %590 = vmatmul.mubr.msk.bf16.vlgmr.msra.gmra.mxu1 %vm312_vm1, %v379_v25 }
 0x2dd   : > { %v421_v26 = vpop.f32.mrf.mxu1 }
 0x2de   : > { %427 = vst.msk [vmem:[%s304_s13] sm:$0xff] %vm312_vm1, %v421_v26 }
 0x2df   : > { %v591_v27 = vpop.f32.mrf.mxu1 }
 0x2e1   : > { %v424_v28 = vpop.f32.mrf.mxu1 }
 0x2e3   : > { %v592_v29 = vpop.f32.mrf.mxu1 }
 0x2e4 PF: > { %s14_s19 = sadd.s32 1, %s677_s19   ;;  %s783_s15 = smov %s669_s17 }
 0x2e5   : > { %p11_p7 = scmp.ge.s32.totalorder %s14_s19, 10   ;;  %s784_s16 = smov %s673_s18 }
 0x2e6   : > { %s785_s17 = smov %s788_s20  ;;  %s786_s18 = smov %s792_s21 }
 0x2e7   :  { %13 = sbr.rel (!%p11_p7) target bundleno = 3 (0x3), region = 75 }

// kernel: hetereo_moe_semcom_forward.37
= control target key start
LH: loop header
LB: loop body
LE: loop exit
PB: predicated region body
PF: predicated region fallthrough
CT: control target
= control target key end

     0   :  { %vm16_vm0 = vcmask 195584   ;;  %s124_s0 = inlined_call_operand.vmem [shape: f32[16,24], index: 0, kind: input, shape index: {}]   ;;  %s125_s1 = inlined_call_operand.vmem [shape: f32[1,24], index: 1, kind: input, shape index: {}]   ;;  %s126_s2 = inlined_call_operand.vmem [shape: f32[1,24], index: 2, kind: input, shape index: {}]   ;;  %s127_s3 = inlined_call_operand.vmem [shape: f32[16,24], index: 3, kind: output, shape index: {}]  }
   0x1   :  { %v14_v0 = vld [vmem:[%s124_s0] sm:$0xff]  ;;  %v15_v1 = vld [vmem:[%s124_s0 + $0x8] sm:$0xff] }
   0x2   :  { %v17_v2 = vsel %vm16_vm0, %v14_v0, 0.0  ;;  %v26_v3 = vmul.f32 %v14_v0, %v14_v0  ;;  %v27_v4 = vmul.f32 %v15_v1, %v15_v1  ;;  %v20_v6 = vsel %vm16_vm0, %v15_v1, 0.0  ;;  %v74_v26 = vld [vmem:[%s125_s1] ss:$0 sm:$0xff] }
   0x3   :  { %18 = vadd.xlane.f32.xlu0 %v17_v2  ;;  %v75_v28 = vld [vmem:[%s126_s2] ss:$0 sm:$0xff] }
   0x4   :  { %v28_v5 = vsel %vm16_vm0, %v26_v3, 0.0  ;;  %v31_v7 = vsel %vm16_vm0, %v27_v4, 0.0 }
   0x5   :  { %29 = vadd.xlane.f32.xlu1 %v28_v5 }
   0x7   :  { %21 = vadd.xlane.f32.xlu0 %v20_v6 }
   0x9   :  { %32 = vadd.xlane.f32.xlu1 %v31_v7 }
  0x8c   :  { %v19_v8 = vpop.xlane.xlu0 %18 }
  0x8d   :  { %v24_v9 = vmul.f32 0.041666668, %v19_v8 }
  0x8e   :  { %v30_v10 = vpop.xlane.xlu1 %29 }
  0x8f   :  { %v36_v11 = vmul.f32 %v24_v9, %v24_v9  ;;  %v34_v12 = vmul.f32 0.041666668, %v30_v10  ;;  %v42_v24 = vsub.f32 %v14_v0, %v24_v9 }
  0x90   :  { %v22_v13 = vpop.xlane.xlu0 %21 }
  0x91   :  { %v38_v14 = vsub.f32 %v34_v12, %v36_v11  ;;  %v25_v15 = vmul.f32 0.041666668, %v22_v13 }
  0x92   :  { %v33_v16 = vpop.xlane.xlu1 %32 }
  0x93   :  { %v40_v17 = vmax.f32 %v38_v14, 0.0  ;;  %v37_v18 = vmul.f32 %v25_v15, %v25_v15  ;;  %v35_v19 = vmul.f32 0.041666668, %v33_v16  ;;  %v43_v30 = vsub.f32 %v15_v1, %v25_v15 }
  0x95   :  { %v44_v20 = vadd.f32 1e-05, %v40_v17  ;;  %v39_v21 = vsub.f32 %v35_v19, %v37_v18 }
  0x97   :  { %76 = vrsqrt.f32 %v44_v20  ;;  %v41_v22 = vmax.f32 %v39_v21, 0.0 }
  0x99   :  { %v45_v23 = vadd.f32 1e-05, %v41_v22 }
  0x9b   :  { %78 = vrsqrt.f32 %v45_v23 }
  0xa4   :  { %v77_v25 = vpop.eup %76 }
  0xa5   :  { %v48_v27 = vmul.f32 %v77_v25, %v42_v24 }
  0xa7   :  { %v57_v29 = vmul.f32 %v74_v26, %v48_v27 }
  0xa8   :  { %v79_v31 = vpop.eup %78 }
  0xa9   :  { %v66_v32 = vadd.f32 %v75_v28, %v57_v29  ;;  %v49_v33 = vmul.f32 %v79_v31, %v43_v30 }
  0xab   :  { %68 = vst.msk [vmem:[%s127_s3] sm:$0xff] %vm16_vm0, %v66_v32  ;;  %v58_v34 = vmul.f32 %v74_v26, %v49_v33 }
  0xad   :  { %v67_v35 = vadd.f32 %v75_v28, %v58_v34 }
  0xaf   :  { %69 = vst.msk [vmem:[%s127_s3 + $0x8] sm:$0xff] %vm16_vm0, %v67_v35 }

// kernel: hetereo_moe_semcom_forward.38
= control target key start
LH: loop header
LB: loop body
LE: loop exit
PB: predicated region body
PF: predicated region fallthrough
CT: control target
= control target key end

     0   :  { %vm19_vm0 = vcmask 785408   ;;  %v132_v0 = vmov 0.0   ;;  %vm133_vm1 = vmmov 0   ;;  %vm43_vm2 = vcmask 261120   ;;  %s181_s1 = inlined_call_operand.vmem [shape: bf16[32,96], index: 1, kind: input, shape index: {}]   ;;  %s182_s0 = inlined_call_operand.vmem [shape: f32[16,32], index: 0, kind: input, shape index: {}]   ;;  %s183_s2 = inlined_call_operand.vmem [shape: f32[1,96], index: 2, kind: input, shape index: {}]   ;;  %s184_s3 = inlined_call_operand.vmem [shape: f32[16,96], index: 3, kind: output, shape index: {}]  }
   0x1   :  { %120 = vmatprep.subr.bf16.mxu0 %v132_v0  ;;  %v130_v1 = vld [vmem:[%s181_s1 + $0x8] sm:$0xff]   ;;  %124 = vmatprep.mubr.msk.bf16.mxu0 %vm133_vm1, %v132_v0  ;;  %20 = vst.msk [vmem:[#allocation2] sm:$0xff] %vm19_vm0, %v132_v0  ;;  %21 = vst.msk [vmem:[#allocation2 + $0x8] sm:$0xff] %vm19_vm0, %v132_v0  ;;  %v131_v2 = vld [vmem:[%s181_s1] sm:$0xff]  }
   0x2   :  { %121 = vmatpush3.bf16.msra.mxu0 %v130_v1  ;;  %v24_v3 = vld [vmem:[%s182_s0] sm:$0xff]  ;;  %v25_v4 = vld [vmem:[%s182_s0 + $0x8] sm:$0xff] }
   0x3   :  { %122 = vmatprep.subr.bf16.mxu0 %v132_v0  ;;  %v26_v5 = vpack.c.bf16 %v25_v4, %v24_v3  ;;  %v116_v14 = vld [vmem:[%s183_s2] ss:$0 sm:$0xff] }
   0x6   :  { %123 = vmatpush3.bf16.msra.mxu0 %v131_v2 }
   0x8   :  { %v22_v6 = vld [vmem:[#allocation2] sm:$0xff]  ;;  %v23_v10 = vld [vmem:[#allocation2 + $0x8] sm:$0xff] }
   0x9   :  { %125 = vmatmul.mubr.msk.bf16.vlgmr.msra.gmra.mxu0 %vm43_vm2, %v26_v5 }
  0xc9   :  { %v81_v7 = vpop.f32.mrf.mxu0 }
  0xca   :  { %v88_v8 = vadd.f32 %v81_v7, %v22_v6 }
  0xcb   :  { %v126_v9 = vpop.f32.mrf.mxu0 }
  0xcc   :  { %91 = vst.msk [vmem:[#allocation2] sm:$0xff] %vm19_vm0, %v88_v8 }
  0xcd   :  { %v84_v11 = vpop.f32.mrf.mxu0 }
  0xce   :  { %v89_v12 = vadd.f32 %v84_v11, %v23_v10 }
  0xcf   :  { %v127_v13 = vpop.f32.mrf.mxu0 }
  0xd0   :  { %92 = vst.msk [vmem:[#allocation2 + $0x8] sm:$0xff] %vm19_vm0, %v89_v12 }
  0xd3   :  { %v96_v15 = vld [vmem:[#allocation2] sm:$0xff] }
  0xd4   :  { %v105_v16 = vadd.f32 %v116_v14, %v96_v15 }
  0xd6   :  { %107 = vst.msk [vmem:[%s184_s3] sm:$0xff] %vm19_vm0, %v105_v16 }
  0xd7   :  { %v97_v17 = vld [vmem:[#allocation2 + $0x8] sm:$0xff] }
  0xd8   :  { %v106_v18 = vadd.f32 %v116_v14, %v97_v17 }
  0xda   :  { %108 = vst.msk [vmem:[%s184_s3 + $0x8] sm:$0xff] %vm19_vm0, %v106_v18 }

// kernel: hetereo_moe_semcom_forward.40
= control target key start
LH: loop header
LB: loop body
LE: loop exit
PB: predicated region body
PF: predicated region fallthrough
CT: control target
= control target key end

     0   :  { %vm28_vm0 = vcmask 261120   ;;  %v201_v0 = vmov 0.0   ;;  %vm202_vm1 = vmmov 0   ;;  %s282_s1 = inlined_call_operand.vmem [shape: bf16[32,32], index: 1, kind: input, shape index: {}]   ;;  %s283_s0 = inlined_call_operand.vmem [shape: f32[16,32], index: 0, kind: input, shape index: {}]   ;;  %s284_s2 = inlined_call_operand.vmem [shape: f32[1,32], index: 2, kind: input, shape index: {}]   ;;  %s285_s3 = inlined_call_operand.vmem [shape: f32[16,32], index: 3, kind: input, shape index: {}]   ;;  %s286_s4 = inlined_call_operand.vmem [shape: f32[1,32], index: 4, kind: input, shape index: {}]   ;;  %s287_s5 = inlined_call_operand.vmem [shape: f32[1,32], index: 5, kind: input, shape index: {}]   ;;  %s288_s6 = inlined_call_operand.vmem [shape: f32[16,32], index: 6, kind: output, shape index: {}]  }
   0x1   :  { %185 = vmatprep.subr.bf16.mxu0 %v201_v0  ;;  %v195_v1 = vld [vmem:[%s282_s1 + $0x8] sm:$0xff]   ;;  %189 = vmatprep.mubr.msk.bf16.mxu0 %vm202_vm1, %v201_v0  ;;  %29 = vst.msk [vmem:[#allocation2] sm:$0xff] %vm28_vm0, %v201_v0  ;;  %30 = vst.msk [vmem:[#allocation2 + $0x8] sm:$0xff] %vm28_vm0, %v201_v0  ;;  %v196_v2 = vld [vmem:[%s282_s1] sm:$0xff]  }
   0x2   :  { %186 = vmatpush3.bf16.msra.mxu0 %v195_v1  ;;  %v33_v3 = vld [vmem:[%s283_s0] sm:$0xff]  ;;  %v34_v4 = vld [vmem:[%s283_s0 + $0x8] sm:$0xff] }
   0x3   :  { %187 = vmatprep.subr.bf16.mxu0 %v201_v0  ;;  %v35_v5 = vpack.c.bf16 %v34_v4, %v33_v3  ;;  %v179_v14 = vld [vmem:[%s284_s2] ss:$0 sm:$0xff]  ;;  %v116_v20 = vld [vmem:[%s285_s3 + $0x8] sm:$0xff] }
   0x4   :  { %v115_v16 = vld [vmem:[%s285_s3] sm:$0xff] }
   0x5   :  { %v180_v47 = vld [vmem:[%s286_s4] ss:$0 sm:$0xff] }
   0x6   :  { %188 = vmatpush3.bf16.msra.mxu0 %v196_v2  ;;  %v181_v49 = vld [vmem:[%s287_s5] ss:$0 sm:$0xff] }
   0x8   :  { %v31_v6 = vld [vmem:[#allocation2] sm:$0xff]  ;;  %v32_v10 = vld [vmem:[#allocation2 + $0x8] sm:$0xff] }
   0x9   :  { %190 = vmatmul.mubr.msk.bf16.vlgmr.msra.gmra.mxu0 %vm28_vm0, %v35_v5 }
  0xc9   :  { %v90_v7 = vpop.f32.mrf.mxu0 }
  0xca   :  { %v97_v8 = vadd.f32 %v90_v7, %v31_v6 }
  0xcb   :  { %v191_v9 = vpop.f32.mrf.mxu0 }
  0xcc   :  { %99 = vst.msk [vmem:[#allocation2] sm:$0xff] %vm28_vm0, %v97_v8 }
  0xcd   :  { %v93_v11 = vpop.f32.mrf.mxu0 }
  0xce   :  { %v98_v12 = vadd.f32 %v93_v11, %v32_v10 }
  0xcf   :  { %v192_v13 = vpop.f32.mrf.mxu0 }
  0xd0   :  { %100 = vst.msk [vmem:[#allocation2 + $0x8] sm:$0xff] %vm28_vm0, %v98_v12 }
  0xd3   :  { %v104_v15 = vld [vmem:[#allocation2] sm:$0xff] }
  0xd4   :  { %v113_v17 = vadd.f32 %v179_v14, %v104_v15 }
  0xd6   :  { %v117_v18 = vadd.f32 %v115_v16, %v113_v17 }
  0xd7   :  { %v105_v19 = vld [vmem:[#allocation2 + $0x8] sm:$0xff] }
  0xd8   :  { %v119_v21 = vsel %vm28_vm0, %v117_v18, 0.0  ;;  %v128_v22 = vmul.f32 %v117_v18, %v117_v18  ;;  %v114_v23 = vadd.f32 %v179_v14, %v105_v19 }
  0xd9   :  { %120 = vadd.xlane.f32.xlu0 %v119_v21 }
  0xda   :  { %v130_v24 = vsel %vm28_vm0, %v128_v22, 0.0  ;;  %v118_v25 = vadd.f32 %v116_v20, %v114_v23 }
  0xdb   :  { %131 = vadd.xlane.f32.xlu1 %v130_v24 }
  0xdc   :  { %v122_v26 = vsel %vm28_vm0, %v118_v25, 0.0  ;;  %v129_v27 = vmul.f32 %v118_v25, %v118_v25 }
  0xdd   :  { %123 = vadd.xlane.f32.xlu0 %v122_v26 }
  0xde   :  { %v133_v28 = vsel %vm28_vm0, %v129_v27, 0.0 }
  0xdf   :  { %134 = vadd.xlane.f32.xlu1 %v133_v28 }
 0x162   :  { %v121_v29 = vpop.xlane.xlu0 %120 }
 0x163   :  { %v126_v30 = vmul.f32 0.03125, %v121_v29 }
 0x164   :  { %v132_v31 = vpop.xlane.xlu1 %131 }
 0x165   :  { %v138_v32 = vmul.f32 %v126_v30, %v126_v30  ;;  %v136_v33 = vmul.f32 0.03125, %v132_v31  ;;  %v144_v45 = vsub.f32 %v117_v18, %v126_v30 }
 0x166   :  { %v124_v34 = vpop.xlane.xlu0 %123 }
 0x167   :  { %v140_v35 = vsub.f32 %v136_v33, %v138_v32  ;;  %v127_v36 = vmul.f32 0.03125, %v124_v34 }
 0x168   :  { %v135_v37 = vpop.xlane.xlu1 %134 }
 0x169   :  { %v142_v38 = vmax.f32 %v140_v35, 0.0  ;;  %v139_v39 = vmul.f32 %v127_v36, %v127_v36  ;;  %v137_v40 = vmul.f32 0.03125, %v135_v37  ;;  %v145_v51 = vsub.f32 %v118_v25, %v127_v36 }
 0x16b   :  { %v146_v41 = vadd.f32 1e-05, %v142_v38  ;;  %v141_v42 = vsub.f32 %v137_v40, %v139_v39 }
 0x16d   :  { %197 = vrsqrt.f32 %v146_v41  ;;  %v143_v43 = vmax.f32 %v141_v42, 0.0 }
 0x16f   :  { %v147_v44 = vadd.f32 1e-05, %v143_v43 }
 0x171   :  { %199 = vrsqrt.f32 %v147_v44 }
 0x17a   :  { %v198_v46 = vpop.eup %197 }
 0x17b   :  { %v150_v48 = vmul.f32 %v198_v46, %v144_v45 }
 0x17d   :  { %v159_v50 = vmul.f32 %v180_v47, %v150_v48 }
 0x17e   :  { %v200_v52 = vpop.eup %199 }
 0x17f   :  { %v168_v53 = vadd.f32 %v181_v49, %v159_v50  ;;  %v151_v54 = vmul.f32 %v200_v52, %v145_v51 }
 0x181   :  { %170 = vst.msk [vmem:[%s288_s6] sm:$0xff] %vm28_vm0, %v168_v53  ;;  %v160_v55 = vmul.f32 %v180_v47, %v151_v54 }
 0x183   :  { %v169_v56 = vadd.f32 %v181_v49, %v160_v55 }
 0x185   :  { %171 = vst.msk [vmem:[%s288_s6 + $0x8] sm:$0xff] %vm28_vm0, %v169_v56 }

// kernel: hetereo_moe_semcom_forward.41
= control target key start
LH: loop header
LB: loop body
LE: loop exit
PB: predicated region body
PF: predicated region fallthrough
CT: control target
= control target key end

     0   :  { %s797_s15 = smov 0   ;;  %s799_s16 = smov 0   ;;  %s893_s0 = inlined_call_operand.vmem [shape: f32[16,32], index: 0, kind: input, shape index: {}]   ;;  %s894_s1 = inlined_call_operand.vmem [shape: bf16[32,640], index: 1, kind: input, shape index: {}]   ;;  %s895_s2 = inlined_call_operand.vmem [shape: f32[1,640], index: 2, kind: input, shape index: {}]   ;;  %s896_s3 = inlined_call_operand.vmem [shape: f32[16,640], index: 3, kind: input, shape index: {}]   ;;  %s897_s4 = inlined_call_operand.vmem [shape: f32[16,640], index: 4, kind: output, shape index: {}]  }
   0x1   :  { %s801_s17 = smov 0   ;;  %s803_s18 = smov 0  }
   0x2   :  { %s805_s19 = smov 0  }
   0x3 LB: > { %s29_s20 = sadd.s32 1, %s764_s18  ;;  %s654_s21 = sadd.s32 4294967295, %s768_s19   ;;  %s768_s19 = sphi %s805_s19, %s14_s19   ;;  %s764_s18 = sphi %s803_s18, %s903_s18   ;;  %s760_s17 = sphi %s801_s17, %s902_s17   ;;  %s756_s16 = sphi %s799_s16, %s901_s16   ;;  %s752_s15 = sphi %s797_s15, %s900_s15  }
   0x4   : > { %p31_p0 = scmp.ge.s32.totalorder %s29_s20, 5  ;;  %p77_p1 = scmp.ne.s32.totalorder %s756_s16, %s752_s15 }
   0x5   : > { %p78_p2 = scmp.eq.s32.totalorder %s768_s19, 0  ;;  %p163_p4 = scmp.eq.s32.totalorder %s654_s21, 4 }
   0x6   : > { %s905_s20 = smov (%p31_p0, %s29_s20), 0  ;;  %s70_s24 = sadd.s32 1, %s756_s16 }
   0x7   : > { %p829_p3 = por %p78_p2, %p77_p1  ;;  %s66_s23 = ssub.s32 %s764_s18, %s905_s20 }
   0x8   : > { %p68_p5 = scmp.eq.s32.totalorder %s66_s23, 0  ;;  %p836_p6 = por %p163_p4, %p77_p1 }
   0x9   : > { %p658_p7 = scmp.ge.s32.totalorder %s768_s19, 5 }
   0xa   : > { %s841_s26 = scalar_select %p68_p5, %s756_s16, %s70_s24  }
   0xb   : > { %197 = sbr.rel (%p658_p7) target bundleno = 27 (0x1b), region = 20 }
  0x10   : > { %200 = sbr.rel (!%p829_p3) target bundleno = 22 (0x16), region = 24  ;;  %s202_s27 = sand.u32 (%p829_p3), 1, %s756_s16  }
  0x11   : > { %s660_s28 = sshll.u32 (%p829_p3), %s764_s18, 2  ;;  %s659_s29 = sshll.u32 (%p829_p3), %s202_s27, 4 }
  0x12   : > { %s209_s6 = scalar_lea.vmem (%p829_p3), %s894_s1, %s660_s28  ;;  %s204_s7 = scalar_lea.vmem (%p829_p3), [#allocation3], %s659_s29 }
  0x13   : > { %v226_v0 = vld [vmem:[%s209_s6] sm:$0xf] (%p829_p3)  ;;  %v228_v1 = vld [vmem:[%s209_s6 + $0x14] sm:$0xf] (%p829_p3)  ;;  %v230_v2 = vld [vmem:[%s209_s6 + $0x28] sm:$0xf] (%p829_p3) }
  0x14   : > { %227 = vst [vmem:[%s204_s7] sm:$0xf] (%p829_p3), %v226_v0  ;;  %229 = vst [vmem:[%s204_s7 + $0x4] sm:$0xf] (%p829_p3), %v228_v1  ;;  %v232_v3 = vld [vmem:[%s209_s6 + $0x3c] sm:$0xf] (%p829_p3) }
  0x15   : > { %231 = vst [vmem:[%s204_s7 + $0x8] sm:$0xf] %v230_v2  ;;  %233 = vst [vmem:[%s204_s7 + $0xc] sm:$0xf] %v232_v3 }
  0x16 PF: > { %271 = sbr.rel (!%p829_p3) target bundleno = 27 (0x1b), region = 69  ;;  %s273_s8 = sand.u32 (%p829_p3), 1, %s756_s16  }
  0x17   : > { %s662_s9 = sshll.u32 (%p829_p3), %s764_s18, 3  ;;  %s661_s10 = sshll.u32 (%p829_p3), %s273_s8, 4 }
  0x18   : > { %s280_s13 = scalar_lea.vmem (%p829_p3), %s896_s3, %s662_s9  ;;  %s275_s14 = scalar_lea.vmem (%p829_p3), [#allocation4], %s661_s10 }
  0x19   : > { %v311_v4 = vld [vmem:[%s280_s13] sm:$0xff] (%p829_p3)  ;;  %v313_v5 = vld [vmem:[%s280_s13 + $0x28] sm:$0xff] (%p829_p3) }
  0x1a   : > { %312 = vst [vmem:[%s275_s14] sm:$0xff] (%p829_p3), %v311_v4  ;;  %314 = vst [vmem:[%s275_s14 + $0x8] sm:$0xff] (%p829_p3), %v313_v5 }
  0x1b PF: > { %p663_p8 = scmp.ge.s32.totalorder %s768_s19, 1  ;;  %p319_p9 = scmp.lt.s32.totalorder %s768_s19, 6 }
  0x1d   : > { %p320_p10 = pnand %p663_p8, %p319_p9 }
  0x1e   : > { %s326_s21 = sand.u32 (!%p320_p10), 1, %s752_s15   ;;  %p382_p11 = scmp.lt.s32.totalorder (!%p320_p10), %s760_s17, 4 }
  0x1f   : > { %323 = sbr.rel (%p320_p10) target bundleno = 257 (0x101), region = 107  ;;  %s664_s22 = sshll.u32 (!%p320_p10), %s326_s21, 4 }
  0x20   : > { %s328_s23 = scalar_lea.vmem (!%p320_p10), [#allocation3], %s664_s22  ;;  %s335_s7 = scalar_lea.vmem (!%p320_p10), [#allocation4], %s664_s22 }
  0x21   : > { %s371_s8 = scalar_lea.vmem (!%p320_p10), [#allocation5], %s664_s22 }
  0x24   : > { %v770_v6 = vmov 0.0   ;;  %vm771_vm0 = vmmov 0   ;;  %v728_v7 = vld [vmem:[%s328_s23 + $0x8] sm:$0xff]   ;;  %v729_v8 = vld [vmem:[%s328_s23] sm:$0xff]   ;;  %vm415_vm1 = vcmask 261120   ;;  %s383_s15 = scalar_select %p382_p11, %s760_s17, 4 }
  0x25   : > { %678 = vmatprep.subr.bf16.mxu0 %v770_v6  ;;  %682 = vmatprep.mubr.msk.bf16.mxu0 %vm771_vm0, %v770_v6  ;;  %v396_v9 = vld [vmem:[%s893_s0] sm:$0xff]  ;;  %v397_v10 = vld [vmem:[%s893_s0 + $0x8] sm:$0xff]  ;;  %s672_s9 = sshll.u32 (%p836_p6), %s760_s17, 3 }
  0x26   : > { %679 = vmatpush3.bf16.msra.mxu0 %v728_v7  ;;  %v398_v11 = vpack.c.bf16 %v397_v10, %v396_v9  ;;  %s384_s6 = scalar_lea.vmem %s895_s2, %s383_s15  ;;  %v480_v15 = vld [vmem:[%s335_s7] sm:$0xff]  ;;  %v481_v21 = vld [vmem:[%s335_s7 + $0x8] sm:$0xff]  ;;  %s497_s12 = scalar_lea.vmem (%p836_p6), %s897_s4, %s672_s9 }
  0x27   : > { %680 = vmatprep.subr.bf16.mxu0 %v770_v6  ;;  %v670_v12 = vld [vmem:[%s384_s6] ss:$0 sm:$0xff] }
  0x2a   : > { %681 = vmatpush3.bf16.msra.mxu0 %v729_v8 }
  0x2d   : > { %683 = vmatmul.mubr.msk.bf16.vlgmr.msra.gmra.mxu0 %vm415_vm1, %v398_v11 }
  0xed   : > { %v453_v13 = vpop.f32.mrf.mxu0 }
  0xee   : > { %v476_v14 = vadd.f32 %v670_v12, %v453_v13 }
  0xef   : > { %v684_v16 = vpop.f32.mrf.mxu0 }
  0xf0   : > { %v478_v17 = vmax.f32 %v476_v14, 0.0 }
  0xf1   : > { %v456_v18 = vpop.f32.mrf.mxu0 }
  0xf2   : > { %v482_v19 = vmul.f32 %v480_v15, %v478_v17  ;;  %v477_v20 = vadd.f32 %v670_v12, %v456_v18 }
  0xf3   : > { %v685_v22 = vpop.f32.mrf.mxu0 }
  0xf4   : > { %484 = vst [vmem:[%s371_s8] sm:$0xff] %v482_v19  ;;  %v479_v23 = vmax.f32 %v477_v20, 0.0  ;;  %492 = sbr.rel (!%p836_p6) target bundleno = 257 (0x101), region = 127 }
  0xf6   : > { %v483_v24 = vmul.f32 %v481_v21, %v479_v23 }
  0xf8   : > { %485 = vst [vmem:[%s371_s8 + $0x8] sm:$0xff] %v483_v24 }
  0xfb   : > { %v528_v25 = vld [vmem:[%s371_s8] sm:$0xff] }
  0xfc   : > { %529 = vst [vmem:[%s497_s12] sm:$0xff] %v528_v25 }
  0xff   : > { %v530_v26 = vld [vmem:[%s371_s8 + $0x8] sm:$0xff] }
 0x100   : > { %531 = vst [vmem:[%s497_s12 + $0x28] sm:$0xff] %v530_v26 }
 0x101 PF: > { %s14_s19 = sadd.s32 1, %s768_s19   ;;  %s900_s15 = smov %s756_s16 }
 0x102   : > { %p11_p12 = scmp.ge.s32.totalorder %s14_s19, 7   ;;  %s901_s16 = smov %s841_s26 }
 0x103   : > { %s902_s17 = smov %s764_s18  ;;  %s903_s18 = smov %s905_s20 }
 0x104   :  { %13 = sbr.rel (!%p11_p12) target bundleno = 3 (0x3), region = 210 }

// kernel: hetereo_moe_semcom_forward.48
= control target key start
LH: loop header
LB: loop body
LE: loop exit
PB: predicated region body
PF: predicated region fallthrough
CT: control target
= control target key end

     0   :  { %v132_v0 = vmov 0.0   ;;  %vm133_vm0 = vmmov 0   ;;  %vm42_vm1 = vcmask 261120   ;;  %s175_s1 = inlined_call_operand.vmem [shape: bf16[32,128], index: 1, kind: input, shape index: {}]   ;;  %s176_s0 = inlined_call_operand.vmem [shape: f32[16,32], index: 0, kind: input, shape index: {}]   ;;  %s177_s2 = inlined_call_operand.vmem [shape: f32[1,128], index: 2, kind: input, shape index: {}]   ;;  %s178_s3 = inlined_call_operand.vmem [shape: f32[16,128], index: 3, kind: output, shape index: {}]  }
   0x1   :  { %120 = vmatprep.subr.bf16.mxu0 %v132_v0  ;;  %v130_v1 = vld [vmem:[%s175_s1 + $0x8] sm:$0xff]   ;;  %124 = vmatprep.mubr.msk.bf16.mxu0 %vm133_vm0, %v132_v0  ;;  %v131_v2 = vld [vmem:[%s175_s1] sm:$0xff]  }
   0x2   :  { %121 = vmatpush3.bf16.msra.mxu0 %v130_v1  ;;  %v23_v3 = vld [vmem:[%s176_s0] sm:$0xff]  ;;  %v24_v4 = vld [vmem:[%s176_s0 + $0x8] sm:$0xff] }
   0x3   :  { %122 = vmatprep.subr.bf16.mxu0 %v132_v0  ;;  %v25_v5 = vpack.c.bf16 %v24_v4, %v23_v3  ;;  %v116_v6 = vld [vmem:[%s177_s2] ss:$0 sm:$0xff] }
   0x6   :  { %123 = vmatpush3.bf16.msra.mxu0 %v131_v2 }
   0x9   :  { %125 = vmatmul.mubr.msk.bf16.vlgmr.msra.gmra.mxu0 %vm42_vm1, %v25_v5 }
  0xc9   :  { %v80_v7 = vpop.f32.mrf.mxu0 }
  0xca   :  { %v103_v8 = vadd.f32 %v116_v6, %v80_v7 }
  0xcb   :  { %v126_v9 = vpop.f32.mrf.mxu0 }
  0xcc   :  { %v105_v10 = vmax.f32 %v103_v8, 0.0 }
  0xcd   :  { %v83_v11 = vpop.f32.mrf.mxu0 }
  0xce   :  { %107 = vst [vmem:[%s178_s3] sm:$0xff] %v105_v10  ;;  %v104_v12 = vadd.f32 %v116_v6, %v83_v11 }
  0xcf   :  { %v127_v13 = vpop.f32.mrf.mxu0 }
  0xd0   :  { %v106_v14 = vmax.f32 %v104_v12, 0.0 }
  0xd2   :  { %108 = vst [vmem:[%s178_s3 + $0x8] sm:$0xff] %v106_v14 }

// kernel: hetereo_moe_semcom_forward.49
= control target key start
LH: loop header
LB: loop body
LE: loop exit
PB: predicated region body
PF: predicated region fallthrough
CT: control target
= control target key end

     0   :  { %vm19_vm0 = vcmask 130048   ;;  %v205_v0 = vmov 0.0   ;;  %vm206_vm1 = vmmov 0   ;;  %s272_s1 = inlined_call_operand.vmem [shape: bf16[128,16], index: 1, kind: input, shape index: {}]   ;;  %s273_s0 = inlined_call_operand.vmem [shape: f32[16,128], index: 0, kind: input, shape index: {}]   ;;  %s274_s2 = inlined_call_operand.vmem [shape: f32[1,16], index: 2, kind: input, shape index: {}]   ;;  %s275_s3 = inlined_call_operand.vmem [shape: f32[16,16], index: 3, kind: output, shape index: {}]  }
   0x1   :  { %175 = vmatprep.subr.bf16.mxu0 %v205_v0  ;;  %v197_v1 = vld [vmem:[%s272_s1 + $0x38] sm:$0xff]   ;;  %191 = vmatprep.mubr.msk.bf16.mxu0 %vm206_vm1, %v205_v0  ;;  %20 = vst.msk [vmem:[#allocation2] sm:$0xff] %vm19_vm0, %v205_v0  ;;  %21 = vst.msk [vmem:[#allocation2 + $0x8] sm:$0xff] %vm19_vm0, %v205_v0  ;;  %v198_v2 = vld [vmem:[%s272_s1 + $0x30] sm:$0xff]  }
   0x2   :  { %176 = vmatpush3.bf16.msra.mxu0 %v197_v1  ;;  %v199_v3 = vld [vmem:[%s272_s1 + $0x28] sm:$0xff]   ;;  %v200_v4 = vld [vmem:[%s272_s1 + $0x20] sm:$0xff]   ;;  %v201_v5 = vld [vmem:[%s272_s1 + $0x18] sm:$0xff]  }
   0x3   :  { %177 = vmatprep.subr.bf16.mxu0 %v205_v0  ;;  %v202_v6 = vld [vmem:[%s272_s1 + $0x10] sm:$0xff]   ;;  %v203_v7 = vld [vmem:[%s272_s1 + $0x8] sm:$0xff]   ;;  %v204_v8 = vld [vmem:[%s272_s1] sm:$0xff]  }
   0x4   :  { %v24_v9 = vld [vmem:[%s273_s0] sm:$0xff]  ;;  %v25_v10 = vld [vmem:[%s273_s0 + $0x8] sm:$0xff] }
   0x5   :  { %v26_v11 = vpack.c.bf16 %v25_v10, %v24_v9  ;;  %v165_v20 = vld [vmem:[%s274_s2] ss:$0 sm:$0xff] }
   0x6   :  { %178 = vmatpush3.bf16.msra.mxu0 %v198_v2 }
   0x7   :  { %179 = vmatprep.subr.bf16.mxu0 %v205_v0 }
   0x8   :  { %v22_v12 = vld [vmem:[#allocation2] sm:$0xff]  ;;  %v23_v16 = vld [vmem:[#allocation2 + $0x8] sm:$0xff] }
   0xa   :  { %180 = vmatpush3.bf16.msra.mxu0 %v199_v3 }
   0xb   :  { %181 = vmatprep.subr.bf16.mxu0 %v205_v0 }
   0xe   :  { %182 = vmatpush3.bf16.msra.mxu0 %v200_v4 }
   0xf   :  { %183 = vmatprep.subr.bf16.mxu0 %v205_v0 }
  0x12   :  { %184 = vmatpush3.bf16.msra.mxu0 %v201_v5 }
  0x13   :  { %185 = vmatprep.subr.bf16.mxu0 %v205_v0 }
  0x16   :  { %186 = vmatpush3.bf16.msra.mxu0 %v202_v6 }
  0x17   :  { %187 = vmatprep.subr.bf16.mxu0 %v205_v0 }
  0x1a   :  { %188 = vmatpush3.bf16.msra.mxu0 %v203_v7 }
  0x1b   :  { %189 = vmatprep.subr.bf16.mxu0 %v205_v0 }
  0x1e   :  { %190 = vmatpush3.bf16.msra.mxu0 %v204_v8 }
  0x21   :  { %192 = vmatmul.mubr.bf16.vlgmr.msra.gmra.mxu0 %v26_v11 }
  0xe1   :  { %v125_v13 = vpop.f32.mrf.mxu0 }
  0xe2   :  { %v132_v14 = vadd.f32 %v125_v13, %v22_v12 }
  0xe3   :  { %v193_v15 = vpop.f32.mrf.mxu0 }
  0xe4   :  { %135 = vst.msk [vmem:[#allocation2] sm:$0xff] %vm19_vm0, %v132_v14 }
  0xe5   :  { %v128_v17 = vpop.f32.mrf.mxu0 }
  0xe6   :  { %v133_v18 = vadd.f32 %v128_v17, %v23_v16 }
  0xe7   :  { %v194_v19 = vpop.f32.mrf.mxu0 }
  0xe8   :  { %136 = vst.msk [vmem:[#allocation2 + $0x8] sm:$0xff] %vm19_vm0, %v133_v18 }
  0xeb   :  { %v140_v21 = vld [vmem:[#allocation2] sm:$0xff] }
  0xec   :  { %v149_v22 = vadd.f32 %v165_v20, %v140_v21 }
  0xee   :  { %151 = vst.msk [vmem:[%s275_s3] sm:$0xff] %vm19_vm0, %v149_v22 }
  0xef   :  { %v141_v23 = vld [vmem:[#allocation2 + $0x8] sm:$0xff] }
  0xf0   :  { %v150_v24 = vadd.f32 %v165_v20, %v141_v23 }
  0xf2   :  { %152 = vst.msk [vmem:[%s275_s3 + $0x8] sm:$0xff] %vm19_vm0, %v150_v24 }

// kernel: hetereo_moe_semcom_forward.42
= control target key start
LH: loop header
LB: loop body
LE: loop exit
PB: predicated region body
PF: predicated region fallthrough
CT: control target
= control target key end

     0   :  { %v733_v39 = vmov 0.0   ;;  %vm734_vm0 = vmmov 0   ;;  %vm28_vm1 = vcmask 261120   ;;  %s951_s1 = inlined_call_operand.vmem [shape: bf16[640,32], index: 1, kind: input, shape index: {}]   ;;  %s952_s0 = inlined_call_operand.vmem [shape: f32[16,640], index: 0, kind: input, shape index: {}]   ;;  %s953_s2 = inlined_call_operand.vmem [shape: f32[1,32], index: 2, kind: input, shape index: {}]   ;;  %s954_s3 = inlined_call_operand.vmem [shape: f32[16,32], index: 3, kind: input, shape index: {}]   ;;  %s955_s4 = inlined_call_operand.vmem [shape: f32[1,32], index: 4, kind: input, shape index: {}]   ;;  %s956_s5 = inlined_call_operand.vmem [shape: f32[1,32], index: 5, kind: input, shape index: {}]   ;;  %s957_s6 = inlined_call_operand.vmem [shape: f32[16,32], index: 6, kind: output, shape index: {}]  }
   0x1   :  { %v689_v0 = vld [vmem:[%s951_s1 + $0x78] sm:$0xff]   ;;  %v693_v4 = vld [vmem:[%s951_s1 + $0x70] sm:$0xff]   ;;  %v697_v8 = vld [vmem:[%s951_s1 + $0x68] sm:$0xff]   ;;  %29 = vst.msk [vmem:[#allocation2] sm:$0xff] %vm28_vm1, %v733_v39 }
   0x2   :  { %v690_v1 = vld [vmem:[%s951_s1 + $0xf8] sm:$0xff]   ;;  %614 = vmatprep.subr.bf16.mxu0 %v689_v0  ;;  %v694_v5 = vld [vmem:[%s951_s1 + $0xf0] sm:$0xff]   ;;  %v698_v9 = vld [vmem:[%s951_s1 + $0xe8] sm:$0xff]   ;;  %30 = vst.msk [vmem:[#allocation2 + $0x8] sm:$0xff] %vm28_vm1, %v733_v39 }
   0x3   :  { %v691_v2 = vld [vmem:[%s951_s1 + $0x38] sm:$0xff]   ;;  %636 = vmatprep.subr.bf16.mxu1 %v690_v1  ;;  %v695_v6 = vld [vmem:[%s951_s1 + $0x30] sm:$0xff]   ;;  %v699_v10 = vld [vmem:[%s951_s1 + $0x28] sm:$0xff]  }
   0x4   :  { %v692_v3 = vld [vmem:[%s951_s1 + $0xb8] sm:$0xff]   ;;  %615 = vmatpush3.bf16.msra.mxu0 %v691_v2  ;;  %v696_v7 = vld [vmem:[%s951_s1 + $0xb0] sm:$0xff]   ;;  %v700_v11 = vld [vmem:[%s951_s1 + $0xa8] sm:$0xff]  }
   0x5   :  { %637 = vmatpush3.bf16.msra.mxu1 %v692_v3  ;;  %616 = vmatprep.subr.bf16.mxu0 %v693_v4  ;;  %v701_v12 = vld [vmem:[%s951_s1 + $0x60] sm:$0xff]   ;;  %v705_v16 = vld [vmem:[%s951_s1 + $0x58] sm:$0xff]   ;;  %v709_v20 = vld [vmem:[%s951_s1 + $0x50] sm:$0xff]  }
   0x6   :  { %638 = vmatprep.subr.bf16.mxu1 %v694_v5  ;;  %v702_v13 = vld [vmem:[%s951_s1 + $0xe0] sm:$0xff]   ;;  %v706_v17 = vld [vmem:[%s951_s1 + $0xd8] sm:$0xff]   ;;  %v710_v21 = vld [vmem:[%s951_s1 + $0xd0] sm:$0xff]  }
   0x7   :  { %v703_v14 = vld [vmem:[%s951_s1 + $0x20] sm:$0xff]   ;;  %v707_v18 = vld [vmem:[%s951_s1 + $0x18] sm:$0xff]   ;;  %v711_v22 = vld [vmem:[%s951_s1 + $0x10] sm:$0xff]  }
   0x8   :  { %617 = vmatpush3.bf16.msra.mxu0 %v695_v6  ;;  %v704_v15 = vld [vmem:[%s951_s1 + $0xa0] sm:$0xff]   ;;  %v708_v19 = vld [vmem:[%s951_s1 + $0x98] sm:$0xff]   ;;  %v712_v23 = vld [vmem:[%s951_s1 + $0x90] sm:$0xff]  }
   0x9   :  { %639 = vmatpush3.bf16.msra.mxu1 %v696_v7  ;;  %618 = vmatprep.subr.bf16.mxu0 %v697_v8  ;;  %v713_v24 = vld [vmem:[%s951_s1 + $0x48] sm:$0xff]   ;;  %v717_v28 = vld [vmem:[%s951_s1 + $0x40] sm:$0xff]   ;;  %v39_v33 = vld [vmem:[%s952_s0 + $0x30] sm:$0xff] }
   0xa   :  { %640 = vmatprep.subr.bf16.mxu1 %v698_v9  ;;  %v714_v25 = vld [vmem:[%s951_s1 + $0xc8] sm:$0xff]   ;;  %v718_v29 = vld [vmem:[%s951_s1 + $0xc0] sm:$0xff]   ;;  %v36_v34 = vld [vmem:[%s952_s0 + $0x18] sm:$0xff] }
   0xb   :  { %v715_v26 = vld [vmem:[%s951_s1 + $0x8] sm:$0xff]   ;;  %v719_v30 = vld [vmem:[%s951_s1] sm:$0xff]   ;;  %v35_v42 = vld [vmem:[%s952_s0 + $0x10] sm:$0xff] }
   0xc   :  { %619 = vmatpush3.bf16.msra.mxu0 %v699_v10  ;;  %v716_v27 = vld [vmem:[%s951_s1 + $0x88] sm:$0xff]   ;;  %v720_v31 = vld [vmem:[%s951_s1 + $0x80] sm:$0xff]   ;;  %v40_v43 = vld [vmem:[%s952_s0 + $0x38] sm:$0xff] }
   0xd   :  { %641 = vmatpush3.bf16.msra.mxu1 %v700_v11  ;;  %620 = vmatprep.subr.bf16.mxu0 %v701_v12  ;;  %v34_v32 = vld [vmem:[%s952_s0 + $0x8] sm:$0xff]  ;;  %v41_v36 = vld [vmem:[%s952_s0 + $0x40] sm:$0xff]  ;;  %v45_v44 = vpack.c.bf16 %v40_v43, %v35_v42  ;;  %v721_v45 = vld [vmem:[%s951_s1 + $0x138] sm:$0xff]  }
   0xe   :  { %642 = vmatprep.subr.bf16.mxu1 %v702_v13  ;;  %v44_v35 = vpack.c.bf16 %v39_v33, %v34_v32  ;;  %v33_v37 = vld [vmem:[%s952_s0] sm:$0xff]  ;;  %v38_v38 = vld [vmem:[%s952_s0 + $0x28] sm:$0xff]  ;;  %v46_v40 = vpack.c.bf16 %v41_v36, %v36_v34  ;;  %v722_v46 = vld [vmem:[%s951_s1 + $0x130] sm:$0xff]  }
   0xf   :  { %v43_v41 = vpack.c.bf16 %v38_v38, %v33_v37  ;;  %v723_v47 = vld [vmem:[%s951_s1 + $0x128] sm:$0xff]   ;;  %v724_v48 = vld [vmem:[%s951_s1 + $0x120] sm:$0xff]   ;;  %v725_v49 = vld [vmem:[%s951_s1 + $0x118] sm:$0xff]  }
  0x10   :  { %621 = vmatpush3.bf16.msra.mxu0 %v703_v14  ;;  %400 = vmatprep.mubr.bf16.mxu0 %v44_v35  ;;  %v726_v50 = vld [vmem:[%s951_s1 + $0x110] sm:$0xff]   ;;  %v727_v51 = vld [vmem:[%s951_s1 + $0x108] sm:$0xff]   ;;  %v728_v52 = vld [vmem:[%s951_s1 + $0x100] sm:$0xff]  }
  0x11   :  { %643 = vmatpush3.bf16.msra.mxu1 %v704_v15  ;;  %622 = vmatprep.subr.bf16.mxu0 %v705_v16  ;;  %v37_v53 = vld [vmem:[%s952_s0 + $0x20] sm:$0xff]  ;;  %v42_v54 = vld [vmem:[%s952_s0 + $0x48] sm:$0xff] }
  0x12   :  { %644 = vmatprep.subr.bf16.mxu1 %v706_v17  ;;  %441 = vmatprep.mubr.bf16.mxu1 %v46_v40  ;;  %v47_v55 = vpack.c.bf16 %v42_v54, %v37_v53  ;;  %v31_v5 = vld [vmem:[#allocation2] sm:$0xff]  ;;  %v32_v11 = vld [vmem:[#allocation2 + $0x8] sm:$0xff] }
  0x13   :  { %v611_v16 = vld [vmem:[%s953_s2] ss:$0 sm:$0xff] }
  0x14   :  { %623 = vmatpush3.bf16.msra.mxu0 %v707_v18  ;;  %v510_v18 = vld [vmem:[%s954_s3] sm:$0xff] }
  0x15   :  { %645 = vmatpush3.bf16.msra.mxu1 %v708_v19  ;;  %624 = vmatprep.subr.bf16.mxu0 %v709_v20 }
  0x16   :  { %646 = vmatprep.subr.bf16.mxu1 %v710_v21 }
  0x18   :  { %625 = vmatpush3.bf16.msra.mxu0 %v711_v22  ;;  %v511_v22 = vld [vmem:[%s954_s3 + $0x8] sm:$0xff] }
  0x19   :  { %647 = vmatpush3.bf16.msra.mxu1 %v712_v23  ;;  %626 = vmatprep.subr.bf16.mxu0 %v713_v24 }
  0x1a   :  { %648 = vmatprep.subr.bf16.mxu1 %v714_v25 }
  0x1c   :  { %627 = vmatpush3.bf16.msra.mxu0 %v715_v26 }
  0x1d   :  { %649 = vmatpush3.bf16.msra.mxu1 %v716_v27  ;;  %628 = vmatprep.subr.bf16.mxu0 %v717_v28 }
  0x1e   :  { %650 = vmatprep.subr.bf16.mxu1 %v718_v29 }
  0x20   :  { %629 = vmatpush3.bf16.msra.mxu0 %v719_v30 }
  0x21   :  { %651 = vmatpush3.bf16.msra.mxu1 %v720_v31  ;;  %667 = vmatprep.subr.bf16.mxu0 %v733_v39 }
  0x23   :  { %401 = vmatmul.mubr.bf16.vlgmr.msra.gmra.mxu0 %v43_v41 }
  0x24   :  { %442 = vmatmul.mubr.bf16.vlgmr.msra.gmra.mxu1 %v45_v44  ;;  %668 = vmatpush3.bf16.msra.mxu0 %v721_v45 }
  0x25   :  { %669 = vmatprep.subr.bf16.mxu0 %v733_v39  ;;  %683 = vmatprep.mubr.msk.bf16.mxu0 %vm734_vm0, %v733_v39 }
  0x28   :  { %670 = vmatpush3.bf16.msra.mxu0 %v722_v46 }
  0x29   :  { %671 = vmatprep.subr.bf16.mxu0 %v733_v39 }
  0x2c   :  { %672 = vmatpush3.bf16.msra.mxu0 %v723_v47 }
  0x2d   :  { %673 = vmatprep.subr.bf16.mxu0 %v733_v39 }
  0x30   :  { %674 = vmatpush3.bf16.msra.mxu0 %v724_v48 }
  0x31   :  { %675 = vmatprep.subr.bf16.mxu0 %v733_v39 }
  0x34   :  { %676 = vmatpush3.bf16.msra.mxu0 %v725_v49  ;;  %v612_v49 = vld [vmem:[%s955_s4] ss:$0 sm:$0xff] }
  0x35   :  { %677 = vmatprep.subr.bf16.mxu0 %v733_v39 }
  0x38   :  { %678 = vmatpush3.bf16.msra.mxu0 %v726_v50 }
  0x39   :  { %679 = vmatprep.subr.bf16.mxu0 %v733_v39 }
  0x3c   :  { %680 = vmatpush3.bf16.msra.mxu0 %v727_v51  ;;  %v613_v51 = vld [vmem:[%s956_s5] ss:$0 sm:$0xff] }
  0x3d   :  { %681 = vmatprep.subr.bf16.mxu0 %v733_v39 }
  0x40   :  { %682 = vmatpush3.bf16.msra.mxu0 %v728_v52 }
  0x43   :  { %684 = vmatmul.mubr.bf16.vlgmr.msra.gmra.mxu0 %v47_v55 }
  0xe3   :  { %v630_v56 = vpop.f32.mrf.mxu0 }
  0xe4   :  { %v652_v57 = vpop.f32.mrf.mxu1 }
  0xe5   :  { %v631_v58 = vpop.f32.mrf.mxu0 }
  0xe6   :  { %v653_v59 = vpop.f32.mrf.mxu1  ;;  %v632_v62 = vadd.f32 %v631_v58, %v630_v56 }
  0xe7   :  { %v633_v60 = vpop.f32.mrf.mxu0  ;;  %v654_v63 = vadd.f32 %v653_v59, %v652_v57 }
  0xe8   :  { %v655_v61 = vpop.f32.mrf.mxu1 }
  0xe9   :  { %v634_v0 = vpop.f32.mrf.mxu0  ;;  %v444_v4 = vadd.f32 %v654_v63, %v632_v62 }
  0xea   :  { %v656_v1 = vpop.f32.mrf.mxu1  ;;  %v635_v2 = vadd.f32 %v634_v0, %v633_v60 }
  0xeb   :  { %v657_v3 = vadd.f32 %v656_v1, %v655_v61 }
  0xed   :  { %v447_v10 = vadd.f32 %v657_v3, %v635_v2 }
 0x103   :  { %v484_v6 = vpop.f32.mrf.mxu0 }
 0x104   :  { %v485_v7 = vadd.f32 %v484_v6, %v444_v4 }
 0x105   :  { %v685_v8 = vpop.f32.mrf.mxu0 }
 0x106   :  { %v491_v9 = vadd.f32 %v485_v7, %v31_v5 }
 0x107   :  { %v487_v12 = vpop.f32.mrf.mxu0 }
 0x108   :  { %494 = vst.msk [vmem:[#allocation2] sm:$0xff] %vm28_vm1, %v491_v9  ;;  %v488_v13 = vadd.f32 %v487_v12, %v447_v10 }
 0x109   :  { %v686_v14 = vpop.f32.mrf.mxu0 }
 0x10a   :  { %v492_v15 = vadd.f32 %v488_v13, %v32_v11 }
 0x10c   :  { %495 = vst.msk [vmem:[#allocation2 + $0x8] sm:$0xff] %vm28_vm1, %v492_v15 }
 0x10f   :  { %v499_v17 = vld [vmem:[#allocation2] sm:$0xff] }
 0x110   :  { %v508_v19 = vadd.f32 %v611_v16, %v499_v17 }
 0x112   :  { %v512_v20 = vadd.f32 %v510_v18, %v508_v19 }
 0x113   :  { %v500_v21 = vld [vmem:[#allocation2 + $0x8] sm:$0xff] }
 0x114   :  { %v514_v23 = vsel %vm28_vm1, %v512_v20, 0.0  ;;  %v523_v24 = vmul.f32 %v512_v20, %v512_v20  ;;  %v509_v25 = vadd.f32 %v611_v16, %v500_v21 }
 0x115   :  { %515 = vadd.xlane.f32.xlu0 %v514_v23 }
 0x116   :  { %v525_v26 = vsel %vm28_vm1, %v523_v24, 0.0  ;;  %v513_v27 = vadd.f32 %v511_v22, %v509_v25 }
 0x117   :  { %526 = vadd.xlane.f32.xlu1 %v525_v26 }
 0x118   :  { %v517_v28 = vsel %vm28_vm1, %v513_v27, 0.0  ;;  %v524_v29 = vmul.f32 %v513_v27, %v513_v27 }
 0x119   :  { %518 = vadd.xlane.f32.xlu0 %v517_v28 }
 0x11a   :  { %v528_v30 = vsel %vm28_vm1, %v524_v29, 0.0 }
 0x11b   :  { %529 = vadd.xlane.f32.xlu1 %v528_v30 }
 0x19e   :  { %v516_v31 = vpop.xlane.xlu0 %515 }
 0x19f   :  { %v521_v32 = vmul.f32 0.03125, %v516_v31 }
 0x1a0   :  { %v527_v33 = vpop.xlane.xlu1 %526 }
 0x1a1   :  { %v533_v34 = vmul.f32 %v521_v32, %v521_v32  ;;  %v531_v35 = vmul.f32 0.03125, %v527_v33  ;;  %v539_v47 = vsub.f32 %v512_v20, %v521_v32 }
 0x1a2   :  { %v519_v36 = vpop.xlane.xlu0 %518 }
 0x1a3   :  { %v535_v37 = vsub.f32 %v531_v35, %v533_v34  ;;  %v522_v38 = vmul.f32 0.03125, %v519_v36 }
 0x1a4   :  { %v530_v39 = vpop.xlane.xlu1 %529 }
 0x1a5   :  { %v537_v40 = vmax.f32 %v535_v37, 0.0  ;;  %v534_v41 = vmul.f32 %v522_v38, %v522_v38  ;;  %v532_v42 = vmul.f32 0.03125, %v530_v39  ;;  %v540_v53 = vsub.f32 %v513_v27, %v522_v38 }
 0x1a7   :  { %v541_v43 = vadd.f32 1e-05, %v537_v40  ;;  %v536_v44 = vsub.f32 %v532_v42, %v534_v41 }
 0x1a9   :  { %729 = vrsqrt.f32 %v541_v43  ;;  %v538_v45 = vmax.f32 %v536_v44, 0.0 }
 0x1ab   :  { %v542_v46 = vadd.f32 1e-05, %v538_v45 }
 0x1ad   :  { %731 = vrsqrt.f32 %v542_v46 }
 0x1b6   :  { %v730_v48 = vpop.eup %729 }
 0x1b7   :  { %v545_v50 = vmul.f32 %v730_v48, %v539_v47 }
 0x1b9   :  { %v554_v52 = vmul.f32 %v612_v49, %v545_v50 }
 0x1ba   :  { %v732_v54 = vpop.eup %731 }
 0x1bb   :  { %v563_v55 = vadd.f32 %v613_v51, %v554_v52  ;;  %v546_v56 = vmul.f32 %v732_v54, %v540_v53 }
 0x1bd   :  { %565 = vst.msk [vmem:[%s957_s6] sm:$0xff] %vm28_vm1, %v563_v55  ;;  %v555_v57 = vmul.f32 %v612_v49, %v546_v56 }
 0x1bf   :  { %v564_v58 = vadd.f32 %v613_v51, %v555_v57 }
 0x1c1   :  { %566 = vst.msk [vmem:[%s957_s6 + $0x8] sm:$0xff] %vm28_vm1, %v564_v58 }

// kernel: hetereo_moe_semcom_forward.51
= control target key start
LH: loop header
LB: loop body
LE: loop exit
PB: predicated region body
PF: predicated region fallthrough
CT: control target
= control target key end

     0   :  { %v119_v0 = vmov 0.0   ;;  %vm120_vm0 = vmmov 0   ;;  %vm34_vm1 = vcmask 130048   ;;  %s159_s1 = inlined_call_operand.vmem [shape: bf16[16,128], index: 1, kind: input, shape index: {}]   ;;  %s160_s0 = inlined_call_operand.vmem [shape: f32[16,16], index: 0, kind: input, shape index: {}]   ;;  %s161_s2 = inlined_call_operand.vmem [shape: f32[1,128], index: 2, kind: input, shape index: {}]   ;;  %s162_s3 = inlined_call_operand.vmem [shape: f32[16,128], index: 3, kind: output, shape index: {}]  }
   0x1   :  { %110 = vmatprep.subr.bf16.mxu0 %v119_v0  ;;  %v118_v1 = vld [vmem:[%s159_s1] sm:$0xff]   ;;  %112 = vmatprep.mubr.msk.bf16.mxu0 %vm120_vm0, %v119_v0  ;;  %v24_v3 = vld [vmem:[%s160_s0 + $0x8] sm:$0xff] }
   0x2   :  { %v23_v2 = vld [vmem:[%s160_s0] sm:$0xff]  ;;  %111 = vmatpush3.bf16.msra.mxu0 %v118_v1 }
   0x3   :  { %v25_v4 = vpack.c.bf16 %v24_v3, %v23_v2  ;;  %v107_v5 = vld [vmem:[%s161_s2] ss:$0 sm:$0xff] }
   0x5   :  { %113 = vmatmul.mubr.msk.bf16.vlgmr.msra.gmra.mxu0 %vm34_vm1, %v25_v4 }
  0xc5   :  { %v72_v6 = vpop.f32.mrf.mxu0 }
  0xc6   :  { %v95_v7 = vadd.f32 %v107_v5, %v72_v6 }
  0xc7   :  { %v114_v8 = vpop.f32.mrf.mxu0 }
  0xc8   :  { %v97_v9 = vmax.f32 %v95_v7, 0.0 }
  0xc9   :  { %v75_v10 = vpop.f32.mrf.mxu0 }
  0xca   :  { %99 = vst [vmem:[%s162_s3] sm:$0xff] %v97_v9  ;;  %v96_v11 = vadd.f32 %v107_v5, %v75_v10 }
  0xcb   :  { %v115_v12 = vpop.f32.mrf.mxu0 }
  0xcc   :  { %v98_v13 = vmax.f32 %v96_v11, 0.0 }
  0xce   :  { %100 = vst [vmem:[%s162_s3 + $0x8] sm:$0xff] %v98_v13 }

// kernel: hetereo_moe_semcom_forward.50
= control target key start
LH: loop header
LB: loop body
LE: loop exit
PB: predicated region body
PF: predicated region fallthrough
CT: control target
= control target key end

     0   :  { %s81_s16 = smov 120   ;;  %vm27_vm0 = vcmask 64512   ;;  %vm63_vm1 = vcmask 130048   ;;  %s126_s0 = inlined_call_operand.vmem [shape: f32[2,8,16], index: 0, kind: input, shape index: {}]   ;;  %s127_s1 = inlined_call_operand.vmem [shape: f32[2,8,16], index: 1, kind: input, shape index: {}]   ;;  %s128_s2 = inlined_call_operand.vmem [shape: f32[2,8,16], index: 2, kind: output, shape index: {0}]   ;;  %s129_s3 = inlined_call_operand.vmem [shape: f32[2,8,16], index: 3, kind: output, shape index: {1}]  }
   0x1   :  { %v13_v0 = vld [vmem:[%s126_s0] sm:$0xff]  ;;  %v14_v1 = vld [vmem:[%s126_s0 + $0x8] sm:$0xff] }
   0x2   :  { %v15_v2 = vmul.f32 %v13_v0, %v13_v0  ;;  %v16_v3 = vmul.f32 %v14_v1, %v14_v1  ;;  %v57_v30 = vld [vmem:[%s127_s1] sm:$0xff]  ;;  %v58_v33 = vld [vmem:[%s127_s1 + $0x8] sm:$0xff] }
   0x3   :  { %v59_v31 = vmul.f32 0.12574334, %v57_v30  ;;  %v60_v36 = vmul.f32 0.12574334, %v58_v33 }
   0x4   :  { %19 = vrot.lane.b32.xlu0 %v15_v2, %s81_s16 }
   0x8   :  { %21 = vrot.lane.b32.xlu0 %v16_v3, %s81_s16 }
  0x76   :  { %v20_v4 = vpop.permute.xlu0 %19 }
  0x77   :  { %v25_v5 = vadd.f32 %v20_v4, %v15_v2 }
  0x79   :  { %v28_v6 = vsel %vm27_vm0, %v25_v5, 0.0 }
  0x7a   :  { %29 = vadd.xlane.f32.xlu1 %v28_v6  ;;  %v22_v7 = vpop.permute.xlu0 %21 }
  0x7b   :  { %v26_v8 = vadd.f32 %v22_v7, %v16_v3 }
  0x7d   :  { %v31_v9 = vsel %vm27_vm0, %v26_v8, 0.0 }
  0x7e   :  { %32 = vadd.xlane.f32.xlu1 %v31_v9 }
 0x103   :  { %v30_v10 = vpop.xlane.xlu1 %29 }
 0x104   :  { %v35_v11 = vmul.f32 0.125, %v30_v10 }
 0x106   :  { %v37_v12 = vrot.slane %v35_v11, 4 }
 0x107   :  { %v33_v13 = vpop.xlane.xlu1 %32 }
 0x108   :  { %v38_v14 = vadd.f32 %v37_v12, %v35_v11  ;;  %v36_v15 = vmul.f32 0.125, %v33_v13 }
 0x10a   :  { %v39_v16 = vrot.slane %v38_v14, 2  ;;  %v43_v17 = vrot.slane %v36_v15, 4 }
 0x10c   :  { %v40_v18 = vadd.f32 %v39_v16, %v38_v14  ;;  %v44_v19 = vadd.f32 %v43_v17, %v36_v15 }
 0x10e   :  { %v41_v20 = vrot.slane %v40_v18, 1  ;;  %v45_v21 = vrot.slane %v44_v19, 2 }
 0x110   :  { %v42_v22 = vadd.f32 %v41_v20, %v40_v18  ;;  %v46_v23 = vadd.f32 %v45_v21, %v44_v19 }
 0x112   :  { %v49_v24 = vmul.f32 0.125, %v42_v22  ;;  %v47_v25 = vrot.slane %v46_v23, 1 }
 0x114   :  { %v51_v26 = vadd.f32 1e-08, %v49_v24  ;;  %v48_v27 = vadd.f32 %v47_v25, %v46_v23 }
 0x116   :  { %77 = vrsqrt.f32 %v51_v26  ;;  %v50_v28 = vmul.f32 0.125, %v48_v27 }
 0x118   :  { %v52_v29 = vadd.f32 1e-08, %v50_v28 }
 0x11a   :  { %79 = vrsqrt.f32 %v52_v29 }
 0x123   :  { %v78_v32 = vpop.eup %77 }
 0x124   :  { %v55_v34 = vmul.f32 %v78_v32, %v13_v0 }
 0x126   :  { %v61_v35 = vadd.f32 %v59_v31, %v55_v34  ;;  %64 = vst.msk [vmem:[%s128_s2] sm:$0xff] %vm63_vm1, %v55_v34 }
 0x127   :  { %v80_v37 = vpop.eup %79 }
 0x128   :  { %66 = vst.msk [vmem:[%s129_s3] sm:$0xff] %vm63_vm1, %v61_v35  ;;  %v56_v38 = vmul.f32 %v80_v37, %v14_v1 }
 0x12a   :  { %v62_v39 = vadd.f32 %v60_v36, %v56_v38  ;;  %65 = vst.msk [vmem:[%s128_s2 + $0x8] sm:$0xff] %vm63_vm1, %v56_v38 }
 0x12c   :  { %67 = vst.msk [vmem:[%s129_s3 + $0x8] sm:$0xff] %vm63_vm1, %v62_v39 }

// kernel: hetereo_moe_semcom_forward.52
= control target key start
LH: loop header
LB: loop body
LE: loop exit
PB: predicated region body
PF: predicated region fallthrough
CT: control target
= control target key end

     0   :  { %vm19_vm0 = vcmask 261120   ;;  %v205_v0 = vmov 0.0   ;;  %vm206_vm1 = vmmov 0   ;;  %s272_s1 = inlined_call_operand.vmem [shape: bf16[128,32], index: 1, kind: input, shape index: {}]   ;;  %s273_s0 = inlined_call_operand.vmem [shape: f32[16,128], index: 0, kind: input, shape index: {}]   ;;  %s274_s2 = inlined_call_operand.vmem [shape: f32[1,32], index: 2, kind: input, shape index: {}]   ;;  %s275_s3 = inlined_call_operand.vmem [shape: f32[16,32], index: 3, kind: output, shape index: {}]  }
   0x1   :  { %175 = vmatprep.subr.bf16.mxu0 %v205_v0  ;;  %v197_v1 = vld [vmem:[%s272_s1 + $0x38] sm:$0xff]   ;;  %191 = vmatprep.mubr.msk.bf16.mxu0 %vm206_vm1, %v205_v0  ;;  %20 = vst.msk [vmem:[#allocation2] sm:$0xff] %vm19_vm0, %v205_v0  ;;  %21 = vst.msk [vmem:[#allocation2 + $0x8] sm:$0xff] %vm19_vm0, %v205_v0  ;;  %v198_v2 = vld [vmem:[%s272_s1 + $0x30] sm:$0xff]  }
   0x2   :  { %176 = vmatpush3.bf16.msra.mxu0 %v197_v1  ;;  %v199_v3 = vld [vmem:[%s272_s1 + $0x28] sm:$0xff]   ;;  %v200_v4 = vld [vmem:[%s272_s1 + $0x20] sm:$0xff]   ;;  %v201_v5 = vld [vmem:[%s272_s1 + $0x18] sm:$0xff]  }
   0x3   :  { %177 = vmatprep.subr.bf16.mxu0 %v205_v0  ;;  %v202_v6 = vld [vmem:[%s272_s1 + $0x10] sm:$0xff]   ;;  %v203_v7 = vld [vmem:[%s272_s1 + $0x8] sm:$0xff]   ;;  %v204_v8 = vld [vmem:[%s272_s1] sm:$0xff]  }
   0x4   :  { %v24_v9 = vld [vmem:[%s273_s0] sm:$0xff]  ;;  %v25_v10 = vld [vmem:[%s273_s0 + $0x8] sm:$0xff] }
   0x5   :  { %v26_v11 = vpack.c.bf16 %v25_v10, %v24_v9  ;;  %v165_v20 = vld [vmem:[%s274_s2] ss:$0 sm:$0xff] }
   0x6   :  { %178 = vmatpush3.bf16.msra.mxu0 %v198_v2 }
   0x7   :  { %179 = vmatprep.subr.bf16.mxu0 %v205_v0 }
   0x8   :  { %v22_v12 = vld [vmem:[#allocation2] sm:$0xff]  ;;  %v23_v16 = vld [vmem:[#allocation2 + $0x8] sm:$0xff] }
   0xa   :  { %180 = vmatpush3.bf16.msra.mxu0 %v199_v3 }
   0xb   :  { %181 = vmatprep.subr.bf16.mxu0 %v205_v0 }
   0xe   :  { %182 = vmatpush3.bf16.msra.mxu0 %v200_v4 }
   0xf   :  { %183 = vmatprep.subr.bf16.mxu0 %v205_v0 }
  0x12   :  { %184 = vmatpush3.bf16.msra.mxu0 %v201_v5 }
  0x13   :  { %185 = vmatprep.subr.bf16.mxu0 %v205_v0 }
  0x16   :  { %186 = vmatpush3.bf16.msra.mxu0 %v202_v6 }
  0x17   :  { %187 = vmatprep.subr.bf16.mxu0 %v205_v0 }
  0x1a   :  { %188 = vmatpush3.bf16.msra.mxu0 %v203_v7 }
  0x1b   :  { %189 = vmatprep.subr.bf16.mxu0 %v205_v0 }
  0x1e   :  { %190 = vmatpush3.bf16.msra.mxu0 %v204_v8 }
  0x21   :  { %192 = vmatmul.mubr.bf16.vlgmr.msra.gmra.mxu0 %v26_v11 }
  0xe1   :  { %v125_v13 = vpop.f32.mrf.mxu0 }
  0xe2   :  { %v132_v14 = vadd.f32 %v125_v13, %v22_v12 }
  0xe3   :  { %v193_v15 = vpop.f32.mrf.mxu0 }
  0xe4   :  { %135 = vst.msk [vmem:[#allocation2] sm:$0xff] %vm19_vm0, %v132_v14 }
  0xe5   :  { %v128_v17 = vpop.f32.mrf.mxu0 }
  0xe6   :  { %v133_v18 = vadd.f32 %v128_v17, %v23_v16 }
  0xe7   :  { %v194_v19 = vpop.f32.mrf.mxu0 }
  0xe8   :  { %136 = vst.msk [vmem:[#allocation2 + $0x8] sm:$0xff] %vm19_vm0, %v133_v18 }
  0xeb   :  { %v140_v21 = vld [vmem:[#allocation2] sm:$0xff] }
  0xec   :  { %v149_v22 = vadd.f32 %v165_v20, %v140_v21 }
  0xee   :  { %151 = vst.msk [vmem:[%s275_s3] sm:$0xff] %vm19_vm0, %v149_v22 }
  0xef   :  { %v141_v23 = vld [vmem:[#allocation2 + $0x8] sm:$0xff] }
  0xf0   :  { %v150_v24 = vadd.f32 %v165_v20, %v141_v23 }
  0xf2   :  { %152 = vst.msk [vmem:[%s275_s3 + $0x8] sm:$0xff] %vm19_vm0, %v150_v24 }

// kernel: hetereo_moe_semcom_forward.57
= control target key start
LH: loop header
LB: loop body
LE: loop exit
PB: predicated region body
PF: predicated region fallthrough
CT: control target
= control target key end

     0   :  { %vm28_vm0 = vcmask 261120   ;;  %v275_v0 = vmov 0.0   ;;  %vm276_vm1 = vmmov 0   ;;  %s373_s1 = inlined_call_operand.vmem [shape: bf16[128,32], index: 1, kind: input, shape index: {}]   ;;  %s374_s0 = inlined_call_operand.vmem [shape: f32[16,128], index: 0, kind: input, shape index: {}]   ;;  %s375_s2 = inlined_call_operand.vmem [shape: f32[1,32], index: 2, kind: input, shape index: {}]   ;;  %s376_s3 = inlined_call_operand.vmem [shape: f32[16,32], index: 3, kind: input, shape index: {}]   ;;  %s377_s4 = inlined_call_operand.vmem [shape: f32[1,32], index: 4, kind: input, shape index: {}]   ;;  %s378_s5 = inlined_call_operand.vmem [shape: f32[1,32], index: 5, kind: input, shape index: {}]   ;;  %s379_s6 = inlined_call_operand.vmem [shape: f32[16,32], index: 6, kind: output, shape index: {}]  }
   0x1   :  { %241 = vmatprep.subr.bf16.mxu0 %v275_v0  ;;  %v263_v1 = vld [vmem:[%s373_s1 + $0x38] sm:$0xff]   ;;  %257 = vmatprep.mubr.msk.bf16.mxu0 %vm276_vm1, %v275_v0  ;;  %29 = vst.msk [vmem:[#allocation2] sm:$0xff] %vm28_vm0, %v275_v0  ;;  %30 = vst.msk [vmem:[#allocation2 + $0x8] sm:$0xff] %vm28_vm0, %v275_v0  ;;  %v264_v2 = vld [vmem:[%s373_s1 + $0x30] sm:$0xff]  }
   0x2   :  { %242 = vmatpush3.bf16.msra.mxu0 %v263_v1  ;;  %v265_v3 = vld [vmem:[%s373_s1 + $0x28] sm:$0xff]   ;;  %v266_v4 = vld [vmem:[%s373_s1 + $0x20] sm:$0xff]   ;;  %v267_v5 = vld [vmem:[%s373_s1 + $0x18] sm:$0xff]  }
   0x3   :  { %243 = vmatprep.subr.bf16.mxu0 %v275_v0  ;;  %v268_v6 = vld [vmem:[%s373_s1 + $0x10] sm:$0xff]   ;;  %v269_v7 = vld [vmem:[%s373_s1 + $0x8] sm:$0xff]   ;;  %v270_v8 = vld [vmem:[%s373_s1] sm:$0xff]  }
   0x4   :  { %v33_v9 = vld [vmem:[%s374_s0] sm:$0xff]  ;;  %v34_v10 = vld [vmem:[%s374_s0 + $0x8] sm:$0xff] }
   0x5   :  { %v35_v11 = vpack.c.bf16 %v34_v10, %v33_v9  ;;  %v229_v20 = vld [vmem:[%s375_s2] ss:$0 sm:$0xff]  ;;  %v161_v26 = vld [vmem:[%s376_s3 + $0x8] sm:$0xff] }
   0x6   :  { %244 = vmatpush3.bf16.msra.mxu0 %v264_v2  ;;  %v160_v22 = vld [vmem:[%s376_s3] sm:$0xff] }
   0x7   :  { %245 = vmatprep.subr.bf16.mxu0 %v275_v0  ;;  %v230_v53 = vld [vmem:[%s377_s4] ss:$0 sm:$0xff] }
   0x8   :  { %v31_v12 = vld [vmem:[#allocation2] sm:$0xff]  ;;  %v32_v16 = vld [vmem:[#allocation2 + $0x8] sm:$0xff] }
   0x9   :  { %v231_v55 = vld [vmem:[%s378_s5] ss:$0 sm:$0xff] }
   0xa   :  { %246 = vmatpush3.bf16.msra.mxu0 %v265_v3 }
   0xb   :  { %247 = vmatprep.subr.bf16.mxu0 %v275_v0 }
   0xe   :  { %248 = vmatpush3.bf16.msra.mxu0 %v266_v4 }
   0xf   :  { %249 = vmatprep.subr.bf16.mxu0 %v275_v0 }
  0x12   :  { %250 = vmatpush3.bf16.msra.mxu0 %v267_v5 }
  0x13   :  { %251 = vmatprep.subr.bf16.mxu0 %v275_v0 }
  0x16   :  { %252 = vmatpush3.bf16.msra.mxu0 %v268_v6 }
  0x17   :  { %253 = vmatprep.subr.bf16.mxu0 %v275_v0 }
  0x1a   :  { %254 = vmatpush3.bf16.msra.mxu0 %v269_v7 }
  0x1b   :  { %255 = vmatprep.subr.bf16.mxu0 %v275_v0 }
  0x1e   :  { %256 = vmatpush3.bf16.msra.mxu0 %v270_v8 }
  0x21   :  { %258 = vmatmul.mubr.bf16.vlgmr.msra.gmra.mxu0 %v35_v11 }
  0xe1   :  { %v134_v13 = vpop.f32.mrf.mxu0 }
  0xe2   :  { %v141_v14 = vadd.f32 %v134_v13, %v31_v12 }
  0xe3   :  { %v259_v15 = vpop.f32.mrf.mxu0 }
  0xe4   :  { %144 = vst.msk [vmem:[#allocation2] sm:$0xff] %vm28_vm0, %v141_v14 }
  0xe5   :  { %v137_v17 = vpop.f32.mrf.mxu0 }
  0xe6   :  { %v142_v18 = vadd.f32 %v137_v17, %v32_v16 }
  0xe7   :  { %v260_v19 = vpop.f32.mrf.mxu0 }
  0xe8   :  { %145 = vst.msk [vmem:[#allocation2 + $0x8] sm:$0xff] %vm28_vm0, %v142_v18 }
  0xeb   :  { %v149_v21 = vld [vmem:[#allocation2] sm:$0xff] }
  0xec   :  { %v158_v23 = vadd.f32 %v229_v20, %v149_v21 }
  0xee   :  { %v162_v24 = vadd.f32 %v160_v22, %v158_v23 }
  0xef   :  { %v150_v25 = vld [vmem:[#allocation2 + $0x8] sm:$0xff] }
  0xf0   :  { %v164_v27 = vsel %vm28_vm0, %v162_v24, 0.0  ;;  %v173_v28 = vmul.f32 %v162_v24, %v162_v24  ;;  %v159_v29 = vadd.f32 %v229_v20, %v150_v25 }
  0xf1   :  { %165 = vadd.xlane.f32.xlu0 %v164_v27 }
  0xf2   :  { %v175_v30 = vsel %vm28_vm0, %v173_v28, 0.0  ;;  %v163_v31 = vadd.f32 %v161_v26, %v159_v29 }
  0xf3   :  { %176 = vadd.xlane.f32.xlu1 %v175_v30 }
  0xf4   :  { %v167_v32 = vsel %vm28_vm0, %v163_v31, 0.0  ;;  %v174_v33 = vmul.f32 %v163_v31, %v163_v31 }
  0xf5   :  { %168 = vadd.xlane.f32.xlu0 %v167_v32 }
  0xf6   :  { %v178_v34 = vsel %vm28_vm0, %v174_v33, 0.0 }
  0xf7   :  { %179 = vadd.xlane.f32.xlu1 %v178_v34 }
 0x17a   :  { %v166_v35 = vpop.xlane.xlu0 %165 }
 0x17b   :  { %v171_v36 = vmul.f32 0.03125, %v166_v35 }
 0x17c   :  { %v177_v37 = vpop.xlane.xlu1 %176 }
 0x17d   :  { %v183_v38 = vmul.f32 %v171_v36, %v171_v36  ;;  %v181_v39 = vmul.f32 0.03125, %v177_v37  ;;  %v189_v51 = vsub.f32 %v162_v24, %v171_v36 }
 0x17e   :  { %v169_v40 = vpop.xlane.xlu0 %168 }
 0x17f   :  { %v185_v41 = vsub.f32 %v181_v39, %v183_v38  ;;  %v172_v42 = vmul.f32 0.03125, %v169_v40 }
 0x180   :  { %v180_v43 = vpop.xlane.xlu1 %179 }
 0x181   :  { %v187_v44 = vmax.f32 %v185_v41, 0.0  ;;  %v184_v45 = vmul.f32 %v172_v42, %v172_v42  ;;  %v182_v46 = vmul.f32 0.03125, %v180_v43  ;;  %v190_v57 = vsub.f32 %v163_v31, %v172_v42 }
 0x183   :  { %v191_v47 = vadd.f32 1e-05, %v187_v44  ;;  %v186_v48 = vsub.f32 %v182_v46, %v184_v45 }
 0x185   :  { %271 = vrsqrt.f32 %v191_v47  ;;  %v188_v49 = vmax.f32 %v186_v48, 0.0 }
 0x187   :  { %v192_v50 = vadd.f32 1e-05, %v188_v49 }
 0x189   :  { %273 = vrsqrt.f32 %v192_v50 }
 0x192   :  { %v272_v52 = vpop.eup %271 }
 0x193   :  { %v195_v54 = vmul.f32 %v272_v52, %v189_v51 }
 0x195   :  { %v204_v56 = vmul.f32 %v230_v53, %v195_v54 }
 0x196   :  { %v274_v58 = vpop.eup %273 }
 0x197   :  { %v213_v59 = vadd.f32 %v231_v55, %v204_v56  ;;  %v196_v60 = vmul.f32 %v274_v58, %v190_v57 }
 0x199   :  { %215 = vst.msk [vmem:[%s379_s6] sm:$0xff] %vm28_vm0, %v213_v59  ;;  %v205_v61 = vmul.f32 %v230_v53, %v196_v60 }
 0x19b   :  { %v214_v62 = vadd.f32 %v231_v55, %v205_v61 }
 0x19d   :  { %216 = vst.msk [vmem:[%s379_s6 + $0x8] sm:$0xff] %vm28_vm0, %v214_v62 }

// kernel: custom-call
= control target key start
LH: loop header
LB: loop body
LE: loop exit
PB: predicated region body
PF: predicated region fallthrough
CT: control target
= control target key end

     0   :  { %s92_s0 = inlined_call_operand.vmem [shape: f32[2,8,8], index: 0, kind: input, shape index: {}]   ;;  %s93_s1 = inlined_call_operand.vmem [shape: f32[2,8,8], index: 1, kind: input, shape index: {}]   ;;  %s94_s2 = inlined_call_operand.hbm [shape: c64[2,8,8], index: 2, kind: output, shape index: {}]  }
   0x1   :  { %s3_s11 = scalar_lea.hbm %s94_s2, 256 }
   0x2   :  { %4 = vsyncpa [#allocation0], 0  ;;  %s5_s14 = sshll.u32 %s92_s0, 4  ;;  %s6_s14 = int_to_ptr.vmem [resolvable:$true] %s5_s14 }
   0x3   :  { %s18_s15 = scalar_lea.vmem %s6_s14, 256  ;;  %p23_p1 = scmp.lt.s32.totalorder %s6_s14, %s6_s14 }
   0x4   :  { %p19_p0 = scmp.ne.s32.totalorder %s6_s14, %s18_s15  ;;  %p24_p2 = scmp.lt.s32.totalorder %s18_s15, %s18_s15 }
   0x6   :  { %p25_p3 = por %p24_p2, %p23_p1 }
   0x8   :  { %p26_p4 = pnand %p25_p3, %p19_p0 }
   0xa   :  { %29 = shalt.err (!%p26_p4)  }
   0xb   :  { %8 = dma.vmem_to_hbm [thread:$0]  %s6_s14, 256, %s94_s2, [#allocation0] }
   0xc   :  { %61 = dma.done.wait [#allocation0], 256  }
   0xd   :  { %62 = vsyncadd [#allocation0], 4294967040 }
   0xe   :  { %10 = vsyncpa [#allocation0], 1 }
   0xf   :  { %11 = vsyncpa [#allocation1], 0  ;;  %s12_s0 = sshll.u32 %s93_s1, 4  ;;  %s13_s0 = int_to_ptr.vmem [resolvable:$true] %s12_s0 }
  0x10   :  { %s38_s20 = scalar_lea.vmem %s13_s0, 256  ;;  %p43_p6 = scmp.lt.s32.totalorder %s13_s0, %s13_s0 }
  0x11   :  { %p39_p5 = scmp.ne.s32.totalorder %s13_s0, %s38_s20  ;;  %p44_p7 = scmp.lt.s32.totalorder %s38_s20, %s38_s20 }
  0x13   :  { %p45_p8 = por %p44_p7, %p43_p6 }
  0x15   :  { %p46_p9 = pnand %p45_p8, %p39_p5 }
  0x17   :  { %49 = shalt.err (!%p46_p9)  }
  0x18   :  { %15 = dma.vmem_to_hbm [thread:$0]  %s13_s0, 256, %s3_s11, [#allocation1] }
  0x19   :  { %63 = dma.done.wait [#allocation1], 256  }
  0x1a   :  { %64 = vsyncadd [#allocation1], 4294967040 }
  0x1b   :  { %17 = vsyncpa [#allocation1], 1 }

// kernel: hetereo_moe_semcom_forward.73
= control target key start
LH: loop header
LB: loop body
LE: loop exit
PB: predicated region body
PF: predicated region fallthrough
CT: control target
= control target key end

     0   :  { %v170_v1 = vmov 0.0   ;;  %vm171_vm0 = vmmov 0   ;;  %vm20_vm1 = vcmask 523264   ;;  %s219_s0 = inlined_call_operand.vmem [shape: f32[16,32], index: 0, kind: input, shape index: {}]   ;;  %s220_s1 = inlined_call_operand.vmem [shape: bf16[32,64], index: 1, kind: input, shape index: {}]   ;;  %s221_s2 = inlined_call_operand.vmem [shape: f32[1,64], index: 2, kind: input, shape index: {}]   ;;  %s222_s3 = inlined_call_operand.hbm [shape: f32[16,64], index: 3, kind: output, shape index: {}]  }
   0x1   :  { %v146_v0 = vld [vmem:[%s220_s1 + $0x8] sm:$0xff]   ;;  %133 = vmatprep.subr.bf16.mxu0 %v170_v1  ;;  %v147_v2 = vld [vmem:[%s220_s1] sm:$0xff]   ;;  %137 = vmatprep.mubr.msk.bf16.mxu0 %vm171_vm0, %v170_v1 }
   0x2   :  { %134 = vmatpush3.bf16.msra.mxu0 %v146_v0  ;;  %v25_v3 = vld [vmem:[%s219_s0] sm:$0xff]  ;;  %v26_v4 = vld [vmem:[%s219_s0 + $0x8] sm:$0xff] }
   0x3   :  { %8 = vsyncpa [#allocation4], 0  ;;  %135 = vmatprep.subr.bf16.mxu0 %v170_v1  ;;  %21 = vst.msk [vmem:[#allocation2] sm:$0xff] %vm20_vm1, %v170_v1  ;;  %v27_v5 = vpack.c.bf16 %v26_v4, %v25_v3  ;;  %vm44_vm2 = vcmask 261120   ;;  %v129_v14 = vld [vmem:[%s221_s2] ss:$0 sm:$0xff] }
   0x4   :  { %22 = vst.msk [vmem:[#allocation2 + $0x8] sm:$0xff] %vm20_vm1, %v170_v1  ;;  %s172_s20 = smov [#allocation3]  }
   0x5   :  { %s115_s21 = sshll.u32 %s172_s20, 4  ;;  %s116_s21 = int_to_ptr.vmem [resolvable:$true] %s115_s21 }
   0x6   :  { %136 = vmatpush3.bf16.msra.mxu0 %v147_v2  ;;  %s148_s22 = scalar_lea.vmem %s116_s21, 256  ;;  %p153_p1 = scmp.lt.s32.totalorder %s116_s21, %s116_s21 }
   0x7   :  { %p149_p0 = scmp.ne.s32.totalorder %s116_s21, %s148_s22  ;;  %p154_p2 = scmp.lt.s32.totalorder %s148_s22, %s148_s22 }
   0x9   :  { %138 = vmatmul.mubr.msk.bf16.vlgmr.msra.gmra.mxu0 %vm44_vm2, %v27_v5  ;;  %p155_p3 = por %p154_p2, %p153_p1 }
   0xa   :  { %v23_v6 = vld [vmem:[#allocation2] sm:$0xff] }
   0xb   :  { %v24_v10 = vld [vmem:[#allocation2 + $0x8] sm:$0xff]  ;;  %p156_p4 = pnand %p155_p3, %p149_p0 }
  0xc9   :  { %v82_v7 = vpop.f32.mrf.mxu0 }
  0xca   :  { %v89_v8 = vadd.f32 %v82_v7, %v23_v6 }
  0xcb   :  { %v139_v9 = vpop.f32.mrf.mxu0 }
  0xcc   :  { %92 = vst.msk [vmem:[#allocation2] sm:$0xff] %vm20_vm1, %v89_v8 }
  0xcd   :  { %v85_v11 = vpop.f32.mrf.mxu0 }
  0xce   :  { %v90_v12 = vadd.f32 %v85_v11, %v24_v10 }
  0xcf   :  { %v140_v13 = vpop.f32.mrf.mxu0 }
  0xd0   :  { %93 = vst.msk [vmem:[#allocation2 + $0x8] sm:$0xff] %vm20_vm1, %v90_v12 }
  0xd3   :  { %v97_v15 = vld [vmem:[#allocation2] sm:$0xff] }
  0xd4   :  { %v106_v16 = vadd.f32 %v129_v14, %v97_v15 }
  0xd6   :  { %108 = vst.msk [vmem:[#allocation3] sm:$0xff] %vm20_vm1, %v106_v16 }
  0xd7   :  { %v98_v17 = vld [vmem:[#allocation2 + $0x8] sm:$0xff] }
  0xd8   :  { %v107_v18 = vadd.f32 %v129_v14, %v98_v17 }
  0xda   :  { %109 = vst.msk [vmem:[#allocation3 + $0x8] sm:$0xff] %vm20_vm1, %v107_v18 }
  0xdb   :  { %159 = shalt.err (!%p156_p4)
}
  0xdc   :  { %s173_s23 = smov 128   ;;  %s174_s2 = smov 8  }
  0xdd   :  { %121 = dma.vmem_to_hbm [thread:$0]  %s116_s21, 256, %s222_s3, [#allocation4], %s173_s23, %s173_s23, %s174_s2  }
  0xde   :  { %168 = dma.done.wait [#allocation4], 256  }
  0xdf   :  { %169 = vsyncadd [#allocation4], 4294967040 }
  0xe0   :  { %125 = vsyncpa [#allocation4], 1 }

</bundles_post_ra>
